<compile_context>
chip_gen: v7x
topology: tpu7x:2x2x1
jax: 0.10.0
libtpu: 0.0.40
codegen_flags: <defaults>
</compile_context>

<pallas_src>
import functools
import math

import jax
import jax.numpy as jnp
from jax import lax
from jax.experimental import pallas as pl
from jax.experimental.pallas import tpu as pltpu


# --------------------------- in-kernel helpers ---------------------------

def _layernorm(h, g, b, eps):
    """LayerNorm over last dim; h: (rows, E) f32, g/b: (1, E)."""
    mean = jnp.mean(h, axis=-1, keepdims=True)
    var = jnp.mean(jnp.square(h - mean), axis=-1, keepdims=True)
    return (h - mean) * lax.rsqrt(var + eps) * g + b


def _mha(q2, k2, v2, w_out_t, b_out, B, T, num_heads):
    """Multi-head attention core + fused out-projection.

    q2/k2/v2: (B*T, E) projected q/k/v (rows grouped batch-major).
    Returns (B*T, E) = concat_heads(softmax(qk^T/sqrt(hd)) v) @ Wo^T + bo,
    implemented as a per-head accumulation into the out-projection (no concat).
    """
    E = q2.shape[-1]
    hd = E // num_heads
    scale = 1.0 / math.sqrt(hd)
    q3 = q2.reshape(B, T, E)
    k3 = k2.reshape(B, T, E)
    v3 = v2.reshape(B, T, E)
    out = jnp.zeros((B * T, w_out_t.shape[-1]), jnp.float32)
    for h in range(num_heads):                      # static unroll, H small
        sl = slice(h * hd, (h + 1) * hd)
        qh = q3[:, :, sl] * scale                   # (B, T, hd)
        kh = k3[:, :, sl]
        vh = v3[:, :, sl]
        # contract on head_dim directly (no in-VMEM transpose of K)
        s = jnp.einsum('bqd,bkd->bqk', qh, kh,
                       preferred_element_type=jnp.float32)       # (B, T, T)
        s = s - jnp.max(s, axis=-1, keepdims=True)
        p = jnp.exp(s)
        p = p * pl.reciprocal(jnp.sum(p, axis=-1, keepdims=True), approx=True)
        oh = jnp.einsum('bqk,bkd->bqd', p, vh,
                        preferred_element_type=jnp.float32)      # (B, T, hd)
        out = out + jnp.dot(oh.reshape(B * T, hd), w_out_t[sl, :],
                            preferred_element_type=jnp.float32)
    return out + b_out


# ------------------------------ Pallas kernels ------------------------------

def _prepare_streams_kernel(v_ref, p_ref, wv_ref, wp_ref, b_ref, o_ref):
    """Builds the stacked (3, B, T, D) streams: [visual, physio, out_layer_pv(cat)]."""
    B, T, D = v_ref.shape
    v = v_ref[...]
    p = p_ref[...]
    joint = (jnp.dot(v.astype(jnp.float32).reshape(B * T, D), wv_ref[...],
                     preferred_element_type=jnp.float32)
             + jnp.dot(p.astype(jnp.float32).reshape(B * T, D), wp_ref[...],
                       preferred_element_type=jnp.float32)
             + b_ref[...])
    o_ref[0] = v
    o_ref[1] = p
    o_ref[2] = joint.reshape(B, T, D).astype(o_ref.dtype)


def _encoder_layer_kernel(x_ref, w_in_ref, b_in_ref, w_out_ref, b_out_ref,
                          ln1g_ref, ln1b_ref, w1_ref, b1_ref, w2_ref, b2_ref,
                          ln2g_ref, ln2b_ref, o_ref, *, num_heads, eps):
    """One full TransformerEncoderLayer for one stream (grid axis = stream)."""
    _, B, T, E = x_ref.shape
    BT = B * T
    x2 = x_ref[0].astype(jnp.float32).reshape(BT, E)

    # fused QKV projection: single MXU call with the full in_proj weight
    qkv = jnp.dot(x2, w_in_ref[0], preferred_element_type=jnp.float32) + b_in_ref[0]
    q2 = qkv[:, :E]
    k2 = qkv[:, E:2 * E]
    v2 = qkv[:, 2 * E:]

    attn = _mha(q2, k2, v2, w_out_ref[0], b_out_ref[0], B, T, num_heads)

    h1 = _layernorm(x2 + attn, ln1g_ref[0], ln1b_ref[0], eps)
    ff_hidden = jnp.maximum(
        jnp.dot(h1, w1_ref[0], preferred_element_type=jnp.float32) + b1_ref[0], 0.0)
    ff = jnp.dot(ff_hidden, w2_ref[0], preferred_element_type=jnp.float32) + b2_ref[0]
    h2 = _layernorm(h1 + ff, ln2g_ref[0], ln2b_ref[0], eps)

    o_ref[0] = h2.reshape(B, T, E).astype(o_ref.dtype)


def _cross_attention_kernel(qidx_ref, kidx_ref, pidx_ref,      # scalar prefetch
                            q_ref, kv_ref, w_in_ref, b_in_ref,
                            w_out_ref, b_out_ref, o_ref, *, num_heads):
    """Fused MHA for one (query-stream, kv-stream, param-module) combo."""
    del qidx_ref, kidx_ref, pidx_ref   # consumed by the index_maps
    _, B, T, E = q_ref.shape
    BT = B * T
    q_in = q_ref[0].astype(jnp.float32).reshape(BT, E)
    kv_in = kv_ref[0].astype(jnp.float32).reshape(BT, E)
    w_in = w_in_ref[0]                 # (E, 3E)  [Wq^T | Wk^T | Wv^T]
    b_in = b_in_ref[0]                 # (1, 3E)

    q2 = jnp.dot(q_in, w_in[:, :E], preferred_element_type=jnp.float32) + b_in[:, :E]
    kv2 = jnp.dot(kv_in, w_in[:, E:], preferred_element_type=jnp.float32) + b_in[:, E:]
    k2 = kv2[:, :E]
    v2 = kv2[:, E:]

    attn = _mha(q2, k2, v2, w_out_ref[0], b_out_ref[0], B, T, num_heads)
    o_ref[0] = attn.reshape(B, T, E).astype(o_ref.dtype)


def _out_proj6_kernel(x_ref, w_ref, b_ref, o_ref):
    """out_layer1: sum_i x[i] @ W1_t[i] + b  == concat_i(x[i]) @ W1^T + b."""
    C, B, T, D = x_ref.shape
    BT = B * T
    acc = jnp.zeros((BT, w_ref.shape[-1]), jnp.float32)
    for i in range(C):                                 # static unroll, C == 6
        acc = acc + jnp.dot(x_ref[i].astype(jnp.float32).reshape(BT, D), w_ref[i],
                            preferred_element_type=jnp.float32)
    o_ref[...] = (acc + b_ref[...]).astype(o_ref.dtype)


# ------------------------------- wrappers -------------------------------

def prepare_streams(visual, physio, wv_t, wp_t, b):
    B, T, D = visual.shape
    return pl.pallas_call(
        _prepare_streams_kernel,
        out_shape=jax.ShapeDtypeStruct((3, B, T, D), visual.dtype),
        grid=(1,),
        in_specs=[pl.BlockSpec((B, T, D), lambda i: (0, 0, 0)),
                  pl.BlockSpec((B, T, D), lambda i: (0, 0, 0)),
                  pl.BlockSpec((D, D), lambda i: (0, 0)),
                  pl.BlockSpec((D, D), lambda i: (0, 0)),
                  pl.BlockSpec((1, D), lambda i: (0, 0))],
        out_specs=pl.BlockSpec((3, B, T, D), lambda i: (0, 0, 0, 0)),
    )(visual, physio, wv_t, wp_t, b)


def encoder_layer_3streams(streams, lp, num_heads):
    """Applies one TransformerEncoderLayer to all 3 streams; grid over streams."""
    S, B, T, E = streams.shape
    Hd = lp["w_ff1_t"].shape[-1]

    def bs(shape):
        return pl.BlockSpec((1,) + shape, lambda s: (s,) + (0,) * len(shape))

    kern = functools.partial(_encoder_layer_kernel, num_heads=num_heads, eps=1e-5)
    return pl.pallas_call(
        kern,
        out_shape=jax.ShapeDtypeStruct((S, B, T, E), streams.dtype),
        grid=(S,),
        in_specs=[bs((B, T, E)),
                  bs((E, 3 * E)), bs((1, 3 * E)),
                  bs((E, E)), bs((1, E)),
                  bs((1, E)), bs((1, E)),
                  bs((E, Hd)), bs((1, Hd)),
                  bs((Hd, E)), bs((1, E)),
                  bs((1, E)), bs((1, E))],
        out_specs=bs((B, T, E)),
        compiler_params=pltpu.CompilerParams(dimension_semantics=("parallel",)),
    )(streams, lp["w_in_t"], lp["b_in"], lp["w_out_t"], lp["b_out"],
      lp["ln1_g"], lp["ln1_b"], lp["w_ff1_t"], lp["b_ff1"],
      lp["w_ff2_t"], lp["b_ff2"], lp["ln2_g"], lp["ln2_b"])


def cross_attention_6(streams, q_idx, kv_idx, p_idx, cp, num_heads):
    """All six cross-attentions in one pallas_call; grid=(6,) over combos."""
    S, B, T, E = streams.shape
    kern = functools.partial(_cross_attention_kernel, num_heads=num_heads)
    grid_spec = pltpu.PrefetchScalarGridSpec(
        num_scalar_prefetch=3,
        grid=(6,),
        in_specs=[
            pl.BlockSpec((1, B, T, E), lambda i, qi, ki, pi: (qi[i], 0, 0, 0)),
            pl.BlockSpec((1, B, T, E), lambda i, qi, ki, pi: (ki[i], 0, 0, 0)),
            pl.BlockSpec((1, E, 3 * E), lambda i, qi, ki, pi: (pi[i], 0, 0)),
            pl.BlockSpec((1, 1, 3 * E), lambda i, qi, ki, pi: (pi[i], 0, 0)),
            pl.BlockSpec((1, E, E), lambda i, qi, ki, pi: (pi[i], 0, 0)),
            pl.BlockSpec((1, 1, E), lambda i, qi, ki, pi: (pi[i], 0, 0)),
        ],
        out_specs=pl.BlockSpec((1, B, T, E), lambda i, qi, ki, pi: (i, 0, 0, 0)),
    )
    return pl.pallas_call(
        kern,
        out_shape=jax.ShapeDtypeStruct((6, B, T, E), streams.dtype),
        grid_spec=grid_spec,
        compiler_params=pltpu.CompilerParams(dimension_semantics=("parallel",)),
    )(q_idx, kv_idx, p_idx, streams, streams,
      cp["w_in_t"], cp["b_in"], cp["w_out_t"], cp["b_out"])


def out_projection6(ca, w1_t6, b1):
    C, B, T, D = ca.shape
    N = w1_t6.shape[-1]
    return pl.pallas_call(
        _out_proj6_kernel,
        out_shape=jax.ShapeDtypeStruct((B * T, N), ca.dtype),
        grid=(1,),
        in_specs=[pl.BlockSpec((C, B, T, D), lambda i: (0, 0, 0, 0)),
                  pl.BlockSpec((C, D, N), lambda i: (0, 0, 0)),
                  pl.BlockSpec((1, N), lambda i: (0, 0))],
        out_specs=pl.BlockSpec((B * T, N), lambda i: (0, 0)),
    )(ca, w1_t6, b1)


# ------------------------------ model forward ------------------------------

def multimodal_transformer_forward(params, visual, physio, num_heads):
    """visual, physio: (B, T, D) -> (T, B, 2D) (FC output path)."""
    B, T, D = visual.shape

    # joint = out_layer_pv(cat(visual, physio)); stack [visual, physio, joint]
    streams = prepare_streams(visual, physio,
                              params["pv_wv_t"], params["pv_wp_t"], params["pv_b"])

    # three independent encoder stacks, one fused pallas_call per layer
    for lp in params["encoder_layers"]:
        streams = encoder_layer_3streams(streams, lp, num_heads)

    # six cross-attentions; combo order == PyTorch concat order.
    # param module sharing matches the reference: cross_attention_v for (v<-p, v<-pv),
    # cross_attention_p for (p<-v, p<-pv), cross_attention_pv for (pv<-v, pv<-p).
    q_idx = jnp.array([0, 1, 2, 0, 2, 1], jnp.int32)   # query stream
    kv_idx = jnp.array([1, 0, 0, 2, 1, 2], jnp.int32)  # key/value stream
    p_idx = jnp.array([0, 1, 2, 0, 2, 1], jnp.int32)   # param module (v, p, pv)
    ca = cross_attention_6(streams, q_idx, kv_idx, p_idx,
                           params["cross"], num_heads)          # (6, B, T, D)

    out2d = out_projection6(ca, params["out1_w_t"], params["out1_b"])   # (B*T, 2D)
    return jnp.transpose(out2d.reshape(B, T, 2 * D), (1, 0, 2))         # (T, B, 2D)


# ------------------------------ parameter init ------------------------------

def _rand(key, shape, scale=0.05):
    return jax.random.normal(key, shape, jnp.float32) * scale


def init_mha_stack(key, n, dim):
    """n stacked MHA modules, weights pre-transposed to (in, out) layout."""
    k1, k2, k3, k4 = jax.random.split(key, 4)
    return {
        "w_in_t": _rand(k1, (n, dim, 3 * dim)),
        "b_in": _rand(k2, (n, 1, 3 * dim), 0.01),
        "w_out_t": _rand(k3, (n, dim, dim)),
        "b_out": _rand(k4, (n, 1, dim), 0.01),
    }


def init_layer_stack(key, n, dim, hidden):
    k0, k1, k2, k3, k4 = jax.random.split(key, 5)
    p = init_mha_stack(k0, n, dim)
    p.update({
        "w_ff1_t": _rand(k1, (n, dim, hidden)),
        "b_ff1": _rand(k2, (n, 1, hidden), 0.01),
        "w_ff2_t": _rand(k3, (n, hidden, dim)),
        "b_ff2": _rand(k4, (n, 1, dim), 0.01),
        "ln1_g": jnp.ones((n, 1, dim), jnp.float32),
        "ln1_b": jnp.zeros((n, 1, dim), jnp.float32),
        "ln2_g": jnp.ones((n, 1, dim), jnp.float32),
        "ln2_b": jnp.zeros((n, 1, dim), jnp.float32),
    })
    return p


def init_model_params(key, dim, hidden, num_layers):
    keys = jax.random.split(key, 6 + num_layers)
    return {
        # out_layer_pv (2D -> D), split into the visual / physio halves, pre-transposed
        "pv_wv_t": _rand(keys[0], (dim, dim)),
        "pv_wp_t": _rand(keys[1], (dim, dim)),
        "pv_b": _rand(keys[2], (1, dim), 0.01),
        # per-layer params stacked over the 3 streams (visual, physio, joint)
        "encoder_layers": [init_layer_stack(keys[6 + l], 3, dim, hidden)
                           for l in range(num_layers)],
        # the 3 cross-attention modules (v, p, pv) stacked
        "cross": init_mha_stack(keys[3], 3, dim),
        # out_layer1 (6D -> 2D), transposed and reshaped to (6, D, 2D)
        "out1_w_t": _rand(keys[4], (6, dim, 2 * dim)),
        "out1_b": _rand(keys[5], (1, 2 * dim), 0.01),
    }


# ---------------------------------- main ----------------------------------

if __name__ == "__main__":
    B, T, D = 2, 8, 32          # batch, seq, visual_dim = audio_dim
    NUM_HEADS, HIDDEN, LAYERS = 4, 64, 2

    root = jax.random.PRNGKey(0)
    k_params, k_v, k_p = jax.random.split(root, 3)

    params = init_model_params(k_params, D, HIDDEN, LAYERS)
    visual = jax.random.normal(k_v, (B, T, D), jnp.float32)
    physio = jax.random.normal(k_p, (B, T, D), jnp.float32)

    fwd = jax.jit(functools.partial(multimodal_transformer_forward,
                                    num_heads=NUM_HEADS))
    out = jax.block_until_ready(fwd(params, visual, physio))
    assert out.shape == (T, B, 2 * D), out.shape
    assert bool(jnp.all(jnp.isfinite(out)))
    print("KERNEL_OK")
</pallas_src>

<mosaic_0001>
module attributes {stable_mosaic.version = 11 : i64} {
  func.func @_prepare_streams_kernel(%arg0: i32, %arg1: memref<2x8x32xf32, #tpu.memory_space<vmem>>, %arg2: memref<2x8x32xf32, #tpu.memory_space<vmem>>, %arg3: memref<32x32xf32, #tpu.memory_space<vmem>>, %arg4: memref<32x32xf32, #tpu.memory_space<vmem>>, %arg5: memref<1x32xf32, #tpu.memory_space<vmem>>, %arg6: memref<3x2x8x32xf32, #tpu.memory_space<vmem>>) attributes {dimension_semantics = [#tpu.dimension_semantics<arbitrary>], iteration_bounds = array<i64: 1>, scalar_prefetch = 0 : i64, scratch_operands = 0 : i64, tpu.core_type = #tpu.core_type<tc>, window_params = [{pipeline_mode = #tpu.pipeline_mode<synchronous>, transform_indices = @transform_0, window_bounds = array<i64: 2, 8, 32>}, {pipeline_mode = #tpu.pipeline_mode<synchronous>, transform_indices = @transform_1, window_bounds = array<i64: 2, 8, 32>}, {pipeline_mode = #tpu.pipeline_mode<synchronous>, transform_indices = @transform_2, window_bounds = array<i64: 32, 32>}, {pipeline_mode = #tpu.pipeline_mode<synchronous>, transform_indices = @transform_3, window_bounds = array<i64: 32, 32>}, {pipeline_mode = #tpu.pipeline_mode<synchronous>, transform_indices = @transform_4, window_bounds = array<i64: 1, 32>}, {pipeline_mode = #tpu.pipeline_mode<synchronous>, transform_indices = @transform_5, window_bounds = array<i64: 3, 2, 8, 32>}]} {
    %c0 = arith.constant 0 : index
    %c0_0 = arith.constant 0 : index
    %c0_1 = arith.constant 0 : index
    %0 = vector.load %arg1[%c0, %c0_0, %c0_1] : memref<2x8x32xf32, #tpu.memory_space<vmem>>, vector<2x8x32xf32>
    %c0_2 = arith.constant 0 : index
    %c0_3 = arith.constant 0 : index
    %c0_4 = arith.constant 0 : index
    %1 = vector.load %arg2[%c0_2, %c0_3, %c0_4] : memref<2x8x32xf32, #tpu.memory_space<vmem>>, vector<2x8x32xf32>
    %2 = vector.shape_cast %0 : vector<2x8x32xf32> to vector<16x32xf32>
    %c0_5 = arith.constant 0 : index
    %c0_6 = arith.constant 0 : index
    %3 = vector.load %arg3[%c0_5, %c0_6] : memref<32x32xf32, #tpu.memory_space<vmem>>, vector<32x32xf32>
    %cst = arith.constant dense<0.000000e+00> : vector<16x32xf32>
    %4 = tpu.matmul %2, %3, %cst {dimension_numbers = #tpu.dot_dimension_numbers<[1], [0], [0], [1], [0, 0, 1, 1], [], []>} : vector<16x32xf32>, vector<32x32xf32>, vector<16x32xf32> -> vector<16x32xf32>
    %5 = vector.shape_cast %1 : vector<2x8x32xf32> to vector<16x32xf32>
    %c0_7 = arith.constant 0 : index
    %c0_8 = arith.constant 0 : index
    %6 = vector.load %arg4[%c0_7, %c0_8] : memref<32x32xf32, #tpu.memory_space<vmem>>, vector<32x32xf32>
    %cst_9 = arith.constant dense<0.000000e+00> : vector<16x32xf32>
    %7 = tpu.matmul %5, %6, %cst_9 {dimension_numbers = #tpu.dot_dimension_numbers<[1], [0], [0], [1], [0, 0, 1, 1], [], []>} : vector<16x32xf32>, vector<32x32xf32>, vector<16x32xf32> -> vector<16x32xf32>
    %8 = arith.addf %4, %7 : vector<16x32xf32>
    %c0_10 = arith.constant 0 : index
    %c0_11 = arith.constant 0 : index
    %9 = vector.load %arg5[%c0_10, %c0_11] : memref<1x32xf32, #tpu.memory_space<vmem>>, vector<1x32xf32>
    %10 = vector.broadcast %9 : vector<1x32xf32> to vector<16x32xf32>
    %11 = arith.addf %8, %10 : vector<16x32xf32>
    %c0_12 = arith.constant 0 : index
    %c0_13 = arith.constant 0 : index
    %c0_14 = arith.constant 0 : index
    %c0_15 = arith.constant 0 : index
    %12 = vector.load %arg6[%c0_12, %c0_13, %c0_14, %c0_15] : memref<3x2x8x32xf32, #tpu.memory_space<vmem>>, vector<1x2x8x32xf32>
    %13 = vector.shape_cast %12 : vector<1x2x8x32xf32> to vector<2x8x32xf32>
    %14 = vector.shape_cast %0 : vector<2x8x32xf32> to vector<1x2x8x32xf32>
    tpu.vector_store %arg6[%c0_12, %c0_13, %c0_14, %c0_15], %14 {strides = array<i32>} : memref<3x2x8x32xf32, #tpu.memory_space<vmem>>, vector<1x2x8x32xf32>,
    %c1 = arith.constant 1 : index
    %c0_16 = arith.constant 0 : index
    %c0_17 = arith.constant 0 : index
    %c0_18 = arith.constant 0 : index
    %15 = vector.load %arg6[%c1, %c0_16, %c0_17, %c0_18] : memref<3x2x8x32xf32, #tpu.memory_space<vmem>>, vector<1x2x8x32xf32>
    %16 = vector.shape_cast %15 : vector<1x2x8x32xf32> to vector<2x8x32xf32>
    %17 = vector.shape_cast %1 : vector<2x8x32xf32> to vector<1x2x8x32xf32>
    tpu.vector_store %arg6[%c1, %c0_16, %c0_17, %c0_18], %17 {strides = array<i32>} : memref<3x2x8x32xf32, #tpu.memory_space<vmem>>, vector<1x2x8x32xf32>,
    %18 = vector.shape_cast %11 : vector<16x32xf32> to vector<2x8x32xf32>
    %c2 = arith.constant 2 : index
    %c0_19 = arith.constant 0 : index
    %c0_20 = arith.constant 0 : index
    %c0_21 = arith.constant 0 : index
    %19 = vector.load %arg6[%c2, %c0_19, %c0_20, %c0_21] : memref<3x2x8x32xf32, #tpu.memory_space<vmem>>, vector<1x2x8x32xf32>
    %20 = vector.shape_cast %19 : vector<1x2x8x32xf32> to vector<2x8x32xf32>
    %21 = vector.shape_cast %18 : vector<2x8x32xf32> to vector<1x2x8x32xf32>
    tpu.vector_store %arg6[%c2, %c0_19, %c0_20, %c0_21], %21 {strides = array<i32>} : memref<3x2x8x32xf32, #tpu.memory_space<vmem>>, vector<1x2x8x32xf32>,
    return
  }
  func.func @transform_0(%arg0: i32) -> (i32, i32, i32) {
    %c0_i32 = arith.constant 0 : i32
    %c0_i32_0 = arith.constant 0 : i32
    %c0_i32_1 = arith.constant 0 : i32
    %c0_i32_2 = arith.constant 0 : i32
    return %c0_i32, %c0_i32_0, %c0_i32_1 : i32, i32, i32
  }
  func.func @transform_1(%arg0: i32) -> (i32, i32, i32) {
    %c0_i32 = arith.constant 0 : i32
    %c0_i32_0 = arith.constant 0 : i32
    %c0_i32_1 = arith.constant 0 : i32
    %c0_i32_2 = arith.constant 0 : i32
    return %c0_i32, %c0_i32_0, %c0_i32_1 : i32, i32, i32
  }
  func.func @transform_2(%arg0: i32) -> (i32, i32) {
    %c0_i32 = arith.constant 0 : i32
    %c0_i32_0 = arith.constant 0 : i32
    %c0_i32_1 = arith.constant 0 : i32
    return %c0_i32, %c0_i32_0 : i32, i32
  }
  func.func @transform_3(%arg0: i32) -> (i32, i32) {
    %c0_i32 = arith.constant 0 : i32
    %c0_i32_0 = arith.constant 0 : i32
    %c0_i32_1 = arith.constant 0 : i32
    return %c0_i32, %c0_i32_0 : i32, i32
  }
  func.func @transform_4(%arg0: i32) -> (i32, i32) {
    %c0_i32 = arith.constant 0 : i32
    %c0_i32_0 = arith.constant 0 : i32
    %c0_i32_1 = arith.constant 0 : i32
    return %c0_i32, %c0_i32_0 : i32, i32
  }
  func.func @transform_5(%arg0: i32) -> (i32, i32, i32, i32) {
    %c0_i32 = arith.constant 0 : i32
    %c0_i32_0 = arith.constant 0 : i32
    %c0_i32_1 = arith.constant 0 : i32
    %c0_i32_2 = arith.constant 0 : i32
    %c0_i32_3 = arith.constant 0 : i32
    return %c0_i32, %c0_i32_0, %c0_i32_1, %c0_i32_2 : i32, i32, i32, i32
  }
}

module attributes {stable_mosaic.version = 11 : i64} {
  func.func @_encoder_layer_kernel(%arg0: i32, %arg1: memref<1x2x8x32xf32, #tpu.memory_space<vmem>>, %arg2: memref<1x32x96xf32, #tpu.memory_space<vmem>>, %arg3: memref<1x1x96xf32, #tpu.memory_space<vmem>>, %arg4: memref<1x32x32xf32, #tpu.memory_space<vmem>>, %arg5: memref<1x1x32xf32, #tpu.memory_space<vmem>>, %arg6: memref<1x1x32xf32, #tpu.memory_space<vmem>>, %arg7: memref<1x1x32xf32, #tpu.memory_space<vmem>>, %arg8: memref<1x32x64xf32, #tpu.memory_space<vmem>>, %arg9: memref<1x1x64xf32, #tpu.memory_space<vmem>>, %arg10: memref<1x64x32xf32, #tpu.memory_space<vmem>>, %arg11: memref<1x1x32xf32, #tpu.memory_space<vmem>>, %arg12: memref<1x1x32xf32, #tpu.memory_space<vmem>>, %arg13: memref<1x1x32xf32, #tpu.memory_space<vmem>>, %arg14: memref<1x2x8x32xf32, #tpu.memory_space<vmem>>) attributes {dimension_semantics = [#tpu.dimension_semantics<parallel>], iteration_bounds = array<i64: 3>, scalar_prefetch = 0 : i64, scratch_operands = 0 : i64, tpu.core_type = #tpu.core_type<tc>, window_params = [{transform_indices = @transform_0, window_bounds = array<i64: 1, 2, 8, 32>}, {transform_indices = @transform_1, window_bounds = array<i64: 1, 32, 96>}, {transform_indices = @transform_2, window_bounds = array<i64: 1, 1, 96>}, {transform_indices = @transform_3, window_bounds = array<i64: 1, 32, 32>}, {transform_indices = @transform_4, window_bounds = array<i64: 1, 1, 32>}, {transform_indices = @transform_5, window_bounds = array<i64: 1, 1, 32>}, {transform_indices = @transform_6, window_bounds = array<i64: 1, 1, 32>}, {transform_indices = @transform_7, window_bounds = array<i64: 1, 32, 64>}, {transform_indices = @transform_8, window_bounds = array<i64: 1, 1, 64>}, {transform_indices = @transform_9, window_bounds = array<i64: 1, 64, 32>}, {transform_indices = @transform_10, window_bounds = array<i64: 1, 1, 32>}, {transform_indices = @transform_11, window_bounds = array<i64: 1, 1, 32>}, {transform_indices = @transform_12, window_bounds = array<i64: 1, 1, 32>}, {transform_indices = @transform_13, window_bounds = array<i64: 1, 2, 8, 32>}]} {
    %c0 = arith.constant 0 : index
    %c0_0 = arith.constant 0 : index
    %c0_1 = arith.constant 0 : index
    %c0_2 = arith.constant 0 : index
    %0 = vector.load %arg1[%c0, %c0_0, %c0_1, %c0_2] : memref<1x2x8x32xf32, #tpu.memory_space<vmem>>, vector<1x2x8x32xf32>
    %1 = vector.shape_cast %0 : vector<1x2x8x32xf32> to vector<2x8x32xf32>
    %2 = vector.shape_cast %1 : vector<2x8x32xf32> to vector<16x32xf32>
    %c0_3 = arith.constant 0 : index
    %c0_4 = arith.constant 0 : index
    %c0_5 = arith.constant 0 : index
    %3 = vector.load %arg2[%c0_3, %c0_4, %c0_5] : memref<1x32x96xf32, #tpu.memory_space<vmem>>, vector<1x32x96xf32>
    %4 = vector.shape_cast %3 : vector<1x32x96xf32> to vector<32x96xf32>
    %cst = arith.constant dense<0.000000e+00> : vector<16x96xf32>
    %5 = tpu.matmul %2, %4, %cst {dimension_numbers = #tpu.dot_dimension_numbers<[1], [0], [0], [1], [0, 0, 1, 1], [], []>} : vector<16x32xf32>, vector<32x96xf32>, vector<16x96xf32> -> vector<16x96xf32>
    %c0_6 = arith.constant 0 : index
    %c0_7 = arith.constant 0 : index
    %c0_8 = arith.constant 0 : index
    %6 = vector.load %arg3[%c0_6, %c0_7, %c0_8] : memref<1x1x96xf32, #tpu.memory_space<vmem>>, vector<1x1x96xf32>
    %7 = vector.shape_cast %6 : vector<1x1x96xf32> to vector<1x96xf32>
    %8 = vector.broadcast %7 : vector<1x96xf32> to vector<16x96xf32>
    %9 = arith.addf %5, %8 : vector<16x96xf32>
    %10 = vector.extract_strided_slice %9 {offsets = [0, 0], sizes = [16, 32], strides = [1, 1]} : vector<16x96xf32> to vector<16x32xf32>
    %11 = vector.extract_strided_slice %9 {offsets = [0, 32], sizes = [16, 32], strides = [1, 1]} : vector<16x96xf32> to vector<16x32xf32>
    %12 = vector.extract_strided_slice %9 {offsets = [0, 64], sizes = [16, 32], strides = [1, 1]} : vector<16x96xf32> to vector<16x32xf32>
    %c0_9 = arith.constant 0 : index
    %c0_10 = arith.constant 0 : index
    %c0_11 = arith.constant 0 : index
    %13 = vector.load %arg4[%c0_9, %c0_10, %c0_11] : memref<1x32x32xf32, #tpu.memory_space<vmem>>, vector<1x32x32xf32>
    %14 = vector.shape_cast %13 : vector<1x32x32xf32> to vector<32x32xf32>
    %c0_12 = arith.constant 0 : index
    %c0_13 = arith.constant 0 : index
    %c0_14 = arith.constant 0 : index
    %15 = vector.load %arg5[%c0_12, %c0_13, %c0_14] : memref<1x1x32xf32, #tpu.memory_space<vmem>>, vector<1x1x32xf32>
    %16 = vector.shape_cast %15 : vector<1x1x32xf32> to vector<1x32xf32>
    %17 = vector.shape_cast %10 : vector<16x32xf32> to vector<2x8x32xf32>
    %18 = vector.shape_cast %11 : vector<16x32xf32> to vector<2x8x32xf32>
    %19 = vector.shape_cast %12 : vector<16x32xf32> to vector<2x8x32xf32>
    %cst_15 = arith.constant 0.000000e+00 : f32
    %20 = vector.broadcast %cst_15 : f32 to vector<16x32xf32>
    %21 = vector.extract_strided_slice %17 {offsets = [0, 0, 0], sizes = [2, 8, 8], strides = [1, 1, 1]} : vector<2x8x32xf32> to vector<2x8x8xf32>
    %cst_16 = arith.constant 0.353553385 : f32
    %22 = vector.broadcast %cst_16 : f32 to vector<2x8x8xf32>
    %23 = arith.mulf %21, %22 : vector<2x8x8xf32>
    %24 = vector.extract_strided_slice %18 {offsets = [0, 0, 0], sizes = [2, 8, 8], strides = [1, 1, 1]} : vector<2x8x32xf32> to vector<2x8x8xf32>
    %25 = vector.extract_strided_slice %19 {offsets = [0, 0, 0], sizes = [2, 8, 8], strides = [1, 1, 1]} : vector<2x8x32xf32> to vector<2x8x8xf32>
    "tpu.trace_start"() <{level = 10 : i32, message = "bqd,bkd->bqk"}> : () -> ()
    %cst_17 = arith.constant dense<0.000000e+00> : vector<2x8x8xf32>
    %26 = tpu.matmul %23, %24, %cst_17 {dimension_numbers = #tpu.dot_dimension_numbers<[2], [2], [1], [1], [0, 0, 0, 1, 1, 1], [0], [0]>} : vector<2x8x8xf32>, vector<2x8x8xf32>, vector<2x8x8xf32> -> vector<2x8x8xf32>
    "tpu.trace_stop"() : () -> ()
    %cst_18 = arith.constant dense<0xFF800000> : vector<2x8xf32>
    %27 = vector.multi_reduction <maximumf>, %26, %cst_18 [2] : vector<2x8x8xf32> to vector<2x8xf32>
    %28 = vector.shape_cast %27 : vector<2x8xf32> to vector<2x8x1xf32>
    %29 = vector.broadcast %28 : vector<2x8x1xf32> to vector<2x8x8xf32>
    %30 = arith.subf %26, %29 : vector<2x8x8xf32>
    %31 = math.exp %30 : vector<2x8x8xf32>
    %cst_19 = arith.constant dense<0.000000e+00> : vector<2x8xf32>
    %32 = vector.multi_reduction <add>, %31, %cst_19 [2] : vector<2x8x8xf32> to vector<2x8xf32>
    %33 = vector.shape_cast %32 : vector<2x8xf32> to vector<2x8x1xf32>
    %34 = tpu.reciprocal %33 {approx = true} : vector<2x8x1xf32> -> vector<2x8x1xf32>
    %35 = vector.broadcast %34 : vector<2x8x1xf32> to vector<2x8x8xf32>
    %36 = arith.mulf %31, %35 : vector<2x8x8xf32>
    "tpu.trace_start"() <{level = 10 : i32, message = "bqk,bkd->bqd"}> : () -> ()
    %cst_20 = arith.constant dense<0.000000e+00> : vector<2x8x8xf32>
    %37 = tpu.matmul %36, %25, %cst_20 {dimension_numbers = #tpu.dot_dimension_numbers<[2], [1], [1], [2], [0, 0, 0, 1, 1, 2], [0], [0]>} : vector<2x8x8xf32>, vector<2x8x8xf32>, vector<2x8x8xf32> -> vector<2x8x8xf32>
    "tpu.trace_stop"() : () -> ()
    %38 = vector.shape_cast %37 : vector<2x8x8xf32> to vector<16x8xf32>
    %39 = vector.extract_strided_slice %14 {offsets = [0, 0], sizes = [8, 32], strides = [1, 1]} : vector<32x32xf32> to vector<8x32xf32>
    %cst_21 = arith.constant dense<0.000000e+00> : vector<16x32xf32>
    %40 = tpu.matmul %38, %39, %cst_21 {dimension_numbers = #tpu.dot_dimension_numbers<[1], [0], [0], [1], [0, 0, 1, 1], [], []>} : vector<16x8xf32>, vector<8x32xf32>, vector<16x32xf32> -> vector<16x32xf32>
    %41 = arith.addf %20, %40 : vector<16x32xf32>
    %42 = vector.extract_strided_slice %17 {offsets = [0, 0, 8], sizes = [2, 8, 8], strides = [1, 1, 1]} : vector<2x8x32xf32> to vector<2x8x8xf32>
    %cst_22 = arith.constant 0.353553385 : f32
    %43 = vector.broadcast %cst_22 : f32 to vector<2x8x8xf32>
    %44 = arith.mulf %42, %43 : vector<2x8x8xf32>
    %45 = vector.extract_strided_slice %18 {offsets = [0, 0, 8], sizes = [2, 8, 8], strides = [1, 1, 1]} : vector<2x8x32xf32> to vector<2x8x8xf32>
    %46 = vector.extract_strided_slice %19 {offsets = [0, 0, 8], sizes = [2, 8, 8], strides = [1, 1, 1]} : vector<2x8x32xf32> to vector<2x8x8xf32>
    "tpu.trace_start"() <{level = 10 : i32, message = "bqd,bkd->bqk"}> : () -> ()
    %cst_23 = arith.constant dense<0.000000e+00> : vector<2x8x8xf32>
    %47 = tpu.matmul %44, %45, %cst_23 {dimension_numbers = #tpu.dot_dimension_numbers<[2], [2], [1], [1], [0, 0, 0, 1, 1, 1], [0], [0]>} : vector<2x8x8xf32>, vector<2x8x8xf32>, vector<2x8x8xf32> -> vector<2x8x8xf32>
    "tpu.trace_stop"() : () -> ()
    %cst_24 = arith.constant dense<0xFF800000> : vector<2x8xf32>
    %48 = vector.multi_reduction <maximumf>, %47, %cst_24 [2] : vector<2x8x8xf32> to vector<2x8xf32>
    %49 = vector.shape_cast %48 : vector<2x8xf32> to vector<2x8x1xf32>
    %50 = vector.broadcast %49 : vector<2x8x1xf32> to vector<2x8x8xf32>
    %51 = arith.subf %47, %50 : vector<2x8x8xf32>
    %52 = math.exp %51 : vector<2x8x8xf32>
    %cst_25 = arith.constant dense<0.000000e+00> : vector<2x8xf32>
    %53 = vector.multi_reduction <add>, %52, %cst_25 [2] : vector<2x8x8xf32> to vector<2x8xf32>
    %54 = vector.shape_cast %53 : vector<2x8xf32> to vector<2x8x1xf32>
    %55 = tpu.reciprocal %54 {approx = true} : vector<2x8x1xf32> -> vector<2x8x1xf32>
    %56 = vector.broadcast %55 : vector<2x8x1xf32> to vector<2x8x8xf32>
    %57 = arith.mulf %52, %56 : vector<2x8x8xf32>
    "tpu.trace_start"() <{level = 10 : i32, message = "bqk,bkd->bqd"}> : () -> ()
    %cst_26 = arith.constant dense<0.000000e+00> : vector<2x8x8xf32>
    %58 = tpu.matmul %57, %46, %cst_26 {dimension_numbers = #tpu.dot_dimension_numbers<[2], [1], [1], [2], [0, 0, 0, 1, 1, 2], [0], [0]>} : vector<2x8x8xf32>, vector<2x8x8xf32>, vector<2x8x8xf32> -> vector<2x8x8xf32>
    "tpu.trace_stop"() : () -> ()
    %59 = vector.shape_cast %58 : vector<2x8x8xf32> to vector<16x8xf32>
    %60 = vector.extract_strided_slice %14 {offsets = [8, 0], sizes = [8, 32], strides = [1, 1]} : vector<32x32xf32> to vector<8x32xf32>
    %cst_27 = arith.constant dense<0.000000e+00> : vector<16x32xf32>
    %61 = tpu.matmul %59, %60, %cst_27 {dimension_numbers = #tpu.dot_dimension_numbers<[1], [0], [0], [1], [0, 0, 1, 1], [], []>} : vector<16x8xf32>, vector<8x32xf32>, vector<16x32xf32> -> vector<16x32xf32>
    %62 = arith.addf %41, %61 : vector<16x32xf32>
    %63 = vector.extract_strided_slice %17 {offsets = [0, 0, 16], sizes = [2, 8, 8], strides = [1, 1, 1]} : vector<2x8x32xf32> to vector<2x8x8xf32>
    %cst_28 = arith.constant 0.353553385 : f32
    %64 = vector.broadcast %cst_28 : f32 to vector<2x8x8xf32>
    %65 = arith.mulf %63, %64 : vector<2x8x8xf32>
    %66 = vector.extract_strided_slice %18 {offsets = [0, 0, 16], sizes = [2, 8, 8], strides = [1, 1, 1]} : vector<2x8x32xf32> to vector<2x8x8xf32>
    %67 = vector.extract_strided_slice %19 {offsets = [0, 0, 16], sizes = [2, 8, 8], strides = [1, 1, 1]} : vector<2x8x32xf32> to vector<2x8x8xf32>
    "tpu.trace_start"() <{level = 10 : i32, message = "bqd,bkd->bqk"}> : () -> ()
    %cst_29 = arith.constant dense<0.000000e+00> : vector<2x8x8xf32>
    %68 = tpu.matmul %65, %66, %cst_29 {dimension_numbers = #tpu.dot_dimension_numbers<[2], [2], [1], [1], [0, 0, 0, 1, 1, 1], [0], [0]>} : vector<2x8x8xf32>, vector<2x8x8xf32>, vector<2x8x8xf32> -> vector<2x8x8xf32>
    "tpu.trace_stop"() : () -> ()
    %cst_30 = arith.constant dense<0xFF800000> : vector<2x8xf32>
    %69 = vector.multi_reduction <maximumf>, %68, %cst_30 [2] : vector<2x8x8xf32> to vector<2x8xf32>
    %70 = vector.shape_cast %69 : vector<2x8xf32> to vector<2x8x1xf32>
    %71 = vector.broadcast %70 : vector<2x8x1xf32> to vector<2x8x8xf32>
    %72 = arith.subf %68, %71 : vector<2x8x8xf32>
    %73 = math.exp %72 : vector<2x8x8xf32>
    %cst_31 = arith.constant dense<0.000000e+00> : vector<2x8xf32>
    %74 = vector.multi_reduction <add>, %73, %cst_31 [2] : vector<2x8x8xf32> to vector<2x8xf32>
    %75 = vector.shape_cast %74 : vector<2x8xf32> to vector<2x8x1xf32>
    %76 = tpu.reciprocal %75 {approx = true} : vector<2x8x1xf32> -> vector<2x8x1xf32>
    %77 = vector.broadcast %76 : vector<2x8x1xf32> to vector<2x8x8xf32>
    %78 = arith.mulf %73, %77 : vector<2x8x8xf32>
    "tpu.trace_start"() <{level = 10 : i32, message = "bqk,bkd->bqd"}> : () -> ()
    %cst_32 = arith.constant dense<0.000000e+00> : vector<2x8x8xf32>
    %79 = tpu.matmul %78, %67, %cst_32 {dimension_numbers = #tpu.dot_dimension_numbers<[2], [1], [1], [2], [0, 0, 0, 1, 1, 2], [0], [0]>} : vector<2x8x8xf32>, vector<2x8x8xf32>, vector<2x8x8xf32> -> vector<2x8x8xf32>
    "tpu.trace_stop"() : () -> ()
    %80 = vector.shape_cast %79 : vector<2x8x8xf32> to vector<16x8xf32>
    %81 = vector.extract_strided_slice %14 {offsets = [16, 0], sizes = [8, 32], strides = [1, 1]} : vector<32x32xf32> to vector<8x32xf32>
    %cst_33 = arith.constant dense<0.000000e+00> : vector<16x32xf32>
    %82 = tpu.matmul %80, %81, %cst_33 {dimension_numbers = #tpu.dot_dimension_numbers<[1], [0], [0], [1], [0, 0, 1, 1], [], []>} : vector<16x8xf32>, vector<8x32xf32>, vector<16x32xf32> -> vector<16x32xf32>
    %83 = arith.addf %62, %82 : vector<16x32xf32>
    %84 = vector.extract_strided_slice %17 {offsets = [0, 0, 24], sizes = [2, 8, 8], strides = [1, 1, 1]} : vector<2x8x32xf32> to vector<2x8x8xf32>
    %cst_34 = arith.constant 0.353553385 : f32
    %85 = vector.broadcast %cst_34 : f32 to vector<2x8x8xf32>
    %86 = arith.mulf %84, %85 : vector<2x8x8xf32>
    %87 = vector.extract_strided_slice %18 {offsets = [0, 0, 24], sizes = [2, 8, 8], strides = [1, 1, 1]} : vector<2x8x32xf32> to vector<2x8x8xf32>
    %88 = vector.extract_strided_slice %19 {offsets = [0, 0, 24], sizes = [2, 8, 8], strides = [1, 1, 1]} : vector<2x8x32xf32> to vector<2x8x8xf32>
    "tpu.trace_start"() <{level = 10 : i32, message = "bqd,bkd->bqk"}> : () -> ()
    %cst_35 = arith.constant dense<0.000000e+00> : vector<2x8x8xf32>
    %89 = tpu.matmul %86, %87, %cst_35 {dimension_numbers = #tpu.dot_dimension_numbers<[2], [2], [1], [1], [0, 0, 0, 1, 1, 1], [0], [0]>} : vector<2x8x8xf32>, vector<2x8x8xf32>, vector<2x8x8xf32> -> vector<2x8x8xf32>
    "tpu.trace_stop"() : () -> ()
    %cst_36 = arith.constant dense<0xFF800000> : vector<2x8xf32>
    %90 = vector.multi_reduction <maximumf>, %89, %cst_36 [2] : vector<2x8x8xf32> to vector<2x8xf32>
    %91 = vector.shape_cast %90 : vector<2x8xf32> to vector<2x8x1xf32>
    %92 = vector.broadcast %91 : vector<2x8x1xf32> to vector<2x8x8xf32>
    %93 = arith.subf %89, %92 : vector<2x8x8xf32>
    %94 = math.exp %93 : vector<2x8x8xf32>
    %cst_37 = arith.constant dense<0.000000e+00> : vector<2x8xf32>
    %95 = vector.multi_reduction <add>, %94, %cst_37 [2] : vector<2x8x8xf32> to vector<2x8xf32>
    %96 = vector.shape_cast %95 : vector<2x8xf32> to vector<2x8x1xf32>
    %97 = tpu.reciprocal %96 {approx = true} : vector<2x8x1xf32> -> vector<2x8x1xf32>
    %98 = vector.broadcast %97 : vector<2x8x1xf32> to vector<2x8x8xf32>
    %99 = arith.mulf %94, %98 : vector<2x8x8xf32>
    "tpu.trace_start"() <{level = 10 : i32, message = "bqk,bkd->bqd"}> : () -> ()
    %cst_38 = arith.constant dense<0.000000e+00> : vector<2x8x8xf32>
    %100 = tpu.matmul %99, %88, %cst_38 {dimension_numbers = #tpu.dot_dimension_numbers<[2], [1], [1], [2], [0, 0, 0, 1, 1, 2], [0], [0]>} : vector<2x8x8xf32>, vector<2x8x8xf32>, vector<2x8x8xf32> -> vector<2x8x8xf32>
    "tpu.trace_stop"() : () -> ()
    %101 = vector.shape_cast %100 : vector<2x8x8xf32> to vector<16x8xf32>
    %102 = vector.extract_strided_slice %14 {offsets = [24, 0], sizes = [8, 32], strides = [1, 1]} : vector<32x32xf32> to vector<8x32xf32>
    %cst_39 = arith.constant dense<0.000000e+00> : vector<16x32xf32>
    %103 = tpu.matmul %101, %102, %cst_39 {dimension_numbers = #tpu.dot_dimension_numbers<[1], [0], [0], [1], [0, 0, 1, 1], [], []>} : vector<16x8xf32>, vector<8x32xf32>, vector<16x32xf32> -> vector<16x32xf32>
    %104 = arith.addf %83, %103 : vector<16x32xf32>
    %105 = vector.broadcast %16 : vector<1x32xf32> to vector<16x32xf32>
    %106 = arith.addf %104, %105 : vector<16x32xf32>
    %107 = arith.addf %2, %106 : vector<16x32xf32>
    %c0_40 = arith.constant 0 : index
    %c0_41 = arith.constant 0 : index
    %c0_42 = arith.constant 0 : index
    %108 = vector.load %arg6[%c0_40, %c0_41, %c0_42] : memref<1x1x32xf32, #tpu.memory_space<vmem>>, vector<1x1x32xf32>
    %109 = vector.shape_cast %108 : vector<1x1x32xf32> to vector<1x32xf32>
    %c0_43 = arith.constant 0 : index
    %c0_44 = arith.constant 0 : index
    %c0_45 = arith.constant 0 : index
    %110 = vector.load %arg7[%c0_43, %c0_44, %c0_45] : memref<1x1x32xf32, #tpu.memory_space<vmem>>, vector<1x1x32xf32>
    %111 = vector.shape_cast %110 : vector<1x1x32xf32> to vector<1x32xf32>
    %cst_46 = arith.constant dense<0.000000e+00> : vector<16xf32>
    %112 = vector.multi_reduction <add>, %107, %cst_46 [1] : vector<16x32xf32> to vector<16xf32>
    %113 = vector.shape_cast %112 : vector<16xf32> to vector<16x1xf32>
    %cst_47 = arith.constant 3.200000e+01 : f32
    %114 = vector.broadcast %cst_47 : f32 to vector<16x1xf32>
    %115 = arith.divf %113, %114 : vector<16x1xf32>
    %116 = vector.broadcast %115 : vector<16x1xf32> to vector<16x32xf32>
    %117 = arith.subf %107, %116 : vector<16x32xf32>
    %118 = arith.mulf %117, %117 : vector<16x32xf32>
    %cst_48 = arith.constant dense<0.000000e+00> : vector<16xf32>
    %119 = vector.multi_reduction <add>, %118, %cst_48 [1] : vector<16x32xf32> to vector<16xf32>
    %120 = vector.shape_cast %119 : vector<16xf32> to vector<16x1xf32>
    %cst_49 = arith.constant 3.200000e+01 : f32
    %121 = vector.broadcast %cst_49 : f32 to vector<16x1xf32>
    %122 = arith.divf %120, %121 : vector<16x1xf32>
    %123 = vector.broadcast %115 : vector<16x1xf32> to vector<16x32xf32>
    %124 = arith.subf %107, %123 : vector<16x32xf32>
    %cst_50 = arith.constant 9.99999974E-6 : f32
    %125 = vector.broadcast %cst_50 : f32 to vector<16x1xf32>
    %126 = arith.addf %122, %125 : vector<16x1xf32>
    %127 = math.rsqrt %126 : vector<16x1xf32>
    %128 = vector.broadcast %127 : vector<16x1xf32> to vector<16x32xf32>
    %129 = arith.mulf %124, %128 : vector<16x32xf32>
    %130 = vector.broadcast %109 : vector<1x32xf32> to vector<16x32xf32>
    %131 = arith.mulf %129, %130 : vector<16x32xf32>
    %132 = vector.broadcast %111 : vector<1x32xf32> to vector<16x32xf32>
    %133 = arith.addf %131, %132 : vector<16x32xf32>
    %c0_51 = arith.constant 0 : index
    %c0_52 = arith.constant 0 : index
    %c0_53 = arith.constant 0 : index
    %134 = vector.load %arg8[%c0_51, %c0_52, %c0_53] : memref<1x32x64xf32, #tpu.memory_space<vmem>>, vector<1x32x64xf32>
    %135 = vector.shape_cast %134 : vector<1x32x64xf32> to vector<32x64xf32>
    %cst_54 = arith.constant dense<0.000000e+00> : vector<16x64xf32>
    %136 = tpu.matmul %133, %135, %cst_54 {dimension_numbers = #tpu.dot_dimension_numbers<[1], [0], [0], [1], [0, 0, 1, 1], [], []>} : vector<16x32xf32>, vector<32x64xf32>, vector<16x64xf32> -> vector<16x64xf32>
    %c0_55 = arith.constant 0 : index
    %c0_56 = arith.constant 0 : index
    %c0_57 = arith.constant 0 : index
    %137 = vector.load %arg9[%c0_55, %c0_56, %c0_57] : memref<1x1x64xf32, #tpu.memory_space<vmem>>, vector<1x1x64xf32>
    %138 = vector.shape_cast %137 : vector<1x1x64xf32> to vector<1x64xf32>
    %139 = vector.broadcast %138 : vector<1x64xf32> to vector<16x64xf32>
    %140 = arith.addf %136, %139 : vector<16x64xf32>
    %cst_58 = arith.constant 0.000000e+00 : f32
    %141 = vector.broadcast %cst_58 : f32 to vector<16x64xf32>
    %142 = arith.maximumf %140, %141 : vector<16x64xf32>
    %c0_59 = arith.constant 0 : index
    %c0_60 = arith.constant 0 : index
    %c0_61 = arith.constant 0 : index
    %143 = vector.load %arg10[%c0_59, %c0_60, %c0_61] : memref<1x64x32xf32, #tpu.memory_space<vmem>>, vector<1x64x32xf32>
    %144 = vector.shape_cast %143 : vector<1x64x32xf32> to vector<64x32xf32>
    %cst_62 = arith.constant dense<0.000000e+00> : vector<16x32xf32>
    %145 = tpu.matmul %142, %144, %cst_62 {dimension_numbers = #tpu.dot_dimension_numbers<[1], [0], [0], [1], [0, 0, 1, 1], [], []>} : vector<16x64xf32>, vector<64x32xf32>, vector<16x32xf32> -> vector<16x32xf32>
    %c0_63 = arith.constant 0 : index
    %c0_64 = arith.constant 0 : index
    %c0_65 = arith.constant 0 : index
    %146 = vector.load %arg11[%c0_63, %c0_64, %c0_65] : memref<1x1x32xf32, #tpu.memory_space<vmem>>, vector<1x1x32xf32>
    %147 = vector.shape_cast %146 : vector<1x1x32xf32> to vector<1x32xf32>
    %148 = vector.broadcast %147 : vector<1x32xf32> to vector<16x32xf32>
    %149 = arith.addf %145, %148 : vector<16x32xf32>
    %150 = arith.addf %133, %149 : vector<16x32xf32>
    %c0_66 = arith.constant 0 : index
    %c0_67 = arith.constant 0 : index
    %c0_68 = arith.constant 0 : index
    %151 = vector.load %arg12[%c0_66, %c0_67, %c0_68] : memref<1x1x32xf32, #tpu.memory_space<vmem>>, vector<1x1x32xf32>
    %152 = vector.shape_cast %151 : vector<1x1x32xf32> to vector<1x32xf32>
    %c0_69 = arith.constant 0 : index
    %c0_70 = arith.constant 0 : index
    %c0_71 = arith.constant 0 : index
    %153 = vector.load %arg13[%c0_69, %c0_70, %c0_71] : memref<1x1x32xf32, #tpu.memory_space<vmem>>, vector<1x1x32xf32>
    %154 = vector.shape_cast %153 : vector<1x1x32xf32> to vector<1x32xf32>
    %cst_72 = arith.constant dense<0.000000e+00> : vector<16xf32>
    %155 = vector.multi_reduction <add>, %150, %cst_72 [1] : vector<16x32xf32> to vector<16xf32>
    %156 = vector.shape_cast %155 : vector<16xf32> to vector<16x1xf32>
    %cst_73 = arith.constant 3.200000e+01 : f32
    %157 = vector.broadcast %cst_73 : f32 to vector<16x1xf32>
    %158 = arith.divf %156, %157 : vector<16x1xf32>
    %159 = vector.broadcast %158 : vector<16x1xf32> to vector<16x32xf32>
    %160 = arith.subf %150, %159 : vector<16x32xf32>
    %161 = arith.mulf %160, %160 : vector<16x32xf32>
    %cst_74 = arith.constant dense<0.000000e+00> : vector<16xf32>
    %162 = vector.multi_reduction <add>, %161, %cst_74 [1] : vector<16x32xf32> to vector<16xf32>
    %163 = vector.shape_cast %162 : vector<16xf32> to vector<16x1xf32>
    %cst_75 = arith.constant 3.200000e+01 : f32
    %164 = vector.broadcast %cst_75 : f32 to vector<16x1xf32>
    %165 = arith.divf %163, %164 : vector<16x1xf32>
    %166 = vector.broadcast %158 : vector<16x1xf32> to vector<16x32xf32>
    %167 = arith.subf %150, %166 : vector<16x32xf32>
    %cst_76 = arith.constant 9.99999974E-6 : f32
    %168 = vector.broadcast %cst_76 : f32 to vector<16x1xf32>
    %169 = arith.addf %165, %168 : vector<16x1xf32>
    %170 = math.rsqrt %169 : vector<16x1xf32>
    %171 = vector.broadcast %170 : vector<16x1xf32> to vector<16x32xf32>
    %172 = arith.mulf %167, %171 : vector<16x32xf32>
    %173 = vector.broadcast %152 : vector<1x32xf32> to vector<16x32xf32>
    %174 = arith.mulf %172, %173 : vector<16x32xf32>
    %175 = vector.broadcast %154 : vector<1x32xf32> to vector<16x32xf32>
    %176 = arith.addf %174, %175 : vector<16x32xf32>
    %177 = vector.shape_cast %176 : vector<16x32xf32> to vector<2x8x32xf32>
    %c0_77 = arith.constant 0 : index
    %c0_78 = arith.constant 0 : index
    %c0_79 = arith.constant 0 : index
    %c0_80 = arith.constant 0 : index
    %178 = vector.load %arg14[%c0_77, %c0_78, %c0_79, %c0_80] : memref<1x2x8x32xf32, #tpu.memory_space<vmem>>, vector<1x2x8x32xf32>
    %179 = vector.shape_cast %178 : vector<1x2x8x32xf32> to vector<2x8x32xf32>
    %180 = vector.shape_cast %177 : vector<2x8x32xf32> to vector<1x2x8x32xf32>
    tpu.vector_store %arg14[%c0_77, %c0_78, %c0_79, %c0_80], %180 {strides = array<i32>} : memref<1x2x8x32xf32, #tpu.memory_space<vmem>>, vector<1x2x8x32xf32>,
    return
  }
  func.func @transform_0(%arg0: i32) -> (i32, i32, i32, i32) {
    %c0_i32 = arith.constant 0 : i32
    %c0_i32_0 = arith.constant 0 : i32
    %c0_i32_1 = arith.constant 0 : i32
    %c0_i32_2 = arith.constant 0 : i32
    return %arg0, %c0_i32, %c0_i32_0, %c0_i32_1 : i32, i32, i32, i32
  }
  func.func @transform_1(%arg0: i32) -> (i32, i32, i32) {
    %c0_i32 = arith.constant 0 : i32
    %c0_i32_0 = arith.constant 0 : i32
    %c0_i32_1 = arith.constant 0 : i32
    return %arg0, %c0_i32, %c0_i32_0 : i32, i32, i32
  }
  func.func @transform_2(%arg0: i32) -> (i32, i32, i32) {
    %c0_i32 = arith.constant 0 : i32
    %c0_i32_0 = arith.constant 0 : i32
    %c0_i32_1 = arith.constant 0 : i32
    return %arg0, %c0_i32, %c0_i32_0 : i32, i32, i32
  }
  func.func @transform_3(%arg0: i32) -> (i32, i32, i32) {
    %c0_i32 = arith.constant 0 : i32
    %c0_i32_0 = arith.constant 0 : i32
    %c0_i32_1 = arith.constant 0 : i32
    return %arg0, %c0_i32, %c0_i32_0 : i32, i32, i32
  }
  func.func @transform_4(%arg0: i32) -> (i32, i32, i32) {
    %c0_i32 = arith.constant 0 : i32
    %c0_i32_0 = arith.constant 0 : i32
    %c0_i32_1 = arith.constant 0 : i32
    return %arg0, %c0_i32, %c0_i32_0 : i32, i32, i32
  }
  func.func @transform_5(%arg0: i32) -> (i32, i32, i32) {
    %c0_i32 = arith.constant 0 : i32
    %c0_i32_0 = arith.constant 0 : i32
    %c0_i32_1 = arith.constant 0 : i32
    return %arg0, %c0_i32, %c0_i32_0 : i32, i32, i32
  }
  func.func @transform_6(%arg0: i32) -> (i32, i32, i32) {
    %c0_i32 = arith.constant 0 : i32
    %c0_i32_0 = arith.constant 0 : i32
    %c0_i32_1 = arith.constant 0 : i32
    return %arg0, %c0_i32, %c0_i32_0 : i32, i32, i32
  }
  func.func @transform_7(%arg0: i32) -> (i32, i32, i32) {
    %c0_i32 = arith.constant 0 : i32
    %c0_i32_0 = arith.constant 0 : i32
    %c0_i32_1 = arith.constant 0 : i32
    return %arg0, %c0_i32, %c0_i32_0 : i32, i32, i32
  }
  func.func @transform_8(%arg0: i32) -> (i32, i32, i32) {
    %c0_i32 = arith.constant 0 : i32
    %c0_i32_0 = arith.constant 0 : i32
    %c0_i32_1 = arith.constant 0 : i32
    return %arg0, %c0_i32, %c0_i32_0 : i32, i32, i32
  }
  func.func @transform_9(%arg0: i32) -> (i32, i32, i32) {
    %c0_i32 = arith.constant 0 : i32
    %c0_i32_0 = arith.constant 0 : i32
    %c0_i32_1 = arith.constant 0 : i32
    return %arg0, %c0_i32, %c0_i32_0 : i32, i32, i32
  }
  func.func @transform_10(%arg0: i32) -> (i32, i32, i32) {
    %c0_i32 = arith.constant 0 : i32
    %c0_i32_0 = arith.constant 0 : i32
    %c0_i32_1 = arith.constant 0 : i32
    return %arg0, %c0_i32, %c0_i32_0 : i32, i32, i32
  }
  func.func @transform_11(%arg0: i32) -> (i32, i32, i32) {
    %c0_i32 = arith.constant 0 : i32
    %c0_i32_0 = arith.constant 0 : i32
    %c0_i32_1 = arith.constant 0 : i32
    return %arg0, %c0_i32, %c0_i32_0 : i32, i32, i32
  }
  func.func @transform_12(%arg0: i32) -> (i32, i32, i32) {
    %c0_i32 = arith.constant 0 : i32
    %c0_i32_0 = arith.constant 0 : i32
    %c0_i32_1 = arith.constant 0 : i32
    return %arg0, %c0_i32, %c0_i32_0 : i32, i32, i32
  }
  func.func @transform_13(%arg0: i32) -> (i32, i32, i32, i32) {
    %c0_i32 = arith.constant 0 : i32
    %c0_i32_0 = arith.constant 0 : i32
    %c0_i32_1 = arith.constant 0 : i32
    %c0_i32_2 = arith.constant 0 : i32
    return %arg0, %c0_i32, %c0_i32_0, %c0_i32_1 : i32, i32, i32, i32
  }
}

module attributes {stable_mosaic.version = 11 : i64} {
  func.func @_cross_attention_kernel(%arg0: i32, %arg1: memref<6xi32, #tpu.memory_space<smem>>, %arg2: memref<6xi32, #tpu.memory_space<smem>>, %arg3: memref<6xi32, #tpu.memory_space<smem>>, %arg4: memref<1x2x8x32xf32, #tpu.memory_space<vmem>>, %arg5: memref<1x2x8x32xf32, #tpu.memory_space<vmem>>, %arg6: memref<1x32x96xf32, #tpu.memory_space<vmem>>, %arg7: memref<1x1x96xf32, #tpu.memory_space<vmem>>, %arg8: memref<1x32x32xf32, #tpu.memory_space<vmem>>, %arg9: memref<1x1x32xf32, #tpu.memory_space<vmem>>, %arg10: memref<1x2x8x32xf32, #tpu.memory_space<vmem>>) attributes {dimension_semantics = [#tpu.dimension_semantics<parallel>], iteration_bounds = array<i64: 6>, scalar_prefetch = 3 : i64, scratch_operands = 0 : i64, tpu.core_type = #tpu.core_type<tc>, window_params = [{transform_indices = @transform_0, window_bounds = array<i64: 1, 2, 8, 32>}, {transform_indices = @transform_1, window_bounds = array<i64: 1, 2, 8, 32>}, {transform_indices = @transform_2, window_bounds = array<i64: 1, 32, 96>}, {transform_indices = @transform_3, window_bounds = array<i64: 1, 1, 96>}, {transform_indices = @transform_4, window_bounds = array<i64: 1, 32, 32>}, {transform_indices = @transform_5, window_bounds = array<i64: 1, 1, 32>}, {transform_indices = @transform_6, window_bounds = array<i64: 1, 2, 8, 32>}]} {
    %c0 = arith.constant 0 : index
    %c0_0 = arith.constant 0 : index
    %c0_1 = arith.constant 0 : index
    %c0_2 = arith.constant 0 : index
    %0 = vector.load %arg4[%c0, %c0_0, %c0_1, %c0_2] : memref<1x2x8x32xf32, #tpu.memory_space<vmem>>, vector<1x2x8x32xf32>
    %1 = vector.shape_cast %0 : vector<1x2x8x32xf32> to vector<2x8x32xf32>
    %2 = vector.shape_cast %1 : vector<2x8x32xf32> to vector<16x32xf32>
    %c0_3 = arith.constant 0 : index
    %c0_4 = arith.constant 0 : index
    %c0_5 = arith.constant 0 : index
    %c0_6 = arith.constant 0 : index
    %3 = vector.load %arg5[%c0_3, %c0_4, %c0_5, %c0_6] : memref<1x2x8x32xf32, #tpu.memory_space<vmem>>, vector<1x2x8x32xf32>
    %4 = vector.shape_cast %3 : vector<1x2x8x32xf32> to vector<2x8x32xf32>
    %5 = vector.shape_cast %4 : vector<2x8x32xf32> to vector<16x32xf32>
    %c0_7 = arith.constant 0 : index
    %c0_8 = arith.constant 0 : index
    %c0_9 = arith.constant 0 : index
    %6 = vector.load %arg6[%c0_7, %c0_8, %c0_9] : memref<1x32x96xf32, #tpu.memory_space<vmem>>, vector<1x32x96xf32>
    %7 = vector.shape_cast %6 : vector<1x32x96xf32> to vector<32x96xf32>
    %c0_10 = arith.constant 0 : index
    %c0_11 = arith.constant 0 : index
    %c0_12 = arith.constant 0 : index
    %8 = vector.load %arg7[%c0_10, %c0_11, %c0_12] : memref<1x1x96xf32, #tpu.memory_space<vmem>>, vector<1x1x96xf32>
    %9 = vector.shape_cast %8 : vector<1x1x96xf32> to vector<1x96xf32>
    %10 = vector.extract_strided_slice %7 {offsets = [0, 0], sizes = [32, 32], strides = [1, 1]} : vector<32x96xf32> to vector<32x32xf32>
    %cst = arith.constant dense<0.000000e+00> : vector<16x32xf32>
    %11 = tpu.matmul %2, %10, %cst {dimension_numbers = #tpu.dot_dimension_numbers<[1], [0], [0], [1], [0, 0, 1, 1], [], []>} : vector<16x32xf32>, vector<32x32xf32>, vector<16x32xf32> -> vector<16x32xf32>
    %12 = vector.extract_strided_slice %9 {offsets = [0, 0], sizes = [1, 32], strides = [1, 1]} : vector<1x96xf32> to vector<1x32xf32>
    %13 = vector.broadcast %12 : vector<1x32xf32> to vector<16x32xf32>
    %14 = arith.addf %11, %13 : vector<16x32xf32>
    %15 = vector.extract_strided_slice %7 {offsets = [0, 32], sizes = [32, 64], strides = [1, 1]} : vector<32x96xf32> to vector<32x64xf32>
    %cst_13 = arith.constant dense<0.000000e+00> : vector<16x64xf32>
    %16 = tpu.matmul %5, %15, %cst_13 {dimension_numbers = #tpu.dot_dimension_numbers<[1], [0], [0], [1], [0, 0, 1, 1], [], []>} : vector<16x32xf32>, vector<32x64xf32>, vector<16x64xf32> -> vector<16x64xf32>
    %17 = vector.extract_strided_slice %9 {offsets = [0, 32], sizes = [1, 64], strides = [1, 1]} : vector<1x96xf32> to vector<1x64xf32>
    %18 = vector.broadcast %17 : vector<1x64xf32> to vector<16x64xf32>
    %19 = arith.addf %16, %18 : vector<16x64xf32>
    %20 = vector.extract_strided_slice %19 {offsets = [0, 0], sizes = [16, 32], strides = [1, 1]} : vector<16x64xf32> to vector<16x32xf32>
    %21 = vector.extract_strided_slice %19 {offsets = [0, 32], sizes = [16, 32], strides = [1, 1]} : vector<16x64xf32> to vector<16x32xf32>
    %c0_14 = arith.constant 0 : index
    %c0_15 = arith.constant 0 : index
    %c0_16 = arith.constant 0 : index
    %22 = vector.load %arg8[%c0_14, %c0_15, %c0_16] : memref<1x32x32xf32, #tpu.memory_space<vmem>>, vector<1x32x32xf32>
    %23 = vector.shape_cast %22 : vector<1x32x32xf32> to vector<32x32xf32>
    %c0_17 = arith.constant 0 : index
    %c0_18 = arith.constant 0 : index
    %c0_19 = arith.constant 0 : index
    %24 = vector.load %arg9[%c0_17, %c0_18, %c0_19] : memref<1x1x32xf32, #tpu.memory_space<vmem>>, vector<1x1x32xf32>
    %25 = vector.shape_cast %24 : vector<1x1x32xf32> to vector<1x32xf32>
    %26 = vector.shape_cast %14 : vector<16x32xf32> to vector<2x8x32xf32>
    %27 = vector.shape_cast %20 : vector<16x32xf32> to vector<2x8x32xf32>
    %28 = vector.shape_cast %21 : vector<16x32xf32> to vector<2x8x32xf32>
    %cst_20 = arith.constant 0.000000e+00 : f32
    %29 = vector.broadcast %cst_20 : f32 to vector<16x32xf32>
    %30 = vector.extract_strided_slice %26 {offsets = [0, 0, 0], sizes = [2, 8, 8], strides = [1, 1, 1]} : vector<2x8x32xf32> to vector<2x8x8xf32>
    %cst_21 = arith.constant 0.353553385 : f32
    %31 = vector.broadcast %cst_21 : f32 to vector<2x8x8xf32>
    %32 = arith.mulf %30, %31 : vector<2x8x8xf32>
    %33 = vector.extract_strided_slice %27 {offsets = [0, 0, 0], sizes = [2, 8, 8], strides = [1, 1, 1]} : vector<2x8x32xf32> to vector<2x8x8xf32>
    %34 = vector.extract_strided_slice %28 {offsets = [0, 0, 0], sizes = [2, 8, 8], strides = [1, 1, 1]} : vector<2x8x32xf32> to vector<2x8x8xf32>
    "tpu.trace_start"() <{level = 10 : i32, message = "bqd,bkd->bqk"}> : () -> ()
    %cst_22 = arith.constant dense<0.000000e+00> : vector<2x8x8xf32>
    %35 = tpu.matmul %32, %33, %cst_22 {dimension_numbers = #tpu.dot_dimension_numbers<[2], [2], [1], [1], [0, 0, 0, 1, 1, 1], [0], [0]>} : vector<2x8x8xf32>, vector<2x8x8xf32>, vector<2x8x8xf32> -> vector<2x8x8xf32>
    "tpu.trace_stop"() : () -> ()
    %cst_23 = arith.constant dense<0xFF800000> : vector<2x8xf32>
    %36 = vector.multi_reduction <maximumf>, %35, %cst_23 [2] : vector<2x8x8xf32> to vector<2x8xf32>
    %37 = vector.shape_cast %36 : vector<2x8xf32> to vector<2x8x1xf32>
    %38 = vector.broadcast %37 : vector<2x8x1xf32> to vector<2x8x8xf32>
    %39 = arith.subf %35, %38 : vector<2x8x8xf32>
    %40 = math.exp %39 : vector<2x8x8xf32>
    %cst_24 = arith.constant dense<0.000000e+00> : vector<2x8xf32>
    %41 = vector.multi_reduction <add>, %40, %cst_24 [2] : vector<2x8x8xf32> to vector<2x8xf32>
    %42 = vector.shape_cast %41 : vector<2x8xf32> to vector<2x8x1xf32>
    %43 = tpu.reciprocal %42 {approx = true} : vector<2x8x1xf32> -> vector<2x8x1xf32>
    %44 = vector.broadcast %43 : vector<2x8x1xf32> to vector<2x8x8xf32>
    %45 = arith.mulf %40, %44 : vector<2x8x8xf32>
    "tpu.trace_start"() <{level = 10 : i32, message = "bqk,bkd->bqd"}> : () -> ()
    %cst_25 = arith.constant dense<0.000000e+00> : vector<2x8x8xf32>
    %46 = tpu.matmul %45, %34, %cst_25 {dimension_numbers = #tpu.dot_dimension_numbers<[2], [1], [1], [2], [0, 0, 0, 1, 1, 2], [0], [0]>} : vector<2x8x8xf32>, vector<2x8x8xf32>, vector<2x8x8xf32> -> vector<2x8x8xf32>
    "tpu.trace_stop"() : () -> ()
    %47 = vector.shape_cast %46 : vector<2x8x8xf32> to vector<16x8xf32>
    %48 = vector.extract_strided_slice %23 {offsets = [0, 0], sizes = [8, 32], strides = [1, 1]} : vector<32x32xf32> to vector<8x32xf32>
    %cst_26 = arith.constant dense<0.000000e+00> : vector<16x32xf32>
    %49 = tpu.matmul %47, %48, %cst_26 {dimension_numbers = #tpu.dot_dimension_numbers<[1], [0], [0], [1], [0, 0, 1, 1], [], []>} : vector<16x8xf32>, vector<8x32xf32>, vector<16x32xf32> -> vector<16x32xf32>
    %50 = arith.addf %29, %49 : vector<16x32xf32>
    %51 = vector.extract_strided_slice %26 {offsets = [0, 0, 8], sizes = [2, 8, 8], strides = [1, 1, 1]} : vector<2x8x32xf32> to vector<2x8x8xf32>
    %cst_27 = arith.constant 0.353553385 : f32
    %52 = vector.broadcast %cst_27 : f32 to vector<2x8x8xf32>
    %53 = arith.mulf %51, %52 : vector<2x8x8xf32>
    %54 = vector.extract_strided_slice %27 {offsets = [0, 0, 8], sizes = [2, 8, 8], strides = [1, 1, 1]} : vector<2x8x32xf32> to vector<2x8x8xf32>
    %55 = vector.extract_strided_slice %28 {offsets = [0, 0, 8], sizes = [2, 8, 8], strides = [1, 1, 1]} : vector<2x8x32xf32> to vector<2x8x8xf32>
    "tpu.trace_start"() <{level = 10 : i32, message = "bqd,bkd->bqk"}> : () -> ()
    %cst_28 = arith.constant dense<0.000000e+00> : vector<2x8x8xf32>
    %56 = tpu.matmul %53, %54, %cst_28 {dimension_numbers = #tpu.dot_dimension_numbers<[2], [2], [1], [1], [0, 0, 0, 1, 1, 1], [0], [0]>} : vector<2x8x8xf32>, vector<2x8x8xf32>, vector<2x8x8xf32> -> vector<2x8x8xf32>
    "tpu.trace_stop"() : () -> ()
    %cst_29 = arith.constant dense<0xFF800000> : vector<2x8xf32>
    %57 = vector.multi_reduction <maximumf>, %56, %cst_29 [2] : vector<2x8x8xf32> to vector<2x8xf32>
    %58 = vector.shape_cast %57 : vector<2x8xf32> to vector<2x8x1xf32>
    %59 = vector.broadcast %58 : vector<2x8x1xf32> to vector<2x8x8xf32>
    %60 = arith.subf %56, %59 : vector<2x8x8xf32>
    %61 = math.exp %60 : vector<2x8x8xf32>
    %cst_30 = arith.constant dense<0.000000e+00> : vector<2x8xf32>
    %62 = vector.multi_reduction <add>, %61, %cst_30 [2] : vector<2x8x8xf32> to vector<2x8xf32>
    %63 = vector.shape_cast %62 : vector<2x8xf32> to vector<2x8x1xf32>
    %64 = tpu.reciprocal %63 {approx = true} : vector<2x8x1xf32> -> vector<2x8x1xf32>
    %65 = vector.broadcast %64 : vector<2x8x1xf32> to vector<2x8x8xf32>
    %66 = arith.mulf %61, %65 : vector<2x8x8xf32>
    "tpu.trace_start"() <{level = 10 : i32, message = "bqk,bkd->bqd"}> : () -> ()
    %cst_31 = arith.constant dense<0.000000e+00> : vector<2x8x8xf32>
    %67 = tpu.matmul %66, %55, %cst_31 {dimension_numbers = #tpu.dot_dimension_numbers<[2], [1], [1], [2], [0, 0, 0, 1, 1, 2], [0], [0]>} : vector<2x8x8xf32>, vector<2x8x8xf32>, vector<2x8x8xf32> -> vector<2x8x8xf32>
    "tpu.trace_stop"() : () -> ()
    %68 = vector.shape_cast %67 : vector<2x8x8xf32> to vector<16x8xf32>
    %69 = vector.extract_strided_slice %23 {offsets = [8, 0], sizes = [8, 32], strides = [1, 1]} : vector<32x32xf32> to vector<8x32xf32>
    %cst_32 = arith.constant dense<0.000000e+00> : vector<16x32xf32>
    %70 = tpu.matmul %68, %69, %cst_32 {dimension_numbers = #tpu.dot_dimension_numbers<[1], [0], [0], [1], [0, 0, 1, 1], [], []>} : vector<16x8xf32>, vector<8x32xf32>, vector<16x32xf32> -> vector<16x32xf32>
    %71 = arith.addf %50, %70 : vector<16x32xf32>
    %72 = vector.extract_strided_slice %26 {offsets = [0, 0, 16], sizes = [2, 8, 8], strides = [1, 1, 1]} : vector<2x8x32xf32> to vector<2x8x8xf32>
    %cst_33 = arith.constant 0.353553385 : f32
    %73 = vector.broadcast %cst_33 : f32 to vector<2x8x8xf32>
    %74 = arith.mulf %72, %73 : vector<2x8x8xf32>
    %75 = vector.extract_strided_slice %27 {offsets = [0, 0, 16], sizes = [2, 8, 8], strides = [1, 1, 1]} : vector<2x8x32xf32> to vector<2x8x8xf32>
    %76 = vector.extract_strided_slice %28 {offsets = [0, 0, 16], sizes = [2, 8, 8], strides = [1, 1, 1]} : vector<2x8x32xf32> to vector<2x8x8xf32>
    "tpu.trace_start"() <{level = 10 : i32, message = "bqd,bkd->bqk"}> : () -> ()
    %cst_34 = arith.constant dense<0.000000e+00> : vector<2x8x8xf32>
    %77 = tpu.matmul %74, %75, %cst_34 {dimension_numbers = #tpu.dot_dimension_numbers<[2], [2], [1], [1], [0, 0, 0, 1, 1, 1], [0], [0]>} : vector<2x8x8xf32>, vector<2x8x8xf32>, vector<2x8x8xf32> -> vector<2x8x8xf32>
    "tpu.trace_stop"() : () -> ()
    %cst_35 = arith.constant dense<0xFF800000> : vector<2x8xf32>
    %78 = vector.multi_reduction <maximumf>, %77, %cst_35 [2] : vector<2x8x8xf32> to vector<2x8xf32>
    %79 = vector.shape_cast %78 : vector<2x8xf32> to vector<2x8x1xf32>
    %80 = vector.broadcast %79 : vector<2x8x1xf32> to vector<2x8x8xf32>
    %81 = arith.subf %77, %80 : vector<2x8x8xf32>
    %82 = math.exp %81 : vector<2x8x8xf32>
    %cst_36 = arith.constant dense<0.000000e+00> : vector<2x8xf32>
    %83 = vector.multi_reduction <add>, %82, %cst_36 [2] : vector<2x8x8xf32> to vector<2x8xf32>
    %84 = vector.shape_cast %83 : vector<2x8xf32> to vector<2x8x1xf32>
    %85 = tpu.reciprocal %84 {approx = true} : vector<2x8x1xf32> -> vector<2x8x1xf32>
    %86 = vector.broadcast %85 : vector<2x8x1xf32> to vector<2x8x8xf32>
    %87 = arith.mulf %82, %86 : vector<2x8x8xf32>
    "tpu.trace_start"() <{level = 10 : i32, message = "bqk,bkd->bqd"}> : () -> ()
    %cst_37 = arith.constant dense<0.000000e+00> : vector<2x8x8xf32>
    %88 = tpu.matmul %87, %76, %cst_37 {dimension_numbers = #tpu.dot_dimension_numbers<[2], [1], [1], [2], [0, 0, 0, 1, 1, 2], [0], [0]>} : vector<2x8x8xf32>, vector<2x8x8xf32>, vector<2x8x8xf32> -> vector<2x8x8xf32>
    "tpu.trace_stop"() : () -> ()
    %89 = vector.shape_cast %88 : vector<2x8x8xf32> to vector<16x8xf32>
    %90 = vector.extract_strided_slice %23 {offsets = [16, 0], sizes = [8, 32], strides = [1, 1]} : vector<32x32xf32> to vector<8x32xf32>
    %cst_38 = arith.constant dense<0.000000e+00> : vector<16x32xf32>
    %91 = tpu.matmul %89, %90, %cst_38 {dimension_numbers = #tpu.dot_dimension_numbers<[1], [0], [0], [1], [0, 0, 1, 1], [], []>} : vector<16x8xf32>, vector<8x32xf32>, vector<16x32xf32> -> vector<16x32xf32>
    %92 = arith.addf %71, %91 : vector<16x32xf32>
    %93 = vector.extract_strided_slice %26 {offsets = [0, 0, 24], sizes = [2, 8, 8], strides = [1, 1, 1]} : vector<2x8x32xf32> to vector<2x8x8xf32>
    %cst_39 = arith.constant 0.353553385 : f32
    %94 = vector.broadcast %cst_39 : f32 to vector<2x8x8xf32>
    %95 = arith.mulf %93, %94 : vector<2x8x8xf32>
    %96 = vector.extract_strided_slice %27 {offsets = [0, 0, 24], sizes = [2, 8, 8], strides = [1, 1, 1]} : vector<2x8x32xf32> to vector<2x8x8xf32>
    %97 = vector.extract_strided_slice %28 {offsets = [0, 0, 24], sizes = [2, 8, 8], strides = [1, 1, 1]} : vector<2x8x32xf32> to vector<2x8x8xf32>
    "tpu.trace_start"() <{level = 10 : i32, message = "bqd,bkd->bqk"}> : () -> ()
    %cst_40 = arith.constant dense<0.000000e+00> : vector<2x8x8xf32>
    %98 = tpu.matmul %95, %96, %cst_40 {dimension_numbers = #tpu.dot_dimension_numbers<[2], [2], [1], [1], [0, 0, 0, 1, 1, 1], [0], [0]>} : vector<2x8x8xf32>, vector<2x8x8xf32>, vector<2x8x8xf32> -> vector<2x8x8xf32>
    "tpu.trace_stop"() : () -> ()
    %cst_41 = arith.constant dense<0xFF800000> : vector<2x8xf32>
    %99 = vector.multi_reduction <maximumf>, %98, %cst_41 [2] : vector<2x8x8xf32> to vector<2x8xf32>
    %100 = vector.shape_cast %99 : vector<2x8xf32> to vector<2x8x1xf32>
    %101 = vector.broadcast %100 : vector<2x8x1xf32> to vector<2x8x8xf32>
    %102 = arith.subf %98, %101 : vector<2x8x8xf32>
    %103 = math.exp %102 : vector<2x8x8xf32>
    %cst_42 = arith.constant dense<0.000000e+00> : vector<2x8xf32>
    %104 = vector.multi_reduction <add>, %103, %cst_42 [2] : vector<2x8x8xf32> to vector<2x8xf32>
    %105 = vector.shape_cast %104 : vector<2x8xf32> to vector<2x8x1xf32>
    %106 = tpu.reciprocal %105 {approx = true} : vector<2x8x1xf32> -> vector<2x8x1xf32>
    %107 = vector.broadcast %106 : vector<2x8x1xf32> to vector<2x8x8xf32>
    %108 = arith.mulf %103, %107 : vector<2x8x8xf32>
    "tpu.trace_start"() <{level = 10 : i32, message = "bqk,bkd->bqd"}> : () -> ()
    %cst_43 = arith.constant dense<0.000000e+00> : vector<2x8x8xf32>
    %109 = tpu.matmul %108, %97, %cst_43 {dimension_numbers = #tpu.dot_dimension_numbers<[2], [1], [1], [2], [0, 0, 0, 1, 1, 2], [0], [0]>} : vector<2x8x8xf32>, vector<2x8x8xf32>, vector<2x8x8xf32> -> vector<2x8x8xf32>
    "tpu.trace_stop"() : () -> ()
    %110 = vector.shape_cast %109 : vector<2x8x8xf32> to vector<16x8xf32>
    %111 = vector.extract_strided_slice %23 {offsets = [24, 0], sizes = [8, 32], strides = [1, 1]} : vector<32x32xf32> to vector<8x32xf32>
    %cst_44 = arith.constant dense<0.000000e+00> : vector<16x32xf32>
    %112 = tpu.matmul %110, %111, %cst_44 {dimension_numbers = #tpu.dot_dimension_numbers<[1], [0], [0], [1], [0, 0, 1, 1], [], []>} : vector<16x8xf32>, vector<8x32xf32>, vector<16x32xf32> -> vector<16x32xf32>
    %113 = arith.addf %92, %112 : vector<16x32xf32>
    %114 = vector.broadcast %25 : vector<1x32xf32> to vector<16x32xf32>
    %115 = arith.addf %113, %114 : vector<16x32xf32>
    %116 = vector.shape_cast %115 : vector<16x32xf32> to vector<2x8x32xf32>
    %c0_45 = arith.constant 0 : index
    %c0_46 = arith.constant 0 : index
    %c0_47 = arith.constant 0 : index
    %c0_48 = arith.constant 0 : index
    %117 = vector.load %arg10[%c0_45, %c0_46, %c0_47, %c0_48] : memref<1x2x8x32xf32, #tpu.memory_space<vmem>>, vector<1x2x8x32xf32>
    %118 = vector.shape_cast %117 : vector<1x2x8x32xf32> to vector<2x8x32xf32>
    %119 = vector.shape_cast %116 : vector<2x8x32xf32> to vector<1x2x8x32xf32>
    tpu.vector_store %arg10[%c0_45, %c0_46, %c0_47, %c0_48], %119 {strides = array<i32>} : memref<1x2x8x32xf32, #tpu.memory_space<vmem>>, vector<1x2x8x32xf32>,
    return
  }
  func.func @transform_0(%arg0: i32, %arg1: memref<6xi32, #tpu.memory_space<smem>>, %arg2: memref<6xi32, #tpu.memory_space<smem>>, %arg3: memref<6xi32, #tpu.memory_space<smem>>) -> (i32, i32, i32, i32) {
    %0 = arith.index_cast %arg0 : i32 to index
    %1 = memref.load %arg1[%0] : memref<6xi32, #tpu.memory_space<smem>>
    %c0_i32 = arith.constant 0 : i32
    %c0_i32_0 = arith.constant 0 : i32
    %c0_i32_1 = arith.constant 0 : i32
    %c0_i32_2 = arith.constant 0 : i32
    return %1, %c0_i32, %c0_i32_0, %c0_i32_1 : i32, i32, i32, i32
  }
  func.func @transform_1(%arg0: i32, %arg1: memref<6xi32, #tpu.memory_space<smem>>, %arg2: memref<6xi32, #tpu.memory_space<smem>>, %arg3: memref<6xi32, #tpu.memory_space<smem>>) -> (i32, i32, i32, i32) {
    %0 = arith.index_cast %arg0 : i32 to index
    %1 = memref.load %arg2[%0] : memref<6xi32, #tpu.memory_space<smem>>
    %c0_i32 = arith.constant 0 : i32
    %c0_i32_0 = arith.constant 0 : i32
    %c0_i32_1 = arith.constant 0 : i32
    %c0_i32_2 = arith.constant 0 : i32
    return %1, %c0_i32, %c0_i32_0, %c0_i32_1 : i32, i32, i32, i32
  }
  func.func @transform_2(%arg0: i32, %arg1: memref<6xi32, #tpu.memory_space<smem>>, %arg2: memref<6xi32, #tpu.memory_space<smem>>, %arg3: memref<6xi32, #tpu.memory_space<smem>>) -> (i32, i32, i32) {
    %0 = arith.index_cast %arg0 : i32 to index
    %1 = memref.load %arg3[%0] : memref<6xi32, #tpu.memory_space<smem>>
    %c0_i32 = arith.constant 0 : i32
    %c0_i32_0 = arith.constant 0 : i32
    %c0_i32_1 = arith.constant 0 : i32
    return %1, %c0_i32, %c0_i32_0 : i32, i32, i32
  }
  func.func @transform_3(%arg0: i32, %arg1: memref<6xi32, #tpu.memory_space<smem>>, %arg2: memref<6xi32, #tpu.memory_space<smem>>, %arg3: memref<6xi32, #tpu.memory_space<smem>>) -> (i32, i32, i32) {
    %0 = arith.index_cast %arg0 : i32 to index
    %1 = memref.load %arg3[%0] : memref<6xi32, #tpu.memory_space<smem>>
    %c0_i32 = arith.constant 0 : i32
    %c0_i32_0 = arith.constant 0 : i32
    %c0_i32_1 = arith.constant 0 : i32
    return %1, %c0_i32, %c0_i32_0 : i32, i32, i32
  }
  func.func @transform_4(%arg0: i32, %arg1: memref<6xi32, #tpu.memory_space<smem>>, %arg2: memref<6xi32, #tpu.memory_space<smem>>, %arg3: memref<6xi32, #tpu.memory_space<smem>>) -> (i32, i32, i32) {
    %0 = arith.index_cast %arg0 : i32 to index
    %1 = memref.load %arg3[%0] : memref<6xi32, #tpu.memory_space<smem>>
    %c0_i32 = arith.constant 0 : i32
    %c0_i32_0 = arith.constant 0 : i32
    %c0_i32_1 = arith.constant 0 : i32
    return %1, %c0_i32, %c0_i32_0 : i32, i32, i32
  }
  func.func @transform_5(%arg0: i32, %arg1: memref<6xi32, #tpu.memory_space<smem>>, %arg2: memref<6xi32, #tpu.memory_space<smem>>, %arg3: memref<6xi32, #tpu.memory_space<smem>>) -> (i32, i32, i32) {
    %0 = arith.index_cast %arg0 : i32 to index
    %1 = memref.load %arg3[%0] : memref<6xi32, #tpu.memory_space<smem>>
    %c0_i32 = arith.constant 0 : i32
    %c0_i32_0 = arith.constant 0 : i32
    %c0_i32_1 = arith.constant 0 : i32
    return %1, %c0_i32, %c0_i32_0 : i32, i32, i32
  }
  func.func @transform_6(%arg0: i32, %arg1: memref<6xi32, #tpu.memory_space<smem>>, %arg2: memref<6xi32, #tpu.memory_space<smem>>, %arg3: memref<6xi32, #tpu.memory_space<smem>>) -> (i32, i32, i32, i32) {
    %c0_i32 = arith.constant 0 : i32
    %c0_i32_0 = arith.constant 0 : i32
    %c0_i32_1 = arith.constant 0 : i32
    %c0_i32_2 = arith.constant 0 : i32
    return %arg0, %c0_i32, %c0_i32_0, %c0_i32_1 : i32, i32, i32, i32
  }
}

module attributes {stable_mosaic.version = 11 : i64} {
  func.func @_out_proj6_kernel(%arg0: i32, %arg1: memref<6x2x8x32xf32, #tpu.memory_space<vmem>>, %arg2: memref<6x32x64xf32, #tpu.memory_space<vmem>>, %arg3: memref<1x64xf32, #tpu.memory_space<vmem>>, %arg4: memref<16x64xf32, #tpu.memory_space<vmem>>) attributes {dimension_semantics = [#tpu.dimension_semantics<arbitrary>], iteration_bounds = array<i64: 1>, scalar_prefetch = 0 : i64, scratch_operands = 0 : i64, tpu.core_type = #tpu.core_type<tc>, window_params = [{pipeline_mode = #tpu.pipeline_mode<synchronous>, transform_indices = @transform_0, window_bounds = array<i64: 6, 2, 8, 32>}, {pipeline_mode = #tpu.pipeline_mode<synchronous>, transform_indices = @transform_1, window_bounds = array<i64: 6, 32, 64>}, {pipeline_mode = #tpu.pipeline_mode<synchronous>, transform_indices = @transform_2, window_bounds = array<i64: 1, 64>}, {pipeline_mode = #tpu.pipeline_mode<synchronous>, transform_indices = @transform_3, window_bounds = array<i64: 16, 64>}]} {
    %cst = arith.constant 0.000000e+00 : f32
    %0 = vector.broadcast %cst : f32 to vector<16x64xf32>
    %c0 = arith.constant 0 : index
    %c0_0 = arith.constant 0 : index
    %c0_1 = arith.constant 0 : index
    %c0_2 = arith.constant 0 : index
    %1 = vector.load %arg1[%c0, %c0_0, %c0_1, %c0_2] : memref<6x2x8x32xf32, #tpu.memory_space<vmem>>, vector<1x2x8x32xf32>
    %2 = vector.shape_cast %1 : vector<1x2x8x32xf32> to vector<2x8x32xf32>
    %3 = vector.shape_cast %2 : vector<2x8x32xf32> to vector<16x32xf32>
    %c0_3 = arith.constant 0 : index
    %c0_4 = arith.constant 0 : index
    %c0_5 = arith.constant 0 : index
    %4 = vector.load %arg2[%c0_3, %c0_4, %c0_5] : memref<6x32x64xf32, #tpu.memory_space<vmem>>, vector<1x32x64xf32>
    %5 = vector.shape_cast %4 : vector<1x32x64xf32> to vector<32x64xf32>
    %cst_6 = arith.constant dense<0.000000e+00> : vector<16x64xf32>
    %6 = tpu.matmul %3, %5, %cst_6 {dimension_numbers = #tpu.dot_dimension_numbers<[1], [0], [0], [1], [0, 0, 1, 1], [], []>} : vector<16x32xf32>, vector<32x64xf32>, vector<16x64xf32> -> vector<16x64xf32>
    %7 = arith.addf %0, %6 : vector<16x64xf32>
    %c1 = arith.constant 1 : index
    %c0_7 = arith.constant 0 : index
    %c0_8 = arith.constant 0 : index
    %c0_9 = arith.constant 0 : index
    %8 = vector.load %arg1[%c1, %c0_7, %c0_8, %c0_9] : memref<6x2x8x32xf32, #tpu.memory_space<vmem>>, vector<1x2x8x32xf32>
    %9 = vector.shape_cast %8 : vector<1x2x8x32xf32> to vector<2x8x32xf32>
    %10 = vector.shape_cast %9 : vector<2x8x32xf32> to vector<16x32xf32>
    %c1_10 = arith.constant 1 : index
    %c0_11 = arith.constant 0 : index
    %c0_12 = arith.constant 0 : index
    %11 = vector.load %arg2[%c1_10, %c0_11, %c0_12] : memref<6x32x64xf32, #tpu.memory_space<vmem>>, vector<1x32x64xf32>
    %12 = vector.shape_cast %11 : vector<1x32x64xf32> to vector<32x64xf32>
    %cst_13 = arith.constant dense<0.000000e+00> : vector<16x64xf32>
    %13 = tpu.matmul %10, %12, %cst_13 {dimension_numbers = #tpu.dot_dimension_numbers<[1], [0], [0], [1], [0, 0, 1, 1], [], []>} : vector<16x32xf32>, vector<32x64xf32>, vector<16x64xf32> -> vector<16x64xf32>
    %14 = arith.addf %7, %13 : vector<16x64xf32>
    %c2 = arith.constant 2 : index
    %c0_14 = arith.constant 0 : index
    %c0_15 = arith.constant 0 : index
    %c0_16 = arith.constant 0 : index
    %15 = vector.load %arg1[%c2, %c0_14, %c0_15, %c0_16] : memref<6x2x8x32xf32, #tpu.memory_space<vmem>>, vector<1x2x8x32xf32>
    %16 = vector.shape_cast %15 : vector<1x2x8x32xf32> to vector<2x8x32xf32>
    %17 = vector.shape_cast %16 : vector<2x8x32xf32> to vector<16x32xf32>
    %c2_17 = arith.constant 2 : index
    %c0_18 = arith.constant 0 : index
    %c0_19 = arith.constant 0 : index
    %18 = vector.load %arg2[%c2_17, %c0_18, %c0_19] : memref<6x32x64xf32, #tpu.memory_space<vmem>>, vector<1x32x64xf32>
    %19 = vector.shape_cast %18 : vector<1x32x64xf32> to vector<32x64xf32>
    %cst_20 = arith.constant dense<0.000000e+00> : vector<16x64xf32>
    %20 = tpu.matmul %17, %19, %cst_20 {dimension_numbers = #tpu.dot_dimension_numbers<[1], [0], [0], [1], [0, 0, 1, 1], [], []>} : vector<16x32xf32>, vector<32x64xf32>, vector<16x64xf32> -> vector<16x64xf32>
    %21 = arith.addf %14, %20 : vector<16x64xf32>
    %c3 = arith.constant 3 : index
    %c0_21 = arith.constant 0 : index
    %c0_22 = arith.constant 0 : index
    %c0_23 = arith.constant 0 : index
    %22 = vector.load %arg1[%c3, %c0_21, %c0_22, %c0_23] : memref<6x2x8x32xf32, #tpu.memory_space<vmem>>, vector<1x2x8x32xf32>
    %23 = vector.shape_cast %22 : vector<1x2x8x32xf32> to vector<2x8x32xf32>
    %24 = vector.shape_cast %23 : vector<2x8x32xf32> to vector<16x32xf32>
    %c3_24 = arith.constant 3 : index
    %c0_25 = arith.constant 0 : index
    %c0_26 = arith.constant 0 : index
    %25 = vector.load %arg2[%c3_24, %c0_25, %c0_26] : memref<6x32x64xf32, #tpu.memory_space<vmem>>, vector<1x32x64xf32>
    %26 = vector.shape_cast %25 : vector<1x32x64xf32> to vector<32x64xf32>
    %cst_27 = arith.constant dense<0.000000e+00> : vector<16x64xf32>
    %27 = tpu.matmul %24, %26, %cst_27 {dimension_numbers = #tpu.dot_dimension_numbers<[1], [0], [0], [1], [0, 0, 1, 1], [], []>} : vector<16x32xf32>, vector<32x64xf32>, vector<16x64xf32> -> vector<16x64xf32>
    %28 = arith.addf %21, %27 : vector<16x64xf32>
    %c4 = arith.constant 4 : index
    %c0_28 = arith.constant 0 : index
    %c0_29 = arith.constant 0 : index
    %c0_30 = arith.constant 0 : index
    %29 = vector.load %arg1[%c4, %c0_28, %c0_29, %c0_30] : memref<6x2x8x32xf32, #tpu.memory_space<vmem>>, vector<1x2x8x32xf32>
    %30 = vector.shape_cast %29 : vector<1x2x8x32xf32> to vector<2x8x32xf32>
    %31 = vector.shape_cast %30 : vector<2x8x32xf32> to vector<16x32xf32>
    %c4_31 = arith.constant 4 : index
    %c0_32 = arith.constant 0 : index
    %c0_33 = arith.constant 0 : index
    %32 = vector.load %arg2[%c4_31, %c0_32, %c0_33] : memref<6x32x64xf32, #tpu.memory_space<vmem>>, vector<1x32x64xf32>
    %33 = vector.shape_cast %32 : vector<1x32x64xf32> to vector<32x64xf32>
    %cst_34 = arith.constant dense<0.000000e+00> : vector<16x64xf32>
    %34 = tpu.matmul %31, %33, %cst_34 {dimension_numbers = #tpu.dot_dimension_numbers<[1], [0], [0], [1], [0, 0, 1, 1], [], []>} : vector<16x32xf32>, vector<32x64xf32>, vector<16x64xf32> -> vector<16x64xf32>
    %35 = arith.addf %28, %34 : vector<16x64xf32>
    %c5 = arith.constant 5 : index
    %c0_35 = arith.constant 0 : index
    %c0_36 = arith.constant 0 : index
    %c0_37 = arith.constant 0 : index
    %36 = vector.load %arg1[%c5, %c0_35, %c0_36, %c0_37] : memref<6x2x8x32xf32, #tpu.memory_space<vmem>>, vector<1x2x8x32xf32>
    %37 = vector.shape_cast %36 : vector<1x2x8x32xf32> to vector<2x8x32xf32>
    %38 = vector.shape_cast %37 : vector<2x8x32xf32> to vector<16x32xf32>
    %c5_38 = arith.constant 5 : index
    %c0_39 = arith.constant 0 : index
    %c0_40 = arith.constant 0 : index
    %39 = vector.load %arg2[%c5_38, %c0_39, %c0_40] : memref<6x32x64xf32, #tpu.memory_space<vmem>>, vector<1x32x64xf32>
    %40 = vector.shape_cast %39 : vector<1x32x64xf32> to vector<32x64xf32>
    %cst_41 = arith.constant dense<0.000000e+00> : vector<16x64xf32>
    %41 = tpu.matmul %38, %40, %cst_41 {dimension_numbers = #tpu.dot_dimension_numbers<[1], [0], [0], [1], [0, 0, 1, 1], [], []>} : vector<16x32xf32>, vector<32x64xf32>, vector<16x64xf32> -> vector<16x64xf32>
    %42 = arith.addf %35, %41 : vector<16x64xf32>
    %c0_42 = arith.constant 0 : index
    %c0_43 = arith.constant 0 : index
    %43 = vector.load %arg3[%c0_42, %c0_43] : memref<1x64xf32, #tpu.memory_space<vmem>>, vector<1x64xf32>
    %44 = vector.broadcast %43 : vector<1x64xf32> to vector<16x64xf32>
    %45 = arith.addf %42, %44 : vector<16x64xf32>
    %c0_44 = arith.constant 0 : index
    %c0_45 = arith.constant 0 : index
    %46 = vector.load %arg4[%c0_44, %c0_45] : memref<16x64xf32, #tpu.memory_space<vmem>>, vector<16x64xf32>
    tpu.vector_store %arg4[%c0_44, %c0_45], %45 {strides = array<i32>} : memref<16x64xf32, #tpu.memory_space<vmem>>, vector<16x64xf32>,
    return
  }
  func.func @transform_0(%arg0: i32) -> (i32, i32, i32, i32) {
    %c0_i32 = arith.constant 0 : i32
    %c0_i32_0 = arith.constant 0 : i32
    %c0_i32_1 = arith.constant 0 : i32
    %c0_i32_2 = arith.constant 0 : i32
    %c0_i32_3 = arith.constant 0 : i32
    return %c0_i32, %c0_i32_0, %c0_i32_1, %c0_i32_2 : i32, i32, i32, i32
  }
  func.func @transform_1(%arg0: i32) -> (i32, i32, i32) {
    %c0_i32 = arith.constant 0 : i32
    %c0_i32_0 = arith.constant 0 : i32
    %c0_i32_1 = arith.constant 0 : i32
    %c0_i32_2 = arith.constant 0 : i32
    return %c0_i32, %c0_i32_0, %c0_i32_1 : i32, i32, i32
  }
  func.func @transform_2(%arg0: i32) -> (i32, i32) {
    %c0_i32 = arith.constant 0 : i32
    %c0_i32_0 = arith.constant 0 : i32
    %c0_i32_1 = arith.constant 0 : i32
    return %c0_i32, %c0_i32_0 : i32, i32
  }
  func.func @transform_3(%arg0: i32) -> (i32, i32) {
    %c0_i32 = arith.constant 0 : i32
    %c0_i32_0 = arith.constant 0 : i32
    %c0_i32_1 = arith.constant 0 : i32
    return %c0_i32, %c0_i32_0 : i32, i32
  }
}

</mosaic_0001>

<bundles_post_ra>
// kernel: multimodal_transformer_forward.5
= control target key start
LH: loop header
LB: loop body
LE: loop exit
PB: predicated region body
PF: predicated region fallthrough
CT: control target
= control target key end

     0   :  { %vm32_vm0 = vcmask 261120   ;;  %s374_s3 = inlined_call_operand.vmem [shape: f32[32,32], index: 3, kind: input, shape index: {}]   ;;  %s375_s2 = inlined_call_operand.vmem [shape: f32[32,32], index: 2, kind: input, shape index: {}]   ;;  %s376_s1 = inlined_call_operand.vmem [shape: f32[2,8,32], index: 1, kind: input, shape index: {}]   ;;  %s377_s5 = inlined_call_operand.vmem [shape: f32[3,2,8,32], index: 5, kind: output, shape index: {}]   ;;  %s378_s0 = inlined_call_operand.vmem [shape: f32[2,8,32], index: 0, kind: input, shape index: {}]   ;;  %s379_s4 = inlined_call_operand.vmem [shape: f32[1,32], index: 4, kind: input, shape index: {}]  }
   0x1   :  { %v28_v0 = vld [vmem:[%s374_s3] sm:$0xff]  ;;  %v29_v1 = vld [vmem:[%s374_s3 + $0x8] sm:$0xff]  ;;  %v30_v5 = vld [vmem:[%s374_s3 + $0x10] sm:$0xff] }
   0x2   :  { %v24_v2 = vld [vmem:[%s375_s2] sm:$0xff]  ;;  %v259_v3 = vpack.c.bf16 %v29_v1, %v28_v0  ;;  %v25_v4 = vld [vmem:[%s375_s2 + $0x8] sm:$0xff]  ;;  %v31_v6 = vld [vmem:[%s374_s3 + $0x18] sm:$0xff] }
   0x3   :  { %v267_v7 = vpack.c.bf16 %v25_v4, %v24_v2  ;;  %v263_v8 = vpack.c.bf16 %v31_v6, %v30_v5  ;;  %v26_v9 = vld [vmem:[%s375_s2 + $0x10] sm:$0xff]  ;;  %v27_v10 = vld [vmem:[%s375_s2 + $0x18] sm:$0xff]  ;;  %v22_v11 = vld [vmem:[%s376_s1] sm:$0xff] }
   0x4   :  { %260 = vmatprep.subr.bf16.mxu1 %v259_v3  ;;  %v271_v12 = vpack.c.bf16 %v27_v10, %v26_v9  ;;  %v23_v13 = vld [vmem:[%s376_s1 + $0x8] sm:$0xff]  ;;  %245 = vmatprep.mubr.msk.f32.mxu1 %vm32_vm0, %v22_v11  ;;  %221 = vst.msk [vmem:[%s377_s5 + $0x10] sm:$0xff] %vm32_vm0, %v22_v11  ;;  %v20_v14 = vld [vmem:[%s378_s0] sm:$0xff] }
   0x5   :  { %v21_v15 = vld [vmem:[%s378_s0 + $0x8] sm:$0xff]  ;;  %268 = vmatprep.subr.bf16.mxu0 %v267_v7  ;;  %262 = vmatpush3.bf16.msra.mxu1 %v259_v3  ;;  %222 = vst.msk [vmem:[%s377_s5 + $0x18] sm:$0xff] %vm32_vm0, %v23_v13  ;;  %204 = vst.msk [vmem:[%s377_s5] sm:$0xff] %vm32_vm0, %v20_v14  ;;  %v220_v18 = vld [vmem:[%s379_s4] ss:$0 sm:$0xff] }
   0x6   :  { %205 = vst.msk [vmem:[%s377_s5 + $0x8] sm:$0xff] %vm32_vm0, %v21_v15  ;;  %270 = vmatpush3.bf16.msra.mxu0 %v267_v7  ;;  %264 = vmatprep.subr.bf16.mxu1 %v263_v8 }
   0x7   :  { %272 = vmatprep.subr.bf16.mxu0 %v271_v12  ;;  %256 = vmatprep.mubr.msk.f32.mxu0 %vm32_vm0, %v20_v14 }
   0x9   :  { %266 = vmatpush3.bf16.msra.mxu1 %v263_v8 }
   0xa   :  { %274 = vmatpush3.bf16.msra.mxu0 %v271_v12 }
   0xc   :  { %246 = vmatmul.mubr.msk.f32.vlgmr.msra.gmra.mrb[0].mxu1 %vm32_vm0, %v23_v13 }
   0xd   :  { %257 = vmatmul.mubr.msk.f32.vlgmr.msra.gmra.mrb[0].mxu0 %vm32_vm0, %v21_v15 }
  0xdf   :  { %v247_v16 = vpop.f32.mrb[0].mxu1 }
  0xe0   :  { %v258_v17 = vpop.f32.mrb[0].mxu0  ;;  %v105_v19 = vpop.f32.mrb[1].mxu1 }
  0xe1   :  { %v192_v20 = vadd.f32 %v258_v17, %v247_v16  ;;  %v186_v21 = vpop.f32.mrb[1].mxu0 }
  0xe2   :  { %v187_v22 = vadd.f32 %v186_v21, %v105_v19 }
  0xe3   :  { %v203_v23 = vadd.f32 %v220_v18, %v192_v20 }
  0xe4   :  { %v202_v24 = vadd.f32 %v220_v18, %v187_v22 }
  0xe5   :  { %224 = vst.msk [vmem:[%s377_s5 + $0x28] sm:$0xff] %vm32_vm0, %v203_v23 }
  0xe6   :  { %223 = vst.msk [vmem:[%s377_s5 + $0x20] sm:$0xff] %vm32_vm0, %v202_v24 }

// kernel: multimodal_transformer_forward.9
= control target key start
LH: loop header
LB: loop body
LE: loop exit
PB: predicated region body
PF: predicated region fallthrough
CT: control target
= control target key end

     0   :  { %vm28_vm0 = vcmask 261120   ;;  %vm564_vm1 = vcmask 523264   ;;  %s923_s1 = inlined_call_operand.vmem [shape: f32[6,32,64], index: 1, kind: input, shape index: {}]   ;;  %s924_s0 = inlined_call_operand.vmem [shape: f32[6,2,8,32], index: 0, kind: input, shape index: {}]   ;;  %s925_s2 = inlined_call_operand.vmem [shape: f32[1,64], index: 2, kind: input, shape index: {}]   ;;  %s926_s3 = inlined_call_operand.vmem [shape: f32[16,64], index: 3, kind: output, shape index: {}]  }
   0x1   :  { %v573_v0 = vld [vmem:[%s923_s1 + $0x20] sm:$0xff]  ;;  %v574_v1 = vld [vmem:[%s923_s1 + $0x28] sm:$0xff]  ;;  %v575_v5 = vld [vmem:[%s923_s1 + $0x30] sm:$0xff] }
   0x2   :  { %v591_v2 = vld [vmem:[%s923_s1 + $0x60] sm:$0xff]  ;;  %v716_v3 = vpack.c.bf16 %v574_v1, %v573_v0  ;;  %v592_v4 = vld [vmem:[%s923_s1 + $0x68] sm:$0xff]  ;;  %v576_v6 = vld [vmem:[%s923_s1 + $0x38] sm:$0xff] }
   0x3   :  { %v740_v7 = vpack.c.bf16 %v592_v4, %v591_v2  ;;  %v720_v8 = vpack.c.bf16 %v576_v6, %v575_v5  ;;  %v593_v9 = vld [vmem:[%s923_s1 + $0x70] sm:$0xff]  ;;  %v594_v10 = vld [vmem:[%s923_s1 + $0x78] sm:$0xff]  ;;  %v16_v14 = vld [vmem:[%s923_s1] sm:$0xff] }
   0x4   :  { %v571_v11 = vld [vmem:[%s924_s0 + $0x10] sm:$0xff]  ;;  %717 = vmatprep.subr.bf16.mxu1 %v716_v3  ;;  %v744_v12 = vpack.c.bf16 %v594_v10, %v593_v9  ;;  %v17_v15 = vld [vmem:[%s923_s1 + $0x8] sm:$0xff]  ;;  %v599_v16 = vld [vmem:[%s923_s1 + $0x80] sm:$0xff] }
   0x5   :  { %658 = vmatprep.mubr.msk.f32.mxu1 %vm28_vm0, %v571_v11  ;;  %v589_v13 = vld [vmem:[%s924_s0 + $0x30] sm:$0xff]  ;;  %741 = vmatprep.subr.bf16.mxu0 %v740_v7  ;;  %v724_v17 = vpack.c.bf16 %v17_v15, %v16_v14  ;;  %v600_v18 = vld [vmem:[%s923_s1 + $0x88] sm:$0xff]  ;;  %v19_v21 = vld [vmem:[%s923_s1 + $0x18] sm:$0xff] }
   0x6   :  { %719 = vmatpush3.bf16.msra.mxu1 %v716_v3  ;;  %743 = vmatpush3.bf16.msra.mxu0 %v740_v7  ;;  %v748_v19 = vpack.c.bf16 %v600_v18, %v599_v16  ;;  %v18_v20 = vld [vmem:[%s923_s1 + $0x10] sm:$0xff]  ;;  %v602_v23 = vld [vmem:[%s923_s1 + $0x98] sm:$0xff]  ;;  %v583_v28 = vld [vmem:[%s923_s1 + $0x40] sm:$0xff] }
   0x7   :  { %721 = vmatprep.subr.bf16.mxu1 %v720_v8  ;;  %745 = vmatprep.subr.bf16.mxu0 %v744_v12  ;;  %v601_v22 = vld [vmem:[%s923_s1 + $0x90] sm:$0xff]  ;;  %v572_v24 = vld [vmem:[%s924_s0 + $0x18] sm:$0xff]  ;;  %v728_v26 = vpack.c.bf16 %v19_v21, %v18_v20  ;;  %v584_v29 = vld [vmem:[%s923_s1 + $0x48] sm:$0xff] }
   0x8   :  { %691 = vmatprep.mubr.msk.f32.mxu0 %vm28_vm0, %v589_v13  ;;  %v590_v25 = vld [vmem:[%s924_s0 + $0x38] sm:$0xff]  ;;  %v752_v27 = vpack.c.bf16 %v602_v23, %v601_v22  ;;  %v14_v30 = vld [vmem:[%s924_s0] sm:$0xff]  ;;  %v608_v32 = vld [vmem:[%s923_s1 + $0xa8] sm:$0xff]  ;;  %v732_v34 = vpack.c.bf16 %v584_v29, %v583_v28 }
   0x9   :  { %v607_v31 = vld [vmem:[%s923_s1 + $0xa0] sm:$0xff]  ;;  %v585_v36 = vld [vmem:[%s923_s1 + $0x50] sm:$0xff]  ;;  %v586_v37 = vld [vmem:[%s923_s1 + $0x58] sm:$0xff] }
   0xa   :  { %723 = vmatpush3.bf16.msra.mxu1 %v720_v8  ;;  %747 = vmatpush3.bf16.msra.mxu0 %v744_v12  ;;  %v597_v33 = vld [vmem:[%s924_s0 + $0x40] sm:$0xff]  ;;  %v756_v35 = vpack.c.bf16 %v608_v32, %v607_v31  ;;  %v609_v38 = vld [vmem:[%s923_s1 + $0xb0] sm:$0xff]  ;;  %v610_v39 = vld [vmem:[%s923_s1 + $0xb8] sm:$0xff]  ;;  %v736_v42 = vpack.c.bf16 %v586_v37, %v585_v36 }
   0xb   :  { %725 = vmatprep.subr.bf16.mxu1 %v724_v17  ;;  %749 = vmatprep.subr.bf16.mxu0 %v748_v19  ;;  %v15_v40 = vld [vmem:[%s924_s0 + $0x8] sm:$0xff]  ;;  %v760_v43 = vpack.c.bf16 %v610_v39, %v609_v38  ;;  %v581_v44 = vld [vmem:[%s924_s0 + $0x20] sm:$0xff]  ;;  %v605_v45 = vld [vmem:[%s924_s0 + $0x50] sm:$0xff] }
   0xc   :  { %v598_v41 = vld [vmem:[%s924_s0 + $0x48] sm:$0xff]  ;;  %v606_v47 = vld [vmem:[%s924_s0 + $0x58] sm:$0xff]  ;;  %v613_v50 = vld [vmem:[%s925_s2] ss:$0 sm:$0xff] }
   0xd   :  { %659 = vmatmul.mubr.msk.f32.vlgmr.msra.gmra.mrb[0].mxu1 %vm28_vm0, %v572_v24  ;;  %692 = vmatmul.mubr.msk.f32.vlgmr.msra.gmra.mrb[0].mxu0 %vm28_vm0, %v590_v25  ;;  %v582_v46 = vld [vmem:[%s924_s0 + $0x28] sm:$0xff] }
   0xe   :  { %727 = vmatpush3.bf16.msra.mxu1 %v724_v17  ;;  %751 = vmatpush3.bf16.msra.mxu0 %v748_v19 }
   0xf   :  { %729 = vmatprep.subr.bf16.mxu1 %v728_v26  ;;  %753 = vmatprep.subr.bf16.mxu0 %v752_v27 }
  0x10   :  { %669 = vmatprep.mubr.msk.f32.mxu1 %vm28_vm0, %v14_v30  ;;  %702 = vmatprep.mubr.msk.f32.mxu0 %vm28_vm0, %v597_v33 }
  0x12   :  { %731 = vmatpush3.bf16.msra.mxu1 %v728_v26  ;;  %755 = vmatpush3.bf16.msra.mxu0 %v752_v27 }
  0x13   :  { %733 = vmatprep.subr.bf16.mxu1 %v732_v34  ;;  %757 = vmatprep.subr.bf16.mxu0 %v756_v35 }
  0x15   :  { %670 = vmatmul.mubr.msk.f32.vlgmr.msra.gmra.mrb[0].mxu1 %vm28_vm0, %v15_v40  ;;  %703 = vmatmul.mubr.msk.f32.vlgmr.msra.gmra.mrb[0].mxu0 %vm28_vm0, %v598_v41 }
  0x16   :  { %735 = vmatpush3.bf16.msra.mxu1 %v732_v34  ;;  %759 = vmatpush3.bf16.msra.mxu0 %v756_v35 }
  0x17   :  { %737 = vmatprep.subr.bf16.mxu1 %v736_v42  ;;  %761 = vmatprep.subr.bf16.mxu0 %v760_v43 }
  0x18   :  { %680 = vmatprep.mubr.msk.f32.mxu1 %vm28_vm0, %v581_v44  ;;  %713 = vmatprep.mubr.msk.f32.mxu0 %vm28_vm0, %v605_v45 }
  0x1a   :  { %739 = vmatpush3.bf16.msra.mxu1 %v736_v42  ;;  %763 = vmatpush3.bf16.msra.mxu0 %v760_v43 }
  0x1d   :  { %681 = vmatmul.mubr.msk.f32.vlgmr.msra.gmra.mrb[0].mxu1 %vm28_vm0, %v582_v46  ;;  %714 = vmatmul.mubr.msk.f32.vlgmr.msra.gmra.mrb[0].mxu0 %vm28_vm0, %v606_v47 }
  0xf0   :  { %v682_v48 = vpop.f32.mrb[0].mxu1  ;;  %v715_v49 = vpop.f32.mrb[0].mxu0 }
  0xf1   :  { %v271_v51 = vpop.f32.mrb[1].mxu1  ;;  %v764_v52 = vadd.f32 %v715_v49, %v682_v48  ;;  %v544_v53 = vpop.f32.mrb[1].mxu0 }
  0xf2   :  { %v765_v54 = vadd.f32 %v544_v53, %v271_v51 }
  0xf3   :  { %v563_v55 = vadd.f32 %v764_v52, %v613_v50 }
  0xf4   :  { %v562_v56 = vadd.f32 %v765_v54, %v613_v50 }
  0xf5   :  { %566 = vst.msk [vmem:[%s926_s3 + $0x8] sm:$0xff] %vm564_vm1, %v563_v55 }
  0xf6   :  { %565 = vst.msk [vmem:[%s926_s3] sm:$0xff] %vm564_vm1, %v562_v56 }

// kernel: multimodal_transformer_forward.8
= control target key start
LH: loop header
LB: loop body
LE: loop exit
PB: predicated region body
PF: predicated region fallthrough
CT: control target
= control target key end

     0   :  { %s3010_s0 = inlined_call_operand.vmem [shape: s32[6], index: 0, kind: input, shape index: {}, may-alias: {0,2}]   ;;  %s3011_s3 = inlined_call_operand.vmem [shape: f32[3,2,8,32], index: 3, kind: input, shape index: {}, may-alias: {3,4}]   ;;  %s3012_s4 = inlined_call_operand.vmem [shape: f32[3,2,8,32], index: 4, kind: input, shape index: {}, may-alias: {3,4}]   ;;  %s3013_s5 = inlined_call_operand.vmem [shape: f32[3,32,96], index: 5, kind: input, shape index: {}]   ;;  %s3014_s6 = inlined_call_operand.vmem [shape: f32[3,1,96], index: 6, kind: input, shape index: {}]   ;;  %s3015_s7 = inlined_call_operand.vmem [shape: f32[3,32,32], index: 7, kind: input, shape index: {}]   ;;  %s3016_s8 = inlined_call_operand.vmem [shape: f32[3,1,32], index: 8, kind: input, shape index: {}]   ;;  %s3017_s9 = inlined_call_operand.vmem [shape: f32[6,2,8,32], index: 9, kind: output, shape index: {}]   ;;  %s3018_s1 = inlined_call_operand.vmem [shape: s32[6], index: 1, kind: input, shape index: {}]   ;;  %s3019_s2 = inlined_call_operand.vmem [shape: s32[6], index: 2, kind: input, shape index: {}, may-alias: {0,2}]  }
   0x1   :  { %s14_s11 = sshll.u32 %s3010_s0, 4  ;;  %s18_s14 = sshll.u32 %s3018_s1, 4  ;;  %s15_s11 = int_to_ptr.vmem [resolvable:$true] %s14_s11  ;;  %s19_s14 = int_to_ptr.vmem [resolvable:$true] %s18_s14 }
   0x2   :  { %s2689_s15 = scalar_lea.vmem %s15_s11, 16  ;;  %p2694_p1 = scmp.lt.s32.totalorder %s15_s11, %s15_s11 }
   0x3   :  { %p2690_p0 = scmp.ne.s32.totalorder %s15_s11, %s2689_s15  ;;  %p2695_p2 = scmp.lt.s32.totalorder %s2689_s15, %s2689_s15 }
   0x5   :  { %p2696_p3 = por %p2695_p2, %p2694_p1 }
   0x7   :  { %p2697_p4 = pnand %p2696_p3, %p2690_p0 }
   0x9   :  { %2700 = shalt.err (!%p2697_p4)  }
   0xa   :  { %s2735_s16 = smov [#allocation3]   ;;  %s2701_s17 = scalar_lea.vmem %s19_s14, 16 }
   0xb   :  { %17 = dma.vmem_to_smem %s15_s11, 16, %s2735_s16, [#allocation2] }
   0xc   :  { %p2702_p5 = scmp.ne.s32.totalorder %s19_s14, %s2701_s17  ;;  %p2706_p6 = scmp.lt.s32.totalorder %s19_s14, %s19_s14 }
   0xd   :  { %p2707_p7 = scmp.lt.s32.totalorder %s2701_s17, %s2701_s17 }
   0xf   :  { %p2708_p8 = por %p2707_p7, %p2706_p6 }
  0x11   :  { %p2709_p9 = pnand %p2708_p8, %p2702_p5 }
  0x13   :  { %2712 = shalt.err (!%p2709_p9)  }
  0x14   :  { %s2736_s0 = smov [#allocation4]   ;;  %s22_s19 = sshll.u32 %s3019_s2, 4  ;;  %s23_s19 = int_to_ptr.vmem [resolvable:$true] %s22_s19 }
  0x15   :  { %21 = dma.vmem_to_smem %s19_s14, 16, %s2736_s0, [#allocation2] }
  0x16   :  { %s2713_s20 = scalar_lea.vmem %s23_s19, 16  ;;  %p2718_p11 = scmp.lt.s32.totalorder %s23_s19, %s23_s19 }
  0x17   :  { %p2714_p10 = scmp.ne.s32.totalorder %s23_s19, %s2713_s20  ;;  %p2719_p12 = scmp.lt.s32.totalorder %s2713_s20, %s2713_s20 }
  0x19   :  { %p2720_p13 = por %p2719_p12, %p2718_p11 }
  0x1b   :  { %p2721_p0 = pnand %p2720_p13, %p2714_p10 }
  0x1d   :  { %2724 = shalt.err (!%p2721_p0)  }
  0x1e   :  { %s2737_s21 = smov [#allocation5]  }
  0x1f   :  { %25 = dma.vmem_to_smem %s23_s19, 16, %s2737_s21, [#allocation2] }
  0x20   :  { %2729 = dma.done.wait [#allocation2], 48 }
  0x21   :  { %2730 = vsyncadd [#allocation2], 4294967248 }
  0x22   :  { %27 = sfence }
  0x23   :  { %s2806_s22 = smov 0  }
  0x24 LB: > { %s2812_s2 = sadd.s32 4294967295, %s2733_s22   ;;  %p2371_p1 = scmp.ge.s32.totalorder %s2733_s22, 1  ;;  %s2733_s22 = sphi %s2806_s22, %s33_s22  }
  0x25   : > { %p299_p2 = scmp.lt.s32.totalorder %s2733_s22, 7 }
  0x27   : > { %p300_p3 = pnand %p2371_p1, %p299_p2 }
  0x28   : > { %s370_s23 = sld [smem:[#allocation5 + %s2812_s2]] (!%p300_p3)  ;;  %vm414_vm0 = vcmask (!%p300_p3), 261120   ;;  %s2738_s14 = smov (!%p300_p3), 96   ;;  %v2739_v21 = vmov (!%p300_p3), 0.0   ;;  %vm2740_vm1 = vmmov (!%p300_p3), 0   ;;  %vm603_vm2 = vcmask (!%p300_p3), 64512  }
  0x29   : > { %303 = sbr.rel (%p300_p3) target bundleno = 3163 (0xc5b), region = 44  ;;  %s363_s24 = sld [smem:[#allocation4 + %s2812_s2]] (!%p300_p3) }
  0x2a   : > { %s356_s25 = sld [smem:[#allocation3 + %s2812_s2]] (!%p300_p3)  ;;  %s2741_s20 = smov (!%p300_p3), 120  }
  0x2b   : > { %s377_s13 = sld [smem:[#allocation5 + %s2812_s2]] (!%p300_p3)  ;;  %s2742_s21 = smov (!%p300_p3), 112  }
  0x2c   : > { %s2746_s10 = smov (!%p300_p3), 72   ;;  %s389_s11 = sld [smem:[#allocation5 + %s2812_s2]] (!%p300_p3) }
  0x2d   : > { %p394_p10 = scmp.lt.s32.totalorder (!%p300_p3), %s2812_s2, 5 }
  0x2e   : > { %p371_p4 = scmp.lt.s32.totalorder (!%p300_p3), %s370_s23, 2 }
  0x2f   : > { %p364_p5 = scmp.lt.s32.totalorder (!%p300_p3), %s363_s24, 2 }
  0x30   : > { %p357_p6 = scmp.lt.s32.totalorder %s356_s25, 2  ;;  %s3021_s23 = smov (!%p371_p4, %s370_s23), 2 }
  0x31   : > { %s3023_s24 = smov (!%p364_p5, %s363_s24), 2  ;;  %s2424_s26 = sshll.u32 %s3021_s23, 5 }
  0x32   : > { %s375_s29 = scalar_lea.vmem %s3013_s5, %s2424_s26  ;;  %s2423_s30 = sshll.u32 %s3023_s24, 4 }
  0x33   : > { %v403_v0 = vld [vmem:[%s375_s29] sm:$0xff]  ;;  %v404_v1 = vld [vmem:[%s375_s29 + $0x8] sm:$0xff]  ;;  %v405_v2 = vld [vmem:[%s375_s29 + $0x10] sm:$0xff]  ;;  %s2825_s12 = scalar_lea.vmem %s3012_s4, %s2423_s30  ;;  %s3025_s25 = smov (!%p357_p6, %s356_s25), 2 }
  0x34   : > { %v2647_v3 = vpack.i.bf16 %v404_v1, %v403_v0  ;;  %v406_v4 = vld [vmem:[%s375_s29 + $0x18] sm:$0xff]  ;;  %v2605_v5 = vpack.c.bf16 %v404_v1, %v403_v0  ;;  %v401_v6 = vld [vmem:[%s2825_s12] sm:$0xff]  ;;  %s2422_s15 = sshll.u32 %s3025_s25, 4  ;;  %p378_p7 = scmp.lt.s32.totalorder %s377_s13, 2  ;;  %v402_v20 = vld [vmem:[%s2825_s12 + $0x8] sm:$0xff] }
  0x35   : > { %v2609_v7 = vpack.c.bf16 %v406_v4, %v405_v2  ;;  %2502 = vmatprep.mubr.msk.f32.mxu1 %vm414_vm0, %v401_v6  ;;  %v2652_v8 = vpack.i.bf16 %v406_v4, %v405_v2  ;;  %s361_s0 = scalar_lea.vmem %s3011_s3, %s2422_s15  ;;  %s2743_s23 = smov 88  }
  0x36   : > { %2648 = vrot.lane.b32.xlu0 %v2647_v3, %s2738_s14  ;;  %2606 = vmatprep.subr.bf16.mxu0 %v2605_v5  ;;  %v399_v9 = vld [vmem:[%s361_s0] sm:$0xff]  ;;  %v400_v10 = vld [vmem:[%s361_s0 + $0x8] sm:$0xff]  ;;  %s3027_s13 = smov (!%p378_p7, %s377_s13), 2  ;;  %s2744_s24 = smov 80  }
  0x37   : > { %2608 = vmatpush3.bf16.msra.mxu0 %v2605_v5  ;;  %2491 = vmatprep.mubr.msk.f32.mxu0 %vm414_vm0, %v399_v9  ;;  %s380_s19 = scalar_lea.vmem %s3014_s6, %s3027_s13  ;;  %s2745_s25 = smov 104  }
  0x38   : > { %2610 = vmatprep.subr.bf16.mxu0 %v2609_v7  ;;  %v2382_v11 = vld [vmem:[%s380_s19] ss:$0 sm:$0xff]  ;;  %s382_s26 = sld [smem:[#allocation5 + %s2812_s2]]  ;;  %p390_p9 = scmp.lt.s32.totalorder %s389_s11, 2 }
  0x39   : > { %512 = vrot.lane.b32.xlu1 %v2382_v11, %s2738_s14  ;;  %s3033_s2 = smov (!%p394_p10, %s2812_s2), 5 }
  0x3a   : > { %2653 = vrot.lane.b32.xlu0 %v2652_v8, %s2738_s14  ;;  %s3031_s11 = smov (!%p390_p9, %s389_s11), 2  ;;  %s2426_s15 = sshll.u32 %s3033_s2, 4 }
  0x3b   : > { %2612 = vmatpush3.bf16.msra.mxu0 %v2609_v7  ;;  %s398_s0 = scalar_lea.vmem %s3017_s9, %s2426_s15 }
  0x3c   : > { %2515 = vmatprep.subr.mxu0 %v2739_v21 }
  0x3e   : > { %2492 = vmatmul.mubr.msk.f32.vlgmr.msra.gmra.mrb[0].mxu0 %vm414_vm0, %v400_v10  ;;  %p383_p8 = scmp.lt.s32.totalorder %s382_s26, 2 }
  0x3f   : > { %2517 = vmatprep.mubr.msk.f32.mxu0 %vm2740_vm1, %v2739_v21 }
  0x40   : > { %s3029_s26 = smov (!%p383_p8, %s382_s26), 2 }
  0x41   : > { %s2425_s27 = sshll.u32 %s3029_s26, 5 }
  0x42   : > { %s2948_s30 = scalar_lea.vmem %s3015_s7, %s2425_s27 }
  0xa8   : > { %v2649_v12 = vpop.permute.xlu0 %2648 }
  0xa9   : > { %v2651_v13 = vunpack.i.h.bf16 %v2649_v12  ;;  %v2650_v14 = vunpack.i.l.bf16 %v2649_v12 }
  0xab   : > { %v2613_v15 = vpack.c.bf16 %v2651_v13, %v2650_v14  ;;  %v513_v24 = vpop.permute.xlu1 %512 }
  0xac   : > { %v2654_v16 = vpop.permute.xlu0 %2653 }
  0xad   : > { %v2656_v17 = vunpack.i.h.bf16 %v2654_v16  ;;  %v2655_v18 = vunpack.i.l.bf16 %v2654_v16  ;;  %2614 = vmatprep.subr.bf16.mxu1 %v2613_v15 }
  0xae   : > { %2616 = vmatpush3.bf16.msra.mxu1 %v2613_v15 }
  0xaf   : > { %v2617_v19 = vpack.c.bf16 %v2656_v17, %v2655_v18 }
  0xb1   : > { %2618 = vmatprep.subr.bf16.mxu1 %v2617_v19 }
  0xb2   : > { %2620 = vmatpush3.bf16.msra.mxu1 %v2617_v19 }
  0xb3   : > { %2505 = vmatprep.subr.mxu1 %v2739_v21 }
  0xb5   : > { %2503 = vmatmul.mubr.msk.f32.vlgmr.msra.gmra.mrb[0].mxu1 %vm414_vm0, %v402_v20 }
  0xb6   : > { %2507 = vmatprep.mubr.msk.f32.mxu1 %vm2740_vm1, %v2739_v21 }
 0x111   : > { %v2493_v22 = vpop.f32.mrb[0].mxu0 }
 0x112   : > { %v487_v23 = vpop.f32.mrb[1].mxu0  ;;  %v493_v30 = vadd.f32 %v2493_v22, %v2382_v11 }
 0x113   : > { %v488_v25 = vadd.f32 %v2382_v11, %v487_v23 }
 0x114   : > { %v2865_v32 = vmul.f32 0.35355338, %v493_v30 }
 0x115   : > { %v2852_v29 = vmul.f32 0.35355338, %v488_v25 }
 0x188   : > { %v2504_v26 = vpop.f32.mrb[0].mxu1 }
 0x189   : > { %v587_v27 = vpop.f32.mrb[1].mxu1  ;;  %v2857_v31 = vadd.f32 %v2504_v26, %v513_v24 }
 0x18a   : > { %v2850_v28 = vadd.f32 %v587_v27, %v513_v24 }
 0x18c   : > { %2506 = vmatpush3.xpose.msk.msra.mxu1 %vm603_vm2, %v2850_v28 }
 0x18d   : > { %2510 = vmatprep.subr.mxu1 %v2739_v21 }
 0x18f   : > { %2508 = vmatmul.mubr.msk.f32.vlgmr.msra.gmra.mrb[2].mxu1 %vm603_vm2, %v2852_v29 }
 0x190   : > { %2511 = vmatpush3.xpose.msk.msra.mxu1 %vm603_vm2, %v2857_v31  ;;  %2512 = vmatprep.mubr.msk.f32.mxu1 %vm2740_vm1, %v2739_v21 }
 0x191   : > { %2520 = vmatprep.subr.mxu1 %v2739_v21 }
 0x193   : > { %2513 = vmatmul.mubr.msk.f32.vlgmr.msra.gmra.mrb[4].mxu1 %vm603_vm2, %v2865_v32 }
 0x194   : > { %2522 = vmatprep.mubr.msk.f32.mxu1 %vm2740_vm1, %v2739_v21 }
 0x262   : > { %v676_v33 = vpop.f32.mrb[2].mxu1 }
 0x263   : > { %v2509_v34 = vpop.f32.mrb[3].mxu1  ;;  %v756_v43 = vsel %vm603_vm2, %v676_v33, -inf }
 0x266   : > { %v752_v35 = vpop.f32.mrb[4].mxu1 }
 0x267   : > { %v2514_v36 = vpop.f32.mrb[5].mxu1  ;;  %v759_v37 = vsel %vm603_vm2, %v752_v35, -inf }
 0x268   : > { %760 = vmax.xlane.f32.xlu1 %v759_v37 }
 0x279   : > { %1010 = vrot.lane.b32.xlu1 %v2857_v31, %s2741_s20 }
 0x27d   : > { %1008 = vrot.lane.b32.xlu1 %v2865_v32, %s2741_s20 }
 0x2f5   : > { %v761_v38 = vpop.xlane.xlu1 %760 }
 0x2f6   : > { %v763_v39 = vsub.f32 %v752_v35, %v761_v38 }
 0x2f8   : > { %v766_v40 = vmul.f32 1.442695, %v763_v39 }
 0x2f9   : > { %v1011_v47 = vpop.permute.xlu1 %1010 }
 0x2fa   : > { %2657 = vpow2.f32 %v766_v40 }
 0x2fd   : > { %v1009_v49 = vpop.permute.xlu1 %1008 }
 0x304   : > { %v2658_v41 = vpop.eup %2657 }
 0x305   : > { %v771_v42 = vsel %vm603_vm2, %v2658_v41, 0.0 }
 0x306   : > { %772 = vadd.xlane.f32.xlu0 %v771_v42  ;;  %v596_v42 = vld [vmem:[%s2948_s30] sm:$0xff] }
 0x31c   : > { %854 = vrot.lane.b32.xlu0 %v2857_v31, %s2738_s14 }
 0x33b   : > { %757 = vmax.xlane.f32.xlu0 %v756_v43 }
 0x351   : > { %778 = vrot.lane.b32.xlu0 %v2850_v28, %s2738_s14  ;;  %s392_s14 = scalar_lea.vmem %s3016_s8, %s3031_s11 }
 0x355   : > { %930 = vrot.lane.b32.xlu0 %v2852_v29, %s2741_s20 }
 0x393   : > { %v773_v44 = vpop.xlane.xlu0 %772 }
 0x394   : > { %2659 = vrcp.f32 %v773_v44 }
 0x397   : > { %v855_v45 = vpop.permute.xlu0 %854 }
 0x398   : > { %2521 = vmatpush3.msra.mxu1 %v855_v45 }
 0x399   : > { %2530 = vmatprep.subr.mxu1 %v2739_v21 }
 0x39e   : > { %v2660_v46 = vpop.eup %2659 }
 0x39f   : > { %v777_v48 = vmul.f32 %v2660_v46, %v2658_v41  ;;  %v597_v41 = vld [vmem:[%s2948_s30 + $0x8] sm:$0xff] }
 0x3a1   : > { %2523 = vmatmul.mubr.msk.f32.vlgmr.msra.gmra.mrb[6].mxu1 %vm603_vm2, %v777_v48 }
 0x3a2   : > { %2531 = vmatpush3.xpose.msk.msra.mxu1 %vm603_vm2, %v1011_v47  ;;  %2532 = vmatprep.mubr.msk.f32.mxu1 %vm2740_vm1, %v2739_v21 }
 0x3a3   : > { %2540 = vmatprep.subr.mxu1 %v2739_v21 }
 0x3a5   : > { %2533 = vmatmul.mubr.msk.f32.vlgmr.msra.gmra.mrb[8].mxu1 %vm603_vm2, %v1009_v49 }
 0x3a6   : > { %2542 = vmatprep.mubr.msk.f32.mxu1 %vm2740_vm1, %v2739_v21 }
 0x3c8   : > { %v758_v50 = vpop.xlane.xlu0 %757 }
 0x3c9   : > { %v762_v51 = vsub.f32 %v676_v33, %v758_v50 }
 0x3cb   : > { %v764_v52 = vmul.f32 1.442695, %v762_v51 }
 0x3cc   : > { %v779_v53 = vpop.permute.xlu0 %778 }
 0x3cd   : > { %2661 = vpow2.f32 %v764_v52  ;;  %2516 = vmatpush3.msra.mxu0 %v779_v53 }
 0x3ce   : > { %2525 = vmatprep.subr.mxu0 %v2739_v21 }
 0x3d0   : > { %v931_v62 = vpop.permute.xlu0 %930 }
 0x3d7   : > { %v2662_v54 = vpop.eup %2661 }
 0x3d8   : > { %v768_v55 = vsel %vm603_vm2, %v2662_v54, 0.0 }
 0x3d9   : > { %769 = vadd.xlane.f32.xlu1 %v768_v55 }
 0x3ea   : > { %932 = vrot.lane.b32.xlu1 %v2850_v28, %s2741_s20 }
 0x466   : > { %v770_v56 = vpop.xlane.xlu1 %769 }
 0x467   : > { %2663 = vrcp.f32 %v770_v56 }
 0x46a   : > { %v933_v59 = vpop.permute.xlu1 %932 }
 0x471   : > { %v2664_v57 = vpop.eup %2663 }
 0x472   : > { %v776_v58 = vmul.f32 %v2664_v57, %v2662_v54  ;;  %v598_v57 = vld [vmem:[%s2948_s30 + $0x10] sm:$0xff] }
 0x474   : > { %2518 = vmatmul.mubr.msk.f32.vlgmr.msra.gmra.mrb[2].mxu0 %vm603_vm2, %v776_v58  ;;  %v2899_v60 = vpop.f32.mrb[6].mxu1 }
 0x475   : > { %2526 = vmatpush3.xpose.msk.msra.mxu0 %vm603_vm2, %v933_v59  ;;  %v2524_v61 = vpop.f32.mrb[7].mxu1  ;;  %2527 = vmatprep.mubr.msk.f32.mxu0 %vm2740_vm1, %v2739_v21 }
 0x476   : > { %2535 = vmatprep.subr.mxu0 %v2739_v21 }
 0x478   : > { %2528 = vmatmul.mubr.msk.f32.vlgmr.msra.gmra.mrb[4].mxu0 %vm603_vm2, %v931_v62  ;;  %v1082_v63 = vpop.f32.mrb[8].mxu1 }
 0x479   : > { %v2534_v0 = vpop.f32.mrb[9].mxu1  ;;  %v1089_v1 = vsel %vm603_vm2, %v1082_v63, -inf  ;;  %2537 = vmatprep.mubr.msk.f32.mxu0 %vm2740_vm1, %v2739_v21 }
 0x47a   : > { %1090 = vmax.xlane.f32.xlu1 %v1089_v1 }
 0x48b   : > { %1424 = vrot.lane.b32.xlu1 %v2850_v28, %s2742_s21 }
 0x48f   : > { %1422 = vrot.lane.b32.xlu1 %v2852_v29, %s2742_s21 }
 0x493   : > { %1500 = vrot.lane.b32.xlu1 %v2865_v32, %s2742_s21 }
 0x507   : > { %v1091_v2 = vpop.xlane.xlu1 %1090 }
 0x508   : > { %v1093_v3 = vsub.f32 %v1082_v63, %v1091_v2 }
 0x50a   : > { %v1096_v4 = vmul.f32 1.442695, %v1093_v3 }
 0x50b   : > { %v1425_v14 = vpop.permute.xlu1 %1424 }
 0x50c   : > { %2665 = vpow2.f32 %v1096_v4 }
 0x50f   : > { %v1423_v17 = vpop.permute.xlu1 %1422 }
 0x513   : > { %v1501_v19 = vpop.permute.xlu1 %1500 }
 0x516   : > { %v2666_v5 = vpop.eup %2665 }
 0x517   : > { %v1101_v6 = vsel %vm603_vm2, %v2666_v5, 0.0 }
 0x518   : > { %1102 = vadd.xlane.f32.xlu0 %v1101_v6 }
 0x52e   : > { %1184 = vrot.lane.b32.xlu0 %v2857_v31, %s2743_s23 }
 0x532   : > { %1502 = vrot.lane.b32.xlu0 %v2857_v31, %s2742_s21 }
 0x547   : > { %v2915_v7 = vpop.f32.mrb[2].mxu0 }
 0x548   : > { %v2519_v8 = vpop.f32.mrb[3].mxu0 }
 0x54b   : > { %v1004_v9 = vpop.f32.mrb[4].mxu0 }
 0x54c   : > { %v2529_v10 = vpop.f32.mrb[5].mxu0  ;;  %v1086_v11 = vsel %vm603_vm2, %v1004_v9, -inf }
 0x551   : > { %1087 = vmax.xlane.f32.xlu0 %v1086_v11 }
 0x567   : > { %1108 = vrot.lane.b32.xlu0 %v2850_v28, %s2743_s23 }
 0x56b   : > { %1676 = vrot.lane.b32.xlu0 %v2857_v31, %s2744_s24 }
 0x56f   : > { %1837 = vrot.lane.b32.xlu0 %v2850_v28, %s2745_s25 }
 0x573   : > { %1915 = vrot.lane.b32.xlu0 %v2857_v31, %s2745_s25 }
 0x577   : > { %1835 = vrot.lane.b32.xlu0 %v2852_v29, %s2745_s25 }
 0x57b   : > { %1913 = vrot.lane.b32.xlu0 %v2865_v32, %s2745_s25 }
 0x5a5   : > { %v1103_v12 = vpop.xlane.xlu0 %1102 }
 0x5a6   : > { %2667 = vrcp.f32 %v1103_v12 }
 0x5a9   : > { %v1185_v13 = vpop.permute.xlu0 %1184 }
 0x5aa   : > { %2541 = vmatpush3.msra.mxu1 %v1185_v13 }
 0x5ab   : > { %2555 = vmatprep.subr.mxu1 %v2739_v21 }
 0x5ad   : > { %v1503_v18 = vpop.permute.xlu0 %1502 }
 0x5b0   : > { %v2668_v15 = vpop.eup %2667 }
 0x5b1   : > { %v1107_v16 = vmul.f32 %v2668_v15, %v2666_v5 }
 0x5b3   : > { %2543 = vmatmul.mubr.msk.f32.vlgmr.msra.gmra.mrb[10].mxu1 %vm603_vm2, %v1107_v16 }
 0x5b4   : > { %2556 = vmatpush3.xpose.msk.msra.mxu1 %vm603_vm2, %v1425_v14  ;;  %2557 = vmatprep.mubr.msk.f32.mxu1 %vm2740_vm1, %v2739_v21 }
 0x5b5   : > { %2560 = vmatprep.subr.mxu1 %v2739_v21 }
 0x5b7   : > { %2558 = vmatmul.mubr.msk.f32.vlgmr.msra.gmra.mrb[12].mxu1 %vm603_vm2, %v1423_v17 }
 0x5b8   : > { %2561 = vmatpush3.xpose.msk.msra.mxu1 %vm603_vm2, %v1503_v18  ;;  %2562 = vmatprep.mubr.msk.f32.mxu1 %vm2740_vm1, %v2739_v21 }
 0x5b9   : > { %2570 = vmatprep.subr.mxu1 %v2739_v21 }
 0x5bb   : > { %2563 = vmatmul.mubr.msk.f32.vlgmr.msra.gmra.mrb[14].mxu1 %vm603_vm2, %v1501_v19 }
 0x5bc   : > { %2572 = vmatprep.mubr.msk.f32.mxu1 %vm2740_vm1, %v2739_v21 }
 0x5de   : > { %v1088_v20 = vpop.xlane.xlu0 %1087 }
 0x5df   : > { %v1092_v22 = vsub.f32 %v1004_v9, %v1088_v20 }
 0x5e1   : > { %v1094_v23 = vmul.f32 1.442695, %v1092_v22 }
 0x5e2   : > { %v1109_v24 = vpop.permute.xlu0 %1108 }
 0x5e3   : > { %2669 = vpow2.f32 %v1094_v23  ;;  %2536 = vmatpush3.msra.mxu0 %v1109_v24 }
 0x5e4   : > { %2545 = vmatprep.subr.mxu0 %v597_v41 }
 0x5e6   : > { %v1677_v25 = vpop.permute.xlu0 %1676 }
 0x5e7   : > { %2571 = vmatpush3.msra.mxu1 %v1677_v25 }
 0x5e8   : > { %2580 = vmatprep.subr.mxu1 %v2739_v21 }
 0x5ea   : > { %v1838_v59 = vpop.permute.xlu0 %1837 }
 0x5ed   : > { %v2670_v26 = vpop.eup %2669 }
 0x5ee   : > { %v1098_v27 = vsel %vm603_vm2, %v2670_v26, 0.0  ;;  %v1916_v0 = vpop.permute.xlu0 %1915 }
 0x5ef   : > { %1099 = vadd.xlane.f32.xlu1 %v1098_v27  ;;  %v599_v27 = vld [vmem:[%s2948_s30 + $0x18] sm:$0xff] }
 0x5f2   : > { %v1836_v1 = vpop.permute.xlu0 %1835 }
 0x5f6   : > { %v1914_v6 = vpop.permute.xlu0 %1913 }
 0x67c   : > { %v1100_v29 = vpop.xlane.xlu1 %1099 }
 0x67d   : > { %2671 = vrcp.f32 %v1100_v29 }
 0x686   : > { %v1256_v30 = vpop.f32.mrb[10].mxu1 }
 0x687   : > { %v2672_v32 = vpop.eup %2671  ;;  %v2544_v33 = vpop.f32.mrb[11].mxu1 }
 0x688   : > { %v1106_v34 = vmul.f32 %v2672_v32, %v2670_v26 }
 0x68a   : > { %2538 = vmatmul.mubr.msk.f32.vlgmr.msra.gmra.mrb[6].mxu0 %vm603_vm2, %v1106_v34  ;;  %v1496_v35 = vpop.f32.mrb[12].mxu1 }
 0x68b   : > { %v2559_v36 = vpop.f32.mrb[13].mxu1  ;;  %v1578_v37 = vsel %vm603_vm2, %v1496_v35, -inf  ;;  %2546 = vmatpush3.msra.mxu0 %v597_v41 }
 0x68c   : > { %1579 = vmax.xlane.f32.xlu1 %v1578_v37  ;;  %2550 = vmatprep.subr.mxu0 %v596_v42  ;;  %v2419_v36 = vld [vmem:[%s392_s14] ss:$0 sm:$0xff] }
 0x68e   : > { %v1574_v38 = vpop.f32.mrb[14].mxu1 }
 0x68f   : > { %v2564_v39 = vpop.f32.mrb[15].mxu1  ;;  %v1581_v40 = vsel %vm603_vm2, %v1574_v38, -inf }
 0x690   : > { %1582 = vmax.xlane.f32.xlu1 %v1581_v40 }
 0x719   : > { %v1580_v43 = vpop.xlane.xlu1 %1579 }
 0x71a   : > { %v1584_v44 = vsub.f32 %v1496_v35, %v1580_v43 }
 0x71c   : > { %v1586_v45 = vmul.f32 1.442695, %v1584_v44 }
 0x71d   : > { %v1583_v46 = vpop.xlane.xlu1 %1582 }
 0x71e   : > { %2673 = vpow2.f32 %v1586_v45  ;;  %v1585_v47 = vsub.f32 %v1574_v38, %v1583_v46 }
 0x720   : > { %v1588_v48 = vmul.f32 1.442695, %v1585_v47 }
 0x722   : > { %2675 = vpow2.f32 %v1588_v48 }
 0x728   : > { %v2674_v49 = vpop.eup %2673 }
 0x729   : > { %v1590_v50 = vsel %vm603_vm2, %v2674_v49, 0.0 }
 0x72a   : > { %1591 = vadd.xlane.f32.xlu1 %v1590_v50 }
 0x72c   : > { %v2676_v51 = vpop.eup %2675 }
 0x72d   : > { %v1593_v52 = vsel %vm603_vm2, %v2676_v51, 0.0 }
 0x72e   : > { %1594 = vadd.xlane.f32.xlu1 %v1593_v52 }
 0x73f   : > { %1600 = vrot.lane.b32.xlu1 %v2850_v28, %s2744_s24 }
 0x75d   : > { %v1180_v53 = vpop.f32.mrb[6].mxu0 }
 0x75e   : > { %v2539_v54 = vpop.f32.mrb[7].mxu0  ;;  %2547 = vmatprep.mubr.msk.f32.mxu0 %vm603_vm2, %v1180_v53 }
 0x75f   : > { %2548 = vmatmul.mubr.msk.f32.vlgmr.msra.gmra.mrb[8].mxu0 %vm603_vm2, %v1256_v30 }
 0x760   : > { %2552 = vmatprep.mubr.msk.f32.mxu0 %vm603_vm2, %v2915_v7  ;;  %2551 = vmatpush3.msra.mxu0 %v596_v42 }
 0x761   : > { %2565 = vmatprep.subr.mxu0 %v2739_v21 }
 0x767   : > { %2553 = vmatmul.mubr.msk.f32.vlgmr.msra.gmra.mrb[8].mxu0 %vm603_vm2, %v2899_v60 }
 0x768   : > { %2567 = vmatprep.mubr.msk.f32.mxu0 %vm2740_vm1, %v2739_v21 }
 0x7b7   : > { %v1592_v55 = vpop.xlane.xlu1 %1591 }
 0x7b8   : > { %2677 = vrcp.f32 %v1592_v55 }
 0x7bb   : > { %v1595_v56 = vpop.xlane.xlu1 %1594 }
 0x7bc   : > { %2679 = vrcp.f32 %v1595_v56 }
 0x7bf   : > { %v1601_v58 = vpop.permute.xlu1 %1600 }
 0x7c0   : > { %2566 = vmatpush3.msra.mxu0 %v1601_v58 }
 0x7c1   : > { %2575 = vmatprep.subr.mxu0 %v598_v57 }
 0x7c2   : > { %v2678_v61 = vpop.eup %2677 }
 0x7c3   : > { %v1598_v62 = vmul.f32 %v2678_v61, %v2674_v49 }
 0x7c5   : > { %2568 = vmatmul.mubr.msk.f32.vlgmr.msra.gmra.mrb[10].mxu0 %vm603_vm2, %v1598_v62 }
 0x7c6   : > { %v2680_v63 = vpop.eup %2679  ;;  %2576 = vmatpush3.msra.mxu0 %v598_v57 }
 0x7c7   : > { %v1599_v60 = vmul.f32 %v2680_v63, %v2676_v51  ;;  %2585 = vmatprep.subr.mxu0 %v2739_v21 }
 0x7c9   : > { %2573 = vmatmul.mubr.msk.f32.vlgmr.msra.gmra.mrb[16].mxu1 %vm603_vm2, %v1599_v60 }
 0x7ca   : > { %2581 = vmatpush3.xpose.msk.msra.mxu1 %vm603_vm2, %v1838_v59  ;;  %2582 = vmatprep.mubr.msk.f32.mxu1 %vm2740_vm1, %v2739_v21 }
 0x7cb   : > { %2590 = vmatprep.subr.mxu1 %v2739_v21 }
 0x7cd   : > { %2583 = vmatmul.mubr.msk.f32.vlgmr.msra.gmra.mrb[18].mxu1 %vm603_vm2, %v1836_v1 }
 0x7ce   : > { %2592 = vmatprep.mubr.msk.f32.mxu1 %vm2740_vm1, %v2739_v21 }
 0x898   : > { %v1672_v2 = vpop.f32.mrb[10].mxu0 }
 0x899   : > { %v2569_v3 = vpop.f32.mrb[11].mxu0  ;;  %2577 = vmatprep.mubr.msk.f32.mxu0 %vm603_vm2, %v1672_v2 }
 0x89c   : > { %v1748_v4 = vpop.f32.mrb[16].mxu1 }
 0x89d   : > { %v2574_v5 = vpop.f32.mrb[17].mxu1  ;;  %2578 = vmatmul.mubr.msk.f32.vlgmr.msra.gmra.mrb[8].mxu0 %vm603_vm2, %v1748_v4 }
 0x89e   : > { %2586 = vmatpush3.xpose.msk.msra.mxu0 %vm603_vm2, %v1916_v0  ;;  %2587 = vmatprep.mubr.msk.f32.mxu0 %vm2740_vm1, %v2739_v21 }
 0x89f   : > { %2595 = vmatprep.subr.mxu0 %v2739_v21 }
 0x8a0   : > { %v1909_v7 = vpop.f32.mrb[18].mxu1 }
 0x8a1   : > { %v2584_v8 = vpop.f32.mrb[19].mxu1  ;;  %2588 = vmatmul.mubr.msk.f32.vlgmr.msra.gmra.mrb[12].mxu0 %vm603_vm2, %v1914_v6  ;;  %v1991_v9 = vsel %vm603_vm2, %v1909_v7, -inf }
 0x8a2   : > { %1992 = vmax.xlane.f32.xlu1 %v1991_v9  ;;  %2597 = vmatprep.mubr.msk.f32.mxu0 %vm2740_vm1, %v2739_v21 }
 0x92f   : > { %v1993_v10 = vpop.xlane.xlu1 %1992 }
 0x930   : > { %v1997_v11 = vsub.f32 %v1909_v7, %v1993_v10 }
 0x932   : > { %v1999_v12 = vmul.f32 1.442695, %v1997_v11 }
 0x934   : > { %2681 = vpow2.f32 %v1999_v12 }
 0x93e   : > { %v2682_v16 = vpop.eup %2681 }
 0x93f   : > { %v2003_v17 = vsel %vm603_vm2, %v2682_v16, 0.0 }
 0x974   : > { %v1987_v13 = vpop.f32.mrb[12].mxu0 }
 0x975   : > { %v2589_v14 = vpop.f32.mrb[13].mxu0  ;;  %v1994_v15 = vsel %vm603_vm2, %v1987_v13, -inf }
 0x976   : > { %1995 = vmax.xlane.f32.xlu0 %v1994_v15 }
 0x97a   : > { %2004 = vadd.xlane.f32.xlu0 %v2003_v17 }
 0x990   : > { %2013 = vrot.lane.b32.xlu0 %v2850_v28, %s2746_s10 }
 0xa03   : > { %v1996_v18 = vpop.xlane.xlu0 %1995 }
 0xa04   : > { %v1998_v19 = vsub.f32 %v1987_v13, %v1996_v18 }
 0xa06   : > { %v2001_v21 = vmul.f32 1.442695, %v1998_v19 }
 0xa07   : > { %v2005_v20 = vpop.xlane.xlu0 %2004 }
 0xa08   : > { %2683 = vpow2.f32 %v2001_v21 }
 0xa09   : > { %2685 = vrcp.f32 %v2005_v20 }
 0xa0b   : > { %v2014_v22 = vpop.permute.xlu0 %2013 }
 0xa0c   : > { %2591 = vmatpush3.msra.mxu1 %v2014_v22 }
 0xa12   : > { %v2684_v23 = vpop.eup %2683 }
 0xa13   : > { %v2686_v24 = vpop.eup %2685  ;;  %v2006_v25 = vsel %vm603_vm2, %v2684_v23, 0.0 }
 0xa14   : > { %v2011_v26 = vmul.f32 %v2686_v24, %v2682_v16  ;;  %2007 = vadd.xlane.f32.xlu1 %v2006_v25 }
 0xa16   : > { %2593 = vmatmul.mubr.msk.f32.vlgmr.msra.gmra.mrb[20].mxu1 %vm603_vm2, %v2011_v26 }
 0xa25   : > { %2089 = vrot.lane.b32.xlu1 %v2857_v31, %s2746_s10 }
 0xaa1   : > { %v2008_v28 = vpop.xlane.xlu1 %2007 }
 0xaa2   : > { %2687 = vrcp.f32 %v2008_v28 }
 0xaa5   : > { %v2090_v29 = vpop.permute.xlu1 %2089 }
 0xaa6   : > { %2596 = vmatpush3.msra.mxu0 %v2090_v29 }
 0xaa7   : > { %2600 = vmatprep.subr.mxu0 %v599_v27 }
 0xaac   : > { %v2688_v30 = vpop.eup %2687 }
 0xaad   : > { %v2012_v32 = vmul.f32 %v2688_v30, %v2684_v23 }
 0xaaf   : > { %2598 = vmatmul.mubr.msk.f32.vlgmr.msra.gmra.mrb[14].mxu0 %vm603_vm2, %v2012_v32 }
 0xab0   : > { %2601 = vmatpush3.msra.mxu0 %v599_v27 }
 0xae9   : > { %v2085_v33 = vpop.f32.mrb[20].mxu1 }
 0xaea   : > { %v2594_v34 = vpop.f32.mrb[21].mxu1  ;;  %2602 = vmatprep.mubr.msk.f32.mxu0 %vm603_vm2, %v2085_v33 }
 0xb82   : > { %v2161_v35 = vpop.f32.mrb[14].mxu0 }
 0xb83   : > { %v2599_v31 = vpop.f32.mrb[15].mxu0  ;;  %2603 = vmatmul.mubr.msk.f32.vlgmr.msra.gmra.mrb[8].mxu0 %vm603_vm2, %v2161_v35 }
 0xc56   : > { %v2604_v37 = vpop.f32.mrb[8].mxu0 }
 0xc57   : > { %v2255_v38 = vadd.f32 %v2604_v37, %v2419_v36  ;;  %v2237_v39 = vpop.f32.mrb[9].mxu0 }
 0xc58   : > { %v2254_v40 = vadd.f32 %v2419_v36, %v2237_v39 }
 0xc59   : > { %2257 = vst.msk [vmem:[%s398_s0 + $0x8] sm:$0xff] %vm414_vm0, %v2255_v38 }
 0xc5a   : > { %2256 = vst.msk [vmem:[%s398_s0] sm:$0xff] %vm414_vm0, %v2254_v40 }
 0xc5b PF: > { %s33_s22 = sadd.s32 1, %s2733_s22  }
 0xc5c   : > { %p30_p11 = scmp.ge.s32.totalorder %s33_s22, 8  }
 0xc5e   :  { %32 = sbr.rel (!%p30_p11) target bundleno = 36 (0x24), region = 89 }

// kernel: multimodal_transformer_forward.6
= control target key start
LH: loop header
LB: loop body
LE: loop exit
PB: predicated region body
PF: predicated region fallthrough
CT: control target
= control target key end

     0   :  { %s3321_s25 = smov 0   ;;  %s3574_s0 = inlined_call_operand.vmem [shape: f32[3,2,8,32], index: 0, kind: input, shape index: {}]   ;;  %s3575_s1 = inlined_call_operand.vmem [shape: f32[3,32,96], index: 1, kind: input, shape index: {}]   ;;  %s3576_s2 = inlined_call_operand.vmem [shape: f32[3,1,96], index: 2, kind: input, shape index: {}]   ;;  %s3577_s3 = inlined_call_operand.vmem [shape: f32[3,32,32], index: 3, kind: input, shape index: {}]   ;;  %s3578_s4 = inlined_call_operand.vmem [shape: f32[3,1,32], index: 4, kind: input, shape index: {}]   ;;  %s3579_s5 = inlined_call_operand.vmem [shape: f32[3,1,32], index: 5, kind: input, shape index: {}]   ;;  %s3580_s6 = inlined_call_operand.vmem [shape: f32[3,1,32], index: 6, kind: input, shape index: {}]   ;;  %s3581_s7 = inlined_call_operand.vmem [shape: f32[3,32,64], index: 7, kind: input, shape index: {}]   ;;  %s3582_s8 = inlined_call_operand.vmem [shape: f32[3,1,64], index: 8, kind: input, shape index: {}]   ;;  %s3583_s9 = inlined_call_operand.vmem [shape: f32[3,64,32], index: 9, kind: input, shape index: {}]   ;;  %s3584_s10 = inlined_call_operand.vmem [shape: f32[3,1,32], index: 10, kind: input, shape index: {}]   ;;  %s3585_s11 = inlined_call_operand.vmem [shape: f32[3,1,32], index: 11, kind: input, shape index: {}]   ;;  %s3586_s12 = inlined_call_operand.vmem [shape: f32[3,1,32], index: 12, kind: input, shape index: {}]   ;;  %s3587_s13 = inlined_call_operand.vmem [shape: f32[3,2,8,32], index: 13, kind: output, shape index: {}]  }
   0x1 LB: > { %s2853_s26 = sadd.s32 4294967295, %s3236_s25   ;;  %p2857_p0 = scmp.ge.s32.totalorder %s3236_s25, 1  ;;  %s3236_s25 = sphi %s3321_s25, %s23_s25  }
   0x2   : > { %p491_p1 = scmp.lt.s32.totalorder %s3236_s25, 4 }
   0x4   : > { %p492_p2 = pnand %p2857_p0, %p491_p1 }
   0x5   : > { %p579_p3 = scmp.lt.s32.totalorder (!%p492_p2), %s2853_s26, 2  ;;  %vm646_vm0 = vcmask (!%p492_p2), 261120   ;;  %v3238_v8 = vmov (!%p492_p2), 0.0   ;;  %vm3239_vm1 = vmmov (!%p492_p2), 0   ;;  %s3240_s21 = smov (!%p492_p2), 96   ;;  %vm738_vm2 = vcmask (!%p492_p2), 64512  }
   0x6   : > { %495 = sbr.rel (%p492_p2) target bundleno = 4188 (0x105c), region = 72  ;;  %3011 = vmatprep.subr.mxu0 (!%p492_p2), %v3238_v8  ;;  %3013 = vmatprep.mubr.msk.f32.mxu0 (!%p492_p2), %vm3239_vm1, %v3238_v8  ;;  %s3241_s22 = smov (!%p492_p2), 64   ;;  %vm2548_vm3 = vcmask (!%p492_p2), 523264  }
   0x7   : > { %s3242_s23 = smov (!%p492_p2), 120   ;;  %s3243_s24 = smov (!%p492_p2), 88  }
   0x8   : > { %s3244_s29 = smov (!%p492_p2), 80   ;;  %s3245_s30 = smov (!%p492_p2), 56  }
   0x9   : > { %s3247_s15 = smov (!%p492_p2), 48   ;;  %s3248_s16 = smov (!%p492_p2), 72  }
   0xd   : > { %s3589_s26 = smov (!%p579_p3, %s2853_s26), 2 }
   0xe   : > { %s3332_s27 = sshll.u32 %s3589_s26, 5  ;;  %s2918_s28 = sshll.u32 %s3589_s26, 4 }
   0xf   : > { %s588_s14 = scalar_lea.vmem %s3575_s1, %s3332_s27  ;;  %s583_s17 = scalar_lea.vmem %s3574_s0, %s2918_s28 }
  0x10   : > { %v635_v0 = vld [vmem:[%s588_s14] sm:$0xff]  ;;  %v636_v1 = vld [vmem:[%s588_s14 + $0x8] sm:$0xff]  ;;  %v637_v2 = vld [vmem:[%s588_s14 + $0x10] sm:$0xff]  ;;  %s591_s20 = scalar_lea.vmem %s3576_s2, %s3589_s26 }
  0x11   : > { %v3131_v3 = vpack.c.bf16 %v636_v1, %v635_v0  ;;  %v638_v4 = vld [vmem:[%s588_s14 + $0x18] sm:$0xff]  ;;  %v3344_v5 = vld [vmem:[%s583_s17] sm:$0xff]  ;;  %v3348_v7 = vld [vmem:[%s583_s17 + $0x8] sm:$0xff]  ;;  %s3246_s14 = smov 112   ;;  %s3249_s17 = smov 104  }
  0x12   : > { %v3135_v6 = vpack.c.bf16 %v638_v4, %v637_v2  ;;  %2998 = vmatprep.mubr.msk.f32.mxu1 %vm646_vm0, %v3344_v5  ;;  %v2870_v9 = vld [vmem:[%s591_s20] ss:$0 sm:$0xff]  ;;  %s3455_s20 = scalar_lea.vmem %s3577_s3, %s3332_s27 }
  0x13   : > { %3132 = vmatprep.subr.bf16.mxu1 %v3131_v3 }
  0x14   : > { %3134 = vmatpush3.bf16.msra.mxu1 %v3131_v3 }
  0x15   : > { %3136 = vmatprep.subr.bf16.mxu1 %v3135_v6 }
  0x18   : > { %3138 = vmatpush3.bf16.msra.mxu1 %v3135_v6 }
  0x19   : > { %3001 = vmatprep.subr.mxu1 %v3238_v8 }
  0x1b   : > { %2999 = vmatmul.mubr.msk.f32.vlgmr.msra.gmra.mrb[0].mxu1 %vm646_vm0, %v3348_v7 }
  0x1c   : > { %3003 = vmatprep.mubr.msk.f32.mxu1 %vm3239_vm1, %v3238_v8 }
  0xee   : > { %v3000_v10 = vpop.f32.mrb[0].mxu1 }
  0xef   : > { %v719_v11 = vpop.f32.mrb[1].mxu1  ;;  %v3365_v13 = vadd.f32 %v3000_v10, %v2870_v9 }
  0xf0   : > { %v3362_v12 = vadd.f32 %v2870_v9, %v719_v11 }
  0xf1   : > { %v3370_v14 = vmul.f32 0.35355338, %v3365_v13 }
  0xf2   : > { %736 = vrot.lane.b32.xlu0 %v3362_v12, %s3240_s21  ;;  %v3376_v16 = vmul.f32 0.35355338, %v3362_v12 }
  0xf6   : > { %815 = vrot.lane.b32.xlu0 %v3365_v13, %s3240_s21  ;;  %s3250_s21 = smov 40  }
  0xfa   : > { %990 = vrot.lane.b32.xlu0 %v3365_v13, %s3241_s22 }
  0xfe   : > { %1144 = vrot.lane.b32.xlu0 %v3370_v14, %s3242_s23 }
 0x164   : > { %v737_v15 = vpop.permute.xlu0 %736 }
 0x165   : > { %3002 = vmatpush3.xpose.msk.msra.mxu1 %vm738_vm2, %v737_v15 }
 0x166   : > { %3006 = vmatprep.subr.mxu1 %v3238_v8 }
 0x168   : > { %v816_v17 = vpop.permute.xlu0 %815  ;;  %3004 = vmatmul.mubr.msk.f32.vlgmr.msra.gmra.mrb[2].mxu1 %vm738_vm2, %v3376_v16 }
 0x169   : > { %3007 = vmatpush3.xpose.msk.msra.mxu1 %vm738_vm2, %v816_v17  ;;  %3008 = vmatprep.mubr.msk.f32.mxu1 %vm3239_vm1, %v3238_v8 }
 0x16a   : > { %3016 = vmatprep.subr.mxu1 %v3238_v8 }
 0x16c   : > { %v991_v18 = vpop.permute.xlu0 %990  ;;  %3009 = vmatmul.mubr.msk.f32.vlgmr.msra.gmra.mrb[4].mxu1 %vm738_vm2, %v3370_v14 }
 0x16d   : > { %3017 = vmatpush3.msra.mxu1 %v991_v18  ;;  %3018 = vmatprep.mubr.msk.f32.mxu1 %vm3239_vm1, %v3238_v8 }
 0x16e   : > { %3026 = vmatprep.subr.mxu1 %v3238_v8 }
 0x170   : > { %v1145_v25 = vpop.permute.xlu0 %1144 }
 0x23b   : > { %v810_v19 = vpop.f32.mrb[2].mxu1 }
 0x23c   : > { %v3005_v20 = vpop.f32.mrb[3].mxu1  ;;  %v892_v21 = vsel %vm738_vm2, %v810_v19, -inf }
 0x23d   : > { %893 = vmax.xlane.f32.xlu0 %v892_v21  ;;  %v728_v20 = vld [vmem:[%s3455_s20] sm:$0xff] }
 0x23f   : > { %v888_v22 = vpop.f32.mrb[4].mxu1 }
 0x240   : > { %v3010_v23 = vpop.f32.mrb[5].mxu1  ;;  %v895_v24 = vsel %vm738_vm2, %v888_v22, -inf }
 0x241   : > { %896 = vmax.xlane.f32.xlu1 %v895_v24 }
 0x253   : > { %914 = vrot.lane.b32.xlu0 %v3362_v12, %s3241_s22 }
 0x257   : > { %1066 = vrot.lane.b32.xlu0 %v3376_v16, %s3242_s23  ;;  %s605_s23 = scalar_lea.vmem %s3580_s6, %s3589_s26 }
 0x2ca   : > { %v894_v26 = vpop.xlane.xlu0 %893 }
 0x2cb   : > { %v898_v33 = vsub.f32 %v810_v19, %v894_v26  ;;  %v729_v19 = vld [vmem:[%s3455_s20 + $0x8] sm:$0xff] }
 0x2cd   : > { %v900_v34 = vmul.f32 1.442695, %v898_v33 }
 0x2ce   : > { %v915_v27 = vpop.permute.xlu0 %914  ;;  %v897_v28 = vpop.xlane.xlu1 %896 }
 0x2cf   : > { %v899_v29 = vsub.f32 %v888_v22, %v897_v28  ;;  %3012 = vmatpush3.msra.mxu0 %v915_v27 }
 0x2d0   : > { %3021 = vmatprep.subr.mxu0 %v3238_v8 }
 0x2d1   : > { %v902_v30 = vmul.f32 1.442695, %v899_v29 }
 0x2d2   : > { %v1067_v45 = vpop.permute.xlu0 %1066 }
 0x2d3   : > { %3190 = vpow2.f32 %v902_v30 }
 0x2d4   : > { %3192 = vpow2.f32 %v900_v34 }
 0x2dd   : > { %v3191_v31 = vpop.eup %3190 }
 0x2de   : > { %v907_v32 = vsel %vm738_vm2, %v3191_v31, 0.0  ;;  %v3193_v35 = vpop.eup %3192 }
 0x2df   : > { %908 = vadd.xlane.f32.xlu1 %v907_v32  ;;  %v904_v36 = vsel %vm738_vm2, %v3193_v35, 0.0 }
 0x2f0   : > { %1146 = vrot.lane.b32.xlu1 %v3365_v13, %s3243_s24 }
 0x314   : > { %905 = vadd.xlane.f32.xlu1 %v904_v36 }
 0x325   : > { %1068 = vrot.lane.b32.xlu1 %v3362_v12, %s3243_s24  ;;  %s599_s24 = scalar_lea.vmem %s3578_s4, %s3589_s26 }
 0x329   : > { %1560 = vrot.lane.b32.xlu1 %v3362_v12, %s3244_s29 }
 0x36c   : > { %v909_v37 = vpop.xlane.xlu1 %908 }
 0x36d   : > { %3194 = vrcp.f32 %v909_v37 }
 0x370   : > { %v1147_v40 = vpop.permute.xlu1 %1146 }
 0x377   : > { %v3195_v38 = vpop.eup %3194 }
 0x378   : > { %v913_v39 = vmul.f32 %v3195_v38, %v3191_v31 }
 0x37a   : > { %3019 = vmatmul.mubr.msk.f32.vlgmr.msra.gmra.mrb[6].mxu1 %vm738_vm2, %v913_v39 }
 0x37b   : > { %3027 = vmatpush3.xpose.msk.msra.mxu1 %vm738_vm2, %v1147_v40  ;;  %3028 = vmatprep.mubr.msk.f32.mxu1 %vm3239_vm1, %v3238_v8 }
 0x37c   : > { %3036 = vmatprep.subr.mxu1 %v3238_v8 }
 0x37e   : > { %3029 = vmatmul.mubr.msk.f32.vlgmr.msra.gmra.mrb[8].mxu1 %vm738_vm2, %v1145_v25 }
 0x37f   : > { %3038 = vmatprep.mubr.msk.f32.mxu1 %vm3239_vm1, %v3238_v8 }
 0x3a1   : > { %v906_v41 = vpop.xlane.xlu1 %905 }
 0x3a2   : > { %3196 = vrcp.f32 %v906_v41 }
 0x3a5   : > { %v1069_v44 = vpop.permute.xlu1 %1068 }
 0x3a9   : > { %v1561_v9 = vpop.permute.xlu1 %1560 }
 0x3ac   : > { %v3197_v42 = vpop.eup %3196 }
 0x3ad   : > { %v912_v43 = vmul.f32 %v3197_v42, %v3193_v35  ;;  %v730_v42 = vld [vmem:[%s3455_s20 + $0x10] sm:$0xff] }
 0x3af   : > { %3014 = vmatmul.mubr.msk.f32.vlgmr.msra.gmra.mrb[0].mxu0 %vm738_vm2, %v912_v43 }
 0x3b0   : > { %3022 = vmatpush3.xpose.msk.msra.mxu0 %vm738_vm2, %v1069_v44  ;;  %3023 = vmatprep.mubr.msk.f32.mxu0 %vm3239_vm1, %v3238_v8 }
 0x3b1   : > { %3031 = vmatprep.subr.mxu0 %v3238_v8 }
 0x3b3   : > { %3024 = vmatmul.mubr.msk.f32.vlgmr.msra.gmra.mrb[2].mxu0 %vm738_vm2, %v1067_v45 }
 0x3b4   : > { %3033 = vmatprep.mubr.msk.f32.mxu0 %vm3239_vm1, %v3238_v8 }
 0x44d   : > { %v3416_v46 = vpop.f32.mrb[6].mxu1 }
 0x44e   : > { %v3020_v47 = vpop.f32.mrb[7].mxu1 }
 0x451   : > { %v1218_v48 = vpop.f32.mrb[8].mxu1 }
 0x452   : > { %v3030_v49 = vpop.f32.mrb[9].mxu1  ;;  %v1225_v50 = vsel %vm738_vm2, %v1218_v48, -inf }
 0x453   : > { %1226 = vmax.xlane.f32.xlu0 %v1225_v50 }
 0x469   : > { %1320 = vrot.lane.b32.xlu0 %v3365_v13, %s3245_s30 }
 0x46d   : > { %1558 = vrot.lane.b32.xlu0 %v3376_v16, %s3246_s14 }
 0x471   : > { %1638 = vrot.lane.b32.xlu0 %v3365_v13, %s3244_s29 }
 0x482   : > { %v3423_v51 = vpop.f32.mrb[0].mxu0 }
 0x483   : > { %v3015_v52 = vpop.f32.mrb[1].mxu0 }
 0x486   : > { %v1140_v53 = vpop.f32.mrb[2].mxu0 }
 0x487   : > { %v3025_v54 = vpop.f32.mrb[3].mxu0  ;;  %v1222_v55 = vsel %vm738_vm2, %v1140_v53, -inf }
 0x490   : > { %1223 = vmax.xlane.f32.xlu0 %v1222_v55 }
 0x4a6   : > { %1244 = vrot.lane.b32.xlu0 %v3362_v12, %s3245_s30  ;;  %s613_s30 = scalar_lea.vmem %s3582_s8, %s3589_s26 }
 0x4aa   : > { %1736 = vrot.lane.b32.xlu0 %v3362_v12, %s3247_s15 }
 0x4ae   : > { %1973 = vrot.lane.b32.xlu0 %v3362_v12, %s3248_s16 }
 0x4b2   : > { %2051 = vrot.lane.b32.xlu0 %v3365_v13, %s3248_s16  ;;  %s621_s16 = scalar_lea.vmem %s3584_s10, %s3589_s26 }
 0x4b6   : > { %1971 = vrot.lane.b32.xlu0 %v3376_v16, %s3249_s17 }
 0x4ba   : > { %2049 = vrot.lane.b32.xlu0 %v3370_v14, %s3249_s17 }
 0x4e0   : > { %v1227_v56 = vpop.xlane.xlu0 %1226 }
 0x4e1   : > { %v1229_v57 = vsub.f32 %v1218_v48, %v1227_v56 }
 0x4e3   : > { %v1232_v58 = vmul.f32 1.442695, %v1229_v57 }
 0x4e4   : > { %v1321_v59 = vpop.permute.xlu0 %1320 }
 0x4e5   : > { %3198 = vpow2.f32 %v1232_v58  ;;  %3037 = vmatpush3.msra.mxu1 %v1321_v59 }
 0x4e6   : > { %3051 = vmatprep.subr.mxu1 %v3238_v8 }
 0x4e8   : > { %v1559_v62 = vpop.permute.xlu0 %1558 }
 0x4ec   : > { %v1639_v63 = vpop.permute.xlu0 %1638 }
 0x4ef   : > { %v3199_v60 = vpop.eup %3198 }
 0x4f0   : > { %v1237_v61 = vsel %vm738_vm2, %v3199_v60, 0.0 }
 0x4f1   : > { %1238 = vadd.xlane.f32.xlu1 %v1237_v61 }
 0x502   : > { %1636 = vrot.lane.b32.xlu1 %v3370_v14, %s3246_s14  ;;  %s610_s14 = scalar_lea.vmem %s3581_s7, %s3332_s27  ;;  %s624_s27 = scalar_lea.vmem %s3585_s11, %s3589_s26 }
 0x51d   : > { %v1224_v0 = vpop.xlane.xlu0 %1223 }
 0x51e   : > { %v1228_v1 = vsub.f32 %v1140_v53, %v1224_v0 }
 0x520   : > { %v1230_v2 = vmul.f32 1.442695, %v1228_v1 }
 0x521   : > { %v1245_v3 = vpop.permute.xlu0 %1244 }
 0x522   : > { %3200 = vpow2.f32 %v1230_v2  ;;  %3032 = vmatpush3.msra.mxu0 %v1245_v3 }
 0x523   : > { %3041 = vmatprep.subr.mxu0 %v729_v19 }
 0x525   : > { %v1737_v31 = vpop.permute.xlu0 %1736 }
 0x52c   : > { %v3201_v4 = vpop.eup %3200 }
 0x52d   : > { %v1234_v6 = vsel %vm738_vm2, %v3201_v4, 0.0 }
 0x52e   : > { %1235 = vadd.xlane.f32.xlu1 %v1234_v6 }
 0x57e   : > { %v1239_v10 = vpop.xlane.xlu1 %1238 }
 0x57f   : > { %3202 = vrcp.f32 %v1239_v10 }
 0x582   : > { %v1637_v14 = vpop.permute.xlu1 %1636 }
 0x589   : > { %v3203_v11 = vpop.eup %3202 }
 0x58a   : > { %v1243_v15 = vmul.f32 %v3203_v11, %v3199_v60 }
 0x58c   : > { %3039 = vmatmul.mubr.msk.f32.vlgmr.msra.gmra.mrb[10].mxu1 %vm738_vm2, %v1243_v15 }
 0x58d   : > { %3052 = vmatpush3.xpose.msk.msra.mxu1 %vm738_vm2, %v1561_v9  ;;  %3053 = vmatprep.mubr.msk.f32.mxu1 %vm3239_vm1, %v3238_v8 }
 0x58e   : > { %3056 = vmatprep.subr.mxu1 %v3238_v8 }
 0x590   : > { %3054 = vmatmul.mubr.msk.f32.vlgmr.msra.gmra.mrb[12].mxu1 %vm738_vm2, %v1559_v62 }
 0x591   : > { %3057 = vmatpush3.xpose.msk.msra.mxu1 %vm738_vm2, %v1639_v63  ;;  %3058 = vmatprep.mubr.msk.f32.mxu1 %vm3239_vm1, %v3238_v8 }
 0x592   : > { %3066 = vmatprep.subr.mxu1 %v3238_v8 }
 0x594   : > { %3059 = vmatmul.mubr.msk.f32.vlgmr.msra.gmra.mrb[14].mxu1 %vm738_vm2, %v1637_v14 }
 0x595   : > { %3068 = vmatprep.mubr.msk.f32.mxu1 %vm3239_vm1, %v3238_v8 }
 0x5bb   : > { %v1236_v16 = vpop.xlane.xlu1 %1235 }
 0x5bc   : > { %3204 = vrcp.f32 %v1236_v16 }
 0x5c6   : > { %v3205_v17 = vpop.eup %3204 }
 0x5c7   : > { %v1242_v18 = vmul.f32 %v3205_v17, %v3201_v4 }
 0x5c9   : > { %3034 = vmatmul.mubr.msk.f32.vlgmr.msra.gmra.mrb[4].mxu0 %vm738_vm2, %v1242_v18  ;;  %v731_v18 = vld [vmem:[%s3455_s20 + $0x18] sm:$0xff]  ;;  %s602_s20 = scalar_lea.vmem %s3579_s5, %s3589_s26 }
 0x5ca   : > { %3042 = vmatpush3.msra.mxu0 %v729_v19 }
 0x5cb   : > { %3046 = vmatprep.subr.mxu0 %v728_v20 }
 0x65f   : > { %v1392_v21 = vpop.f32.mrb[10].mxu1 }
 0x660   : > { %v3040_v22 = vpop.f32.mrb[11].mxu1 }
 0x663   : > { %v1632_v23 = vpop.f32.mrb[12].mxu1 }
 0x664   : > { %v3055_v24 = vpop.f32.mrb[13].mxu1  ;;  %v1714_v25 = vsel %vm738_vm2, %v1632_v23, -inf }
 0x665   : > { %1715 = vmax.xlane.f32.xlu1 %v1714_v25 }
 0x667   : > { %v1710_v26 = vpop.f32.mrb[14].mxu1 }
 0x668   : > { %v3060_v27 = vpop.f32.mrb[15].mxu1  ;;  %v1717_v28 = vsel %vm738_vm2, %v1710_v26, -inf }
 0x669   : > { %1718 = vmax.xlane.f32.xlu1 %v1717_v28 }
 0x69c   : > { %v1316_v29 = vpop.f32.mrb[4].mxu0 }
 0x69d   : > { %v3035_v30 = vpop.f32.mrb[5].mxu0  ;;  %3043 = vmatprep.mubr.msk.f32.mxu0 %vm738_vm2, %v1316_v29 }
 0x69e   : > { %3044 = vmatmul.mubr.msk.f32.vlgmr.msra.gmra.mrb[6].mxu0 %vm738_vm2, %v1392_v21 }
 0x69f   : > { %3048 = vmatprep.mubr.msk.f32.mxu0 %vm738_vm2, %v3423_v51  ;;  %3047 = vmatpush3.msra.mxu0 %v728_v20 }
 0x6a0   : > { %3061 = vmatprep.subr.mxu0 %v3238_v8 }
 0x6a6   : > { %3049 = vmatmul.mubr.msk.f32.vlgmr.msra.gmra.mrb[6].mxu0 %vm738_vm2, %v3416_v46  ;;  %v1974_v46 = vpop.permute.xlu0 %1973 }
 0x6a7   : > { %3062 = vmatpush3.msra.mxu0 %v1737_v31  ;;  %3063 = vmatprep.mubr.msk.f32.mxu0 %vm3239_vm1, %v3238_v8 }
 0x6a8   : > { %3071 = vmatprep.subr.mxu0 %v730_v42 }
 0x6aa   : > { %v2052_v50 = vpop.permute.xlu0 %2051 }
 0x6ae   : > { %v1972_v52 = vpop.permute.xlu0 %1971 }
 0x6b2   : > { %v2050_v57 = vpop.permute.xlu0 %2049 }
 0x6f2   : > { %v1716_v32 = vpop.xlane.xlu1 %1715 }
 0x6f3   : > { %v1720_v33 = vsub.f32 %v1632_v23, %v1716_v32 }
 0x6f5   : > { %v1722_v34 = vmul.f32 1.442695, %v1720_v33 }
 0x6f6   : > { %v1719_v35 = vpop.xlane.xlu1 %1718 }
 0x6f7   : > { %3206 = vpow2.f32 %v1722_v34  ;;  %v1721_v36 = vsub.f32 %v1710_v26, %v1719_v35 }
 0x6f9   : > { %v1724_v37 = vmul.f32 1.442695, %v1721_v36 }
 0x6fb   : > { %3208 = vpow2.f32 %v1724_v37 }
 0x701   : > { %v3207_v38 = vpop.eup %3206 }
 0x702   : > { %v1726_v39 = vsel %vm738_vm2, %v3207_v38, 0.0 }
 0x703   : > { %1727 = vadd.xlane.f32.xlu1 %v1726_v39 }
 0x705   : > { %v3209_v40 = vpop.eup %3208 }
 0x706   : > { %v1729_v41 = vsel %vm738_vm2, %v3209_v40, 0.0 }
 0x707   : > { %1730 = vadd.xlane.f32.xlu1 %v1729_v41 }
 0x718   : > { %1812 = vrot.lane.b32.xlu1 %v3365_v13, %s3247_s15  ;;  %s2922_s15 = sshll.u32 %s3589_s26, 6 }
 0x719   : > { %s3524_s18 = scalar_lea.vmem %s3583_s9, %s2922_s15 }
 0x790   : > { %v1728_v43 = vpop.xlane.xlu1 %1727 }
 0x791   : > { %3210 = vrcp.f32 %v1728_v43  ;;  %v2440_v43 = vld [vmem:[%s610_s14 + $0x8] sm:$0xff] }
 0x794   : > { %v1731_v44 = vpop.xlane.xlu1 %1730 }
 0x795   : > { %3212 = vrcp.f32 %v1731_v44 }
 0x798   : > { %v1813_v45 = vpop.permute.xlu1 %1812 }
 0x799   : > { %3067 = vmatpush3.msra.mxu1 %v1813_v45  ;;  %v2441_v45 = vld [vmem:[%s610_s14 + $0x10] sm:$0xff] }
 0x79a   : > { %3076 = vmatprep.subr.mxu1 %v3238_v8 }
 0x79b   : > { %v3211_v47 = vpop.eup %3210 }
 0x79c   : > { %v1734_v48 = vmul.f32 %v3211_v47, %v3207_v38 }
 0x79e   : > { %3064 = vmatmul.mubr.msk.f32.vlgmr.msra.gmra.mrb[8].mxu0 %vm738_vm2, %v1734_v48  ;;  %v2533_v48 = vld [vmem:[%s3524_s18] sm:$0xff] }
 0x79f   : > { %v3213_v49 = vpop.eup %3212  ;;  %3072 = vmatpush3.msra.mxu0 %v730_v42  ;;  %v2439_v42 = vld [vmem:[%s610_s14] sm:$0xff] }
 0x7a0   : > { %v1735_v51 = vmul.f32 %v3213_v49, %v3209_v40  ;;  %3081 = vmatprep.subr.mxu0 %v3238_v8  ;;  %v3139_v44 = vpack.c.bf16 %v2440_v43, %v2439_v42  ;;  %v2534_v49 = vld [vmem:[%s3524_s18 + $0x8] sm:$0xff] }
 0x7a2   : > { %3069 = vmatmul.mubr.msk.f32.vlgmr.msra.gmra.mrb[16].mxu1 %vm738_vm2, %v1735_v51  ;;  %v3147_v51 = vpack.c.bf16 %v2534_v49, %v2533_v48 }
 0x7a3   : > { %3077 = vmatpush3.xpose.msk.msra.mxu1 %vm738_vm2, %v1974_v46  ;;  %3078 = vmatprep.mubr.msk.f32.mxu1 %vm3239_vm1, %v3238_v8  ;;  %v2442_v46 = vld [vmem:[%s610_s14 + $0x18] sm:$0xff] }
 0x7a4   : > { %3086 = vmatprep.subr.mxu1 %v3238_v8  ;;  %v3143_v47 = vpack.c.bf16 %v2442_v46, %v2441_v45  ;;  %v2914_v45 = vld [vmem:[%s624_s27] ss:$0 sm:$0xff] }
 0x7a6   : > { %3079 = vmatmul.mubr.msk.f32.vlgmr.msra.gmra.mrb[18].mxu1 %vm738_vm2, %v1972_v52  ;;  %v2536_v52 = vld [vmem:[%s3524_s18 + $0x18] sm:$0xff] }
 0x7a7   : > { %3088 = vmatprep.mubr.msk.f32.mxu1 %vm3239_vm1, %v3238_v8 }
 0x871   : > { %v1808_v53 = vpop.f32.mrb[8].mxu0 }
 0x872   : > { %v3065_v54 = vpop.f32.mrb[9].mxu0  ;;  %3073 = vmatprep.mubr.msk.f32.mxu0 %vm738_vm2, %v1808_v53 }
 0x873   : > { %v2537_v54 = vld [vmem:[%s3524_s18 + $0x20] sm:$0xff] }
 0x875   : > { %v1884_v55 = vpop.f32.mrb[16].mxu1 }
 0x876   : > { %v3070_v56 = vpop.f32.mrb[17].mxu1  ;;  %3074 = vmatmul.mubr.msk.f32.vlgmr.msra.gmra.mrb[6].mxu0 %vm738_vm2, %v1884_v55  ;;  %v2538_v55 = vld [vmem:[%s3524_s18 + $0x28] sm:$0xff] }
 0x877   : > { %3082 = vmatpush3.xpose.msk.msra.mxu0 %vm738_vm2, %v2052_v50  ;;  %3083 = vmatprep.mubr.msk.f32.mxu0 %vm3239_vm1, %v3238_v8  ;;  %v2535_v50 = vld [vmem:[%s3524_s18 + $0x10] sm:$0xff]  ;;  %v3155_v56 = vpack.c.bf16 %v2538_v55, %v2537_v54 }
 0x878   : > { %3091 = vmatprep.subr.mxu0 %v3238_v8  ;;  %v3151_v53 = vpack.c.bf16 %v2536_v52, %v2535_v50 }
 0x879   : > { %v2045_v58 = vpop.f32.mrb[18].mxu1 }
 0x87a   : > { %v3080_v59 = vpop.f32.mrb[19].mxu1  ;;  %3084 = vmatmul.mubr.msk.f32.vlgmr.msra.gmra.mrb[10].mxu0 %vm738_vm2, %v2050_v57  ;;  %v2127_v60 = vsel %vm738_vm2, %v2045_v58, -inf }
 0x87b   : > { %2128 = vmax.xlane.f32.xlu1 %v2127_v60  ;;  %3093 = vmatprep.mubr.msk.f32.mxu0 %vm3239_vm1, %v3238_v8 }
 0x908   : > { %v2129_v61 = vpop.xlane.xlu1 %2128 }
 0x909   : > { %v2133_v62 = vsub.f32 %v2045_v58, %v2129_v61 }
 0x90b   : > { %v2135_v63 = vmul.f32 1.442695, %v2133_v62 }
 0x90d   : > { %3214 = vpow2.f32 %v2135_v63 }
 0x917   : > { %v3215_v3 = vpop.eup %3214 }
 0x918   : > { %v2139_v4 = vsel %vm738_vm2, %v3215_v3, 0.0 }
 0x94d   : > { %v2123_v0 = vpop.f32.mrb[10].mxu0 }
 0x94e   : > { %v3085_v1 = vpop.f32.mrb[11].mxu0  ;;  %v2130_v2 = vsel %vm738_vm2, %v2123_v0, -inf }
 0x94f   : > { %2131 = vmax.xlane.f32.xlu0 %v2130_v2 }
 0x953   : > { %2140 = vadd.xlane.f32.xlu0 %v2139_v4  ;;  %v2907_v4 = vld [vmem:[%s605_s23] ss:$0 sm:$0xff] }
 0x969   : > { %2149 = vrot.lane.b32.xlu0 %v3362_v12, %s3250_s21 }
 0x9dc   : > { %v2132_v6 = vpop.xlane.xlu0 %2131 }
 0x9dd   : > { %v2134_v9 = vsub.f32 %v2123_v0, %v2132_v6  ;;  %v2906_v0 = vld [vmem:[%s602_s20] ss:$0 sm:$0xff] }
 0x9df   : > { %v2137_v8 = vmul.f32 1.442695, %v2134_v9 }
 0x9e0   : > { %v2141_v10 = vpop.xlane.xlu0 %2140 }
 0x9e1   : > { %3216 = vpow2.f32 %v2137_v8 }
 0x9e2   : > { %3218 = vrcp.f32 %v2141_v10 }
 0x9e4   : > { %v2150_v11 = vpop.permute.xlu0 %2149 }
 0x9e5   : > { %3087 = vmatpush3.msra.mxu1 %v2150_v11  ;;  %v2539_v11 = vld [vmem:[%s3524_s18 + $0x30] sm:$0xff] }
 0x9e6   : > { %3140 = vmatprep.subr.bf16.mxu1 %v3139_v44 }
 0x9eb   : > { %v3217_v15 = vpop.eup %3216 }
 0x9ec   : > { %v3219_v14 = vpop.eup %3218  ;;  %v2142_v16 = vsel %vm738_vm2, %v3217_v15, 0.0 }
 0x9ed   : > { %v2147_v17 = vmul.f32 %v3219_v14, %v3215_v3  ;;  %2143 = vadd.xlane.f32.xlu1 %v2142_v16  ;;  %v2908_v16 = vld [vmem:[%s613_s30] ss:$0 sm:$0xff] }
 0x9ef   : > { %3089 = vmatmul.mubr.msk.f32.vlgmr.msra.gmra.mrb[20].mxu1 %vm738_vm2, %v2147_v17 }
 0x9f0   : > { %3142 = vmatpush3.bf16.msra.mxu1 %v3139_v44 }
 0x9f1   : > { %3144 = vmatprep.subr.bf16.mxu1 %v3143_v47 }
 0x9f4   : > { %3146 = vmatpush3.bf16.msra.mxu1 %v3143_v47 }
 0x9fe   : > { %2225 = vrot.lane.b32.xlu1 %v3365_v13, %s3250_s21  ;;  %v2905_v13 = vld [vmem:[%s599_s24] ss:$0 sm:$0xff]  ;;  %s627_s21 = scalar_lea.vmem %s3586_s12, %s3589_s26  ;;  %s632_s24 = scalar_lea.vmem %s3587_s13, %s2918_s28 }
 0x9ff   : > { %v2915_v48 = vld [vmem:[%s627_s21] ss:$0 sm:$0xff] }
 0xa7a   : > { %v2144_v12 = vpop.xlane.xlu1 %2143 }
 0xa7b   : > { %3220 = vrcp.f32 %v2144_v12 }
 0xa7e   : > { %v2226_v19 = vpop.permute.xlu1 %2225 }
 0xa7f   : > { %3092 = vmatpush3.msra.mxu0 %v2226_v19 }
 0xa80   : > { %3096 = vmatprep.subr.mxu0 %v731_v18 }
 0xa85   : > { %v3221_v20 = vpop.eup %3220 }
 0xa86   : > { %v2148_v21 = vmul.f32 %v3221_v20, %v3217_v15  ;;  %v2540_v15 = vld [vmem:[%s3524_s18 + $0x38] sm:$0xff] }
 0xa87   : > { %v3159_v14 = vpack.c.bf16 %v2540_v15, %v2539_v11 }
 0xa88   : > { %3094 = vmatmul.mubr.msk.f32.vlgmr.msra.gmra.mrb[12].mxu0 %vm738_vm2, %v2148_v21 }
 0xa89   : > { %3097 = vmatpush3.msra.mxu0 %v731_v18 }
 0xa8a   : > { %3148 = vmatprep.subr.bf16.mxu0 %v3147_v51 }
 0xac2   : > { %v2221_v22 = vpop.f32.mrb[20].mxu1 }
 0xac3   : > { %v3090_v23 = vpop.f32.mrb[21].mxu1  ;;  %3098 = vmatprep.mubr.msk.f32.mxu0 %vm738_vm2, %v2221_v22  ;;  %v2911_v22 = vld [vmem:[%s621_s16] ss:$0 sm:$0xff] }
 0xb5b   : > { %v2297_v24 = vpop.f32.mrb[12].mxu0 }
 0xb5c   : > { %v3095_v25 = vpop.f32.mrb[13].mxu0  ;;  %3099 = vmatmul.mubr.msk.f32.vlgmr.msra.gmra.mrb[6].mxu0 %vm738_vm2, %v2297_v24 }
 0xb5d   : > { %3150 = vmatpush3.bf16.msra.mxu0 %v3147_v51 }
 0xb5e   : > { %3152 = vmatprep.subr.bf16.mxu0 %v3151_v53 }
 0xb61   : > { %3154 = vmatpush3.bf16.msra.mxu0 %v3151_v53 }
 0xb62   : > { %3156 = vmatprep.subr.bf16.mxu0 %v3155_v56 }
 0xb65   : > { %3158 = vmatpush3.bf16.msra.mxu0 %v3155_v56 }
 0xb66   : > { %3160 = vmatprep.subr.bf16.mxu0 %v3159_v14 }
 0xb69   : > { %3162 = vmatpush3.bf16.msra.mxu0 %v3159_v14 }
 0xc2f   : > { %v3100_v26 = vpop.f32.mrb[6].mxu0 }
 0xc30   : > { %v2391_v27 = vadd.f32 %v3100_v26, %v2905_v13  ;;  %v2373_v28 = vpop.f32.mrb[7].mxu0 }
 0xc31   : > { %v2390_v29 = vadd.f32 %v2905_v13, %v2373_v28 }
 0xc32   : > { %v2393_v30 = vadd.f32 %v2391_v27, %v3348_v7 }
 0xc33   : > { %v2392_v31 = vadd.f32 %v2390_v29, %v3344_v5 }
 0xc34   : > { %v2399_v32 = vsel %vm646_vm0, %v2393_v30, 0.0 }
 0xc35   : > { %2400 = vadd.xlane.f32.xlu0 %v2399_v32  ;;  %v2396_v33 = vsel %vm646_vm0, %v2392_v31, 0.0 }
 0xc36   : > { %2397 = vadd.xlane.f32.xlu1 %v2396_v33 }
 0xcc2   : > { %v2401_v34 = vpop.xlane.xlu0 %2400 }
 0xcc3   : > { %v2404_v35 = vmul.f32 0.03125, %v2401_v34  ;;  %v2398_v36 = vpop.xlane.xlu1 %2397 }
 0xcc4   : > { %v2403_v37 = vmul.f32 0.03125, %v2398_v36 }
 0xcc5   : > { %v2406_v38 = vsub.f32 %v2393_v30, %v2404_v35 }
 0xcc6   : > { %v2405_v39 = vsub.f32 %v2392_v31, %v2403_v37 }
 0xcc7   : > { %v2408_v40 = vmul.f32 %v2406_v38, %v2406_v38 }
 0xcc8   : > { %v2407_v41 = vmul.f32 %v2405_v39, %v2405_v39 }
 0xcc9   : > { %v2412_v7 = vsel %vm646_vm0, %v2408_v40, 0.0 }
 0xcca   : > { %2413 = vadd.xlane.f32.xlu1 %v2412_v7  ;;  %v2409_v5 = vsel %vm646_vm0, %v2407_v41, 0.0 }
 0xccb   : > { %2410 = vadd.xlane.f32.xlu0 %v2409_v5 }
 0xd57   : > { %v2414_v57 = vpop.xlane.xlu1 %2413 }
 0xd58   : > { %v2416_v58 = vmul.f32 0.03125, %v2414_v57  ;;  %v2411_v59 = vpop.xlane.xlu0 %2410 }
 0xd59   : > { %v2415_v60 = vmul.f32 0.03125, %v2411_v59 }
 0xd5a   : > { %v2418_v61 = vadd.f32 1e-05, %v2416_v58 }
 0xd5b   : > { %v2417_v62 = vadd.f32 1e-05, %v2415_v60 }
 0xd5c   : > { %3222 = vrsqrt.f32 %v2418_v61 }
 0xd5d   : > { %3224 = vrsqrt.f32 %v2417_v62 }
 0xd66   : > { %v3223_v63 = vpop.eup %3222 }
 0xd67   : > { %v3225_v1 = vpop.eup %3224  ;;  %v2422_v2 = vmul.f32 %v3223_v63, %v2406_v38 }
 0xd68   : > { %v2421_v3 = vmul.f32 %v3225_v1, %v2405_v39 }
 0xd69   : > { %v2430_v6 = vmul.f32 %v2906_v0, %v2422_v2 }
 0xd6a   : > { %v2429_v9 = vmul.f32 %v2906_v0, %v2421_v3 }
 0xd6b   : > { %v2438_v10 = vadd.f32 %v2907_v4, %v2430_v6 }
 0xd6c   : > { %v2437_v8 = vadd.f32 %v2907_v4, %v2429_v9 }
 0xd6e   : > { %3109 = vmatprep.mubr.msk.f32.mxu1 %vm646_vm0, %v2437_v8 }
 0xd6f   : > { %3110 = vmatmul.mubr.msk.f32.vlgmr.msra.gmra.mrb[22].mxu1 %vm646_vm0, %v2438_v10 }
 0xe42   : > { %v3111_v17 = vpop.f32.mrb[22].mxu1 }
 0xe43   : > { %v2528_v12 = vadd.f32 %v3111_v17, %v2908_v16  ;;  %v2522_v18 = vpop.f32.mrb[23].mxu1 }
 0xe44   : > { %v2523_v19 = vadd.f32 %v2908_v16, %v2522_v18 }
 0xe45   : > { %v2532_v21 = vmax.f32 %v2528_v12, 0.0 }
 0xe46   : > { %v2531_v20 = vmax.f32 %v2523_v19, 0.0 }
 0xe48   : > { %3128 = vmatprep.mubr.msk.f32.mxu0 %vm2548_vm3, %v2531_v20 }
 0xe49   : > { %3129 = vmatmul.mubr.msk.f32.vlgmr.msra.gmra.mrb[14].mxu0 %vm2548_vm3, %v2532_v21 }
 0xf1c   : > { %v3130_v23 = vpop.f32.mrb[14].mxu0 }
 0xf1d   : > { %v2627_v24 = vadd.f32 %v3130_v23, %v2911_v22  ;;  %v2621_v25 = vpop.f32.mrb[15].mxu0 }
 0xf1e   : > { %v2622_v13 = vadd.f32 %v2911_v22, %v2621_v25 }
 0xf1f   : > { %v2631_v26 = vadd.f32 %v2627_v24, %v2438_v10 }
 0xf20   : > { %v2630_v27 = vadd.f32 %v2622_v13, %v2437_v8 }
 0xf21   : > { %v2637_v28 = vsel %vm646_vm0, %v2631_v26, 0.0 }
 0xf22   : > { %2638 = vadd.xlane.f32.xlu1 %v2637_v28  ;;  %v2634_v29 = vsel %vm646_vm0, %v2630_v27, 0.0 }
 0xf23   : > { %2635 = vadd.xlane.f32.xlu0 %v2634_v29 }
 0xfaf   : > { %v2639_v30 = vpop.xlane.xlu1 %2638 }
 0xfb0   : > { %v2641_v31 = vmul.f32 0.03125, %v2639_v30  ;;  %v2636_v32 = vpop.xlane.xlu0 %2635 }
 0xfb1   : > { %v2640_v33 = vmul.f32 0.03125, %v2636_v32 }
 0xfb2   : > { %v2643_v34 = vsub.f32 %v2631_v26, %v2641_v31 }
 0xfb3   : > { %v2642_v35 = vsub.f32 %v2630_v27, %v2640_v33 }
 0xfb4   : > { %v2645_v36 = vmul.f32 %v2643_v34, %v2643_v34 }
 0xfb5   : > { %v2644_v37 = vmul.f32 %v2642_v35, %v2642_v35 }
 0xfb6   : > { %v2649_v38 = vsel %vm646_vm0, %v2645_v36, 0.0 }
 0xfb7   : > { %2650 = vadd.xlane.f32.xlu1 %v2649_v38  ;;  %v2646_v39 = vsel %vm646_vm0, %v2644_v37, 0.0 }
 0xfb8   : > { %2647 = vadd.xlane.f32.xlu0 %v2646_v39 }
0x1044   : > { %v2651_v40 = vpop.xlane.xlu1 %2650 }
0x1045   : > { %v2653_v41 = vmul.f32 0.03125, %v2651_v40  ;;  %v2648_v7 = vpop.xlane.xlu0 %2647 }
0x1046   : > { %v2652_v5 = vmul.f32 0.03125, %v2648_v7 }
0x1047   : > { %v2655_v42 = vadd.f32 1e-05, %v2653_v41 }
0x1048   : > { %v2654_v43 = vadd.f32 1e-05, %v2652_v5 }
0x1049   : > { %3226 = vrsqrt.f32 %v2655_v42 }
0x104a   : > { %3228 = vrsqrt.f32 %v2654_v43 }
0x1053   : > { %v3227_v44 = vpop.eup %3226 }
0x1054   : > { %v3229_v46 = vpop.eup %3228  ;;  %v2659_v47 = vmul.f32 %v3227_v44, %v2643_v34 }
0x1055   : > { %v2658_v49 = vmul.f32 %v3229_v46, %v2642_v35 }
0x1056   : > { %v2667_v50 = vmul.f32 %v2914_v45, %v2659_v47 }
0x1057   : > { %v2666_v51 = vmul.f32 %v2914_v45, %v2658_v49 }
0x1058   : > { %v2675_v52 = vadd.f32 %v2915_v48, %v2667_v50 }
0x1059   : > { %v2674_v53 = vadd.f32 %v2915_v48, %v2666_v51 }
0x105a   : > { %2677 = vst.msk [vmem:[%s632_s24 + $0x8] sm:$0xff] %vm646_vm0, %v2675_v52 }
0x105b   : > { %2676 = vst.msk [vmem:[%s632_s24] sm:$0xff] %vm646_vm0, %v2674_v53 }
0x105c PF: > { %s23_s25 = sadd.s32 1, %s3236_s25  }
0x105d   : > { %p20_p4 = scmp.ge.s32.totalorder %s23_s25, 5  }
0x105f   :  { %22 = sbr.rel (!%p20_p4) target bundleno = 1 (0x1), region = 138 }

</bundles_post_ra>
